<compile_context>
chip_gen: v5e
topology: v5e:2x2
jax: 0.10.0
libtpu: 0.0.40
codegen_flags: <defaults>
</compile_context>

<pallas_src>
import functools
import math

import jax
import jax.numpy as jnp
from jax.experimental import pallas as pl
from jax.experimental.pallas import tpu as pltpu

_NEG = -1e30   # finite stand-in for -inf (avoids NaN on fully-masked rows)
_EPS = 1e-5


# ----------------------------------------------------------------------------
# In-kernel building blocks (pure functions on values)
# ----------------------------------------------------------------------------
def _layernorm(x, g, b):
    mu = jnp.mean(x, axis=-1, keepdims=True)
    xc = x - mu
    var = jnp.mean(xc * xc, axis=-1, keepdims=True)
    return xc * jax.lax.rsqrt(var + _EPS) * g + b


def _mha(xq, xkv, wq, bq, wk, bk, wv, bv, wo, bo, mask, nhead):
    """Multi-head attention on a (Bb, Tq, E) query block / (Bb, Tk, E) kv block.

    Separate Q/K/V weights (no lane-slicing of a fused KV result); projections
    and output projection each run as one (rows, E)x(E, E) MXU dot; per-head
    score and P*V dots are batched over the batch-block.  1/sqrt(dh) is folded
    into wq.  `mask` broadcasts against (Bb, Tq, Tk)."""
    bb, tq, e = xq.shape
    tk = xkv.shape[1]
    dh = e // nhead

    xq_b = xq.astype(jnp.bfloat16).reshape(bb * tq, e)
    xkv_b = xkv.astype(jnp.bfloat16).reshape(bb * tk, e)
    q = (jnp.dot(xq_b, wq, preferred_element_type=jnp.float32) + bq
         ).reshape(bb, tq, e)
    k = (jnp.dot(xkv_b, wk, preferred_element_type=jnp.float32) + bk
         ).reshape(bb, tk, e)
    v = (jnp.dot(xkv_b, wv, preferred_element_type=jnp.float32) + bv
         ).reshape(bb, tk, e)

    heads = []
    for h in range(nhead):
        sl = slice(h * dh, (h + 1) * dh)
        qh = q[:, :, sl].astype(jnp.bfloat16)
        kh = k[:, :, sl].astype(jnp.bfloat16)
        vh = v[:, :, sl].astype(jnp.bfloat16)
        s = jnp.einsum("bqd,bkd->bqk", qh, kh,
                       preferred_element_type=jnp.float32) + mask
        s = s - jnp.max(s, axis=-1, keepdims=True)
        p = jnp.exp(s)
        p = p * pl.reciprocal(jnp.sum(p, axis=-1, keepdims=True), approx=True)
        heads.append(jnp.einsum("bqk,bkd->bqd", p.astype(jnp.bfloat16), vh,
                                preferred_element_type=jnp.float32))
    o = jnp.concatenate(heads, axis=-1)                       # (Bb, Tq, E)
    out = jnp.dot(o.astype(jnp.bfloat16).reshape(bb * tq, e), wo,
                  preferred_element_type=jnp.float32) + bo
    return out.reshape(bb, tq, e)


def _ffn(x, w1, b1, w2, b2):
    bb, t, e = x.shape
    xf = x.astype(jnp.bfloat16).reshape(bb * t, e)
    h = jnp.dot(xf, w1, preferred_element_type=jnp.float32) + b1
    h = jnp.maximum(h, 0.0)
    y = jnp.dot(h.astype(jnp.bfloat16), w2,
                preferred_element_type=jnp.float32) + b2
    return y.reshape(bb, t, e)


# ----------------------------------------------------------------------------
# Pallas kernels: whole encoder stack / whole decoder stack + generator
# ----------------------------------------------------------------------------
def _encoder_kernel(x_ref, amask_ref, kpad_ref,
                    wq_ref, bq_ref, wk_ref, bk_ref, wv_ref, bv_ref,
                    wo_ref, bo_ref, ln1g_ref, ln1b_ref,
                    w1_ref, b1_ref, w2_ref, b2_ref, ln2g_ref, ln2b_ref,
                    fng_ref, fnb_ref,
                    mem_ref, *, nhead, num_layers):
    x = x_ref[...].astype(jnp.float32)                        # (Bb, S, E)
    amask = jnp.maximum(amask_ref[...], _NEG)                 # (S, S)
    kpad = kpad_ref[...]                                      # (Bb, 1, S)
    mask = jnp.maximum(
        amask[None, :, :] + jnp.where(kpad > 0.5, _NEG, 0.0), _NEG)

    for l in range(num_layers):
        attn = _mha(x, x, wq_ref[l], bq_ref[l], wk_ref[l], bk_ref[l],
                    wv_ref[l], bv_ref[l], wo_ref[l], bo_ref[l], mask, nhead)
        x = _layernorm(x + attn, ln1g_ref[l], ln1b_ref[l])
        ff = _ffn(x, w1_ref[l], b1_ref[l], w2_ref[l], b2_ref[l])
        x = _layernorm(x + ff, ln2g_ref[l], ln2b_ref[l])

    x = _layernorm(x, fng_ref[...], fnb_ref[...])             # encoder.norm
    mem_ref[...] = x.astype(mem_ref.dtype)                    # bf16 memory


def _decoder_kernel(y_ref, mem_ref, amask_ref, tkpad_ref, mkpad_ref,
                    swq_ref, sbq_ref, swk_ref, sbk_ref, swv_ref, sbv_ref,
                    swo_ref, sbo_ref, ln1g_ref, ln1b_ref,
                    cwq_ref, cbq_ref, cwk_ref, cbk_ref, cwv_ref, cbv_ref,
                    cwo_ref, cbo_ref, ln2g_ref, ln2b_ref,
                    w1_ref, b1_ref, w2_ref, b2_ref, ln3g_ref, ln3b_ref,
                    fng_ref, fnb_ref, gw_ref, gb_ref,
                    out_ref, *, nhead, num_layers):
    y = y_ref[...].astype(jnp.float32)                        # (Bb, T, E)
    mem = mem_ref[...]                                        # (Bb, S, E) bf16
    amask = jnp.maximum(amask_ref[...], _NEG)                 # (T, T) causal
    tkpad = tkpad_ref[...]                                    # (Bb, 1, T)
    self_mask = jnp.maximum(
        amask[None, :, :] + jnp.where(tkpad > 0.5, _NEG, 0.0), _NEG)
    cross_mask = jnp.where(mkpad_ref[...] > 0.5, _NEG, 0.0)   # (Bb, 1, S)

    for l in range(num_layers):
        attn = _mha(y, y, swq_ref[l], sbq_ref[l], swk_ref[l], sbk_ref[l],
                    swv_ref[l], sbv_ref[l], swo_ref[l], sbo_ref[l],
                    self_mask, nhead)
        y = _layernorm(y + attn, ln1g_ref[l], ln1b_ref[l])
        attn = _mha(y, mem, cwq_ref[l], cbq_ref[l], cwk_ref[l], cbk_ref[l],
                    cwv_ref[l], cbv_ref[l], cwo_ref[l], cbo_ref[l],
                    cross_mask, nhead)
        y = _layernorm(y + attn, ln2g_ref[l], ln2b_ref[l])
        ff = _ffn(y, w1_ref[l], b1_ref[l], w2_ref[l], b2_ref[l])
        y = _layernorm(y + ff, ln3g_ref[l], ln3b_ref[l])

    y = _layernorm(y, fng_ref[...], fnb_ref[...])             # decoder.norm
    bb, t, e = y.shape
    vpad = gw_ref.shape[1]
    # Lane-dense (Vpad multiple of 128) generator.  At real vocab sizes split
    # this into its own pallas_call tiled over the vocab dim ("parallel").
    logits = jnp.dot(y.astype(jnp.bfloat16).reshape(bb * t, e), gw_ref[...],
                     preferred_element_type=jnp.float32) + gb_ref[...]
    out_ref[...] = logits.reshape(bb, t, vpad).astype(out_ref.dtype)


# ----------------------------------------------------------------------------
# BlockSpec helpers + kernel wrappers
# ----------------------------------------------------------------------------
def _const_spec(a):
    zeros = (0,) * a.ndim
    return pl.BlockSpec(a.shape, lambda i: zeros)


def _batch_spec(a, bb):
    rest = (0,) * (a.ndim - 1)
    return pl.BlockSpec((bb,) + tuple(a.shape[1:]), lambda i: (i,) + rest)


def encoder_forward(enc, x_emb, src_mask, src_kpad, *, nhead, block_b):
    b, s, e = x_emb.shape
    assert b % block_b == 0
    num_layers = enc["wq"].shape[0]
    kern = functools.partial(_encoder_kernel, nhead=nhead, num_layers=num_layers)
    ops = [x_emb, src_mask, src_kpad,
           enc["wq"], enc["bq"], enc["wk"], enc["bk"], enc["wv"], enc["bv"],
           enc["wo"], enc["bo"], enc["ln1_g"], enc["ln1_b"],
           enc["w1"], enc["b1"], enc["w2"], enc["b2"],
           enc["ln2_g"], enc["ln2_b"], enc["norm_g"], enc["norm_b"]]
    in_specs = [_batch_spec(x_emb, block_b), _const_spec(src_mask),
                _batch_spec(src_kpad, block_b)]
    in_specs += [_const_spec(a) for a in ops[3:]]
    return pl.pallas_call(
        kern,
        grid=(b // block_b,),
        in_specs=in_specs,
        out_specs=pl.BlockSpec((block_b, s, e), lambda i: (i, 0, 0)),
        out_shape=jax.ShapeDtypeStruct((b, s, e), jnp.bfloat16),
        compiler_params=pltpu.CompilerParams(
            dimension_semantics=("parallel",),
            vmem_limit_bytes=32 * 1024 * 1024),
    )(*ops)


def decoder_forward(dec, y_emb, memory, tgt_mask, tgt_kpad, mem_kpad,
                    *, nhead, block_b):
    b, t, e = y_emb.shape
    assert b % block_b == 0
    num_layers = dec["s_wq"].shape[0]
    vpad = dec["gen_w"].shape[1]
    kern = functools.partial(_decoder_kernel, nhead=nhead, num_layers=num_layers)
    ops = [y_emb, memory, tgt_mask, tgt_kpad, mem_kpad,
           dec["s_wq"], dec["s_bq"], dec["s_wk"], dec["s_bk"],
           dec["s_wv"], dec["s_bv"], dec["s_wo"], dec["s_bo"],
           dec["ln1_g"], dec["ln1_b"],
           dec["c_wq"], dec["c_bq"], dec["c_wk"], dec["c_bk"],
           dec["c_wv"], dec["c_bv"], dec["c_wo"], dec["c_bo"],
           dec["ln2_g"], dec["ln2_b"],
           dec["w1"], dec["b1"], dec["w2"], dec["b2"],
           dec["ln3_g"], dec["ln3_b"],
           dec["norm_g"], dec["norm_b"], dec["gen_w"], dec["gen_b"]]
    in_specs = [_batch_spec(y_emb, block_b), _batch_spec(memory, block_b),
                _const_spec(tgt_mask), _batch_spec(tgt_kpad, block_b),
                _batch_spec(mem_kpad, block_b)]
    in_specs += [_const_spec(a) for a in ops[5:]]
    return pl.pallas_call(
        kern,
        grid=(b // block_b,),
        in_specs=in_specs,
        out_specs=pl.BlockSpec((block_b, t, vpad), lambda i: (i, 0, 0)),
        out_shape=jax.ShapeDtypeStruct((b, t, vpad), jnp.float32),
        compiler_params=pltpu.CompilerParams(
            dimension_semantics=("parallel",),
            vmem_limit_bytes=32 * 1024 * 1024),
    )(*ops)


# ----------------------------------------------------------------------------
# Forward pass (JAX glue: embedding gather, mask prep, final slice/transpose)
# ----------------------------------------------------------------------------
def seq2seq_forward(params, src, trg, src_mask, tgt_mask,
                    src_padding_mask, tgt_padding_mask, memory_key_padding_mask,
                    *, nhead, tgt_vocab, block_b=1):
    e = params["src_emb"].shape[1]
    s, t = src.shape[0], trg.shape[0]
    scale = math.sqrt(e)

    # TokenEmbedding * sqrt(E) + PositionalEncoding; the (seq,batch)->(batch,seq)
    # layout change is folded into the gather (index with src.T / trg.T).
    x = params["src_emb"][src.T] * scale + params["pos"][:s][None, :, :]  # (B,S,E)
    y = params["tgt_emb"][trg.T] * scale + params["pos"][:t][None, :, :]  # (B,T,E)

    src_kpad = src_padding_mask.astype(jnp.float32)[:, None, :]   # (B,1,S)
    tgt_kpad = tgt_padding_mask.astype(jnp.float32)[:, None, :]   # (B,1,T)
    mem_kpad = memory_key_padding_mask.astype(jnp.float32)[:, None, :]

    memory = encoder_forward(params["enc"], x, src_mask, src_kpad,
                             nhead=nhead, block_b=block_b)        # (B,S,E) bf16
    logits = decoder_forward(params["dec"], y, memory, tgt_mask,
                             tgt_kpad, mem_kpad,
                             nhead=nhead, block_b=block_b)        # (B,T,Vpad)
    return logits[:, :, :tgt_vocab].transpose(1, 0, 2)            # (T,B,V)


# ----------------------------------------------------------------------------
# Deterministic parameter initialization (stacked per-layer weights)
# ----------------------------------------------------------------------------
def _dense(key, shape, std=0.02):
    return jax.random.normal(key, shape, jnp.float32) * std


def init_attn_stack(key, num_layers, e, nhead):
    dh = e // nhead
    ks = jax.random.split(key, 4)
    z = lambda *shape: jnp.zeros(shape, jnp.float32)
    return {
        # 1/sqrt(dh) attention scale folded into the Q projection weights
        "wq": (_dense(ks[0], (num_layers, e, e)) / math.sqrt(dh)).astype(jnp.bfloat16),
        "bq": z(num_layers, 1, e),
        "wk": _dense(ks[1], (num_layers, e, e)).astype(jnp.bfloat16),
        "bk": z(num_layers, 1, e),
        "wv": _dense(ks[2], (num_layers, e, e)).astype(jnp.bfloat16),
        "bv": z(num_layers, 1, e),
        "wo": _dense(ks[3], (num_layers, e, e)).astype(jnp.bfloat16),
        "bo": z(num_layers, 1, e),
    }


def init_encoder_stack(key, num_layers, e, f, nhead):
    ks = jax.random.split(key, 3)
    p = dict(init_attn_stack(ks[0], num_layers, e, nhead))
    p["w1"] = _dense(ks[1], (num_layers, e, f)).astype(jnp.bfloat16)
    p["b1"] = jnp.zeros((num_layers, 1, f), jnp.float32)
    p["w2"] = _dense(ks[2], (num_layers, f, e)).astype(jnp.bfloat16)
    p["b2"] = jnp.zeros((num_layers, 1, e), jnp.float32)
    ones = jnp.ones((num_layers, 1, e), jnp.float32)
    zeros = jnp.zeros((num_layers, 1, e), jnp.float32)
    p["ln1_g"], p["ln1_b"] = ones, zeros
    p["ln2_g"], p["ln2_b"] = ones, zeros
    p["norm_g"] = jnp.ones((1, e), jnp.float32)
    p["norm_b"] = jnp.zeros((1, e), jnp.float32)
    return p


def init_decoder_stack(key, num_layers, e, f, nhead, tgt_vocab):
    ks = jax.random.split(key, 5)
    p = {}
    for pfx, k in (("s_", ks[0]), ("c_", ks[1])):
        for name, val in init_attn_stack(k, num_layers, e, nhead).items():
            p[pfx + name] = val
    p["w1"] = _dense(ks[2], (num_layers, e, f)).astype(jnp.bfloat16)
    p["b1"] = jnp.zeros((num_layers, 1, f), jnp.float32)
    p["w2"] = _dense(ks[3], (num_layers, f, e)).astype(jnp.bfloat16)
    p["b2"] = jnp.zeros((num_layers, 1, e), jnp.float32)
    ones = jnp.ones((num_layers, 1, e), jnp.float32)
    zeros = jnp.zeros((num_layers, 1, e), jnp.float32)
    p["ln1_g"], p["ln1_b"] = ones, zeros
    p["ln2_g"], p["ln2_b"] = ones, zeros
    p["ln3_g"], p["ln3_b"] = ones, zeros
    p["norm_g"] = jnp.ones((1, e), jnp.float32)
    p["norm_b"] = jnp.zeros((1, e), jnp.float32)
    vpad = ((tgt_vocab + 127) // 128) * 128       # lane-dense generator output
    gw = jnp.zeros((e, vpad), jnp.float32)
    gw = gw.at[:, :tgt_vocab].set(_dense(ks[4], (e, tgt_vocab)))
    p["gen_w"] = gw.astype(jnp.bfloat16)
    p["gen_b"] = jnp.zeros((1, vpad), jnp.float32)
    return p


def make_pos_encoding(emb_size, maxlen=64):
    den = jnp.exp(-jnp.arange(0, emb_size, 2, dtype=jnp.float32)
                  * math.log(10000.0) / emb_size)
    pos = jnp.arange(0, maxlen, dtype=jnp.float32).reshape(maxlen, 1)
    pe = jnp.zeros((maxlen, emb_size), jnp.float32)
    pe = pe.at[:, 0::2].set(jnp.sin(pos * den))
    pe = pe.at[:, 1::2].set(jnp.cos(pos * den))
    return pe


def init_model(key, *, num_encoder_layers, num_decoder_layers, emb_size, nhead,
               src_vocab_size, tgt_vocab_size, dim_feedforward):
    ks = jax.random.split(key, 4)
    return {
        "src_emb": jax.random.normal(ks[0], (src_vocab_size, emb_size), jnp.float32),
        "tgt_emb": jax.random.normal(ks[1], (tgt_vocab_size, emb_size), jnp.float32),
        "pos": make_pos_encoding(emb_size),
        "enc": init_encoder_stack(ks[2], num_encoder_layers, emb_size,
                                  dim_feedforward, nhead),
        "dec": init_decoder_stack(ks[3], num_decoder_layers, emb_size,
                                  dim_feedforward, nhead, tgt_vocab_size),
    }


# ----------------------------------------------------------------------------
# Main
# ----------------------------------------------------------------------------
if __name__ == "__main__":
    NUM_ENC, NUM_DEC = 2, 2
    EMB, NHEAD, FFN = 32, 2, 64
    SRC_VOCAB, TGT_VOCAB = 50, 60
    S, T, B = 8, 8, 2

    key = jax.random.PRNGKey(0)
    k_param, k_src, k_trg = jax.random.split(key, 3)

    params = init_model(
        k_param,
        num_encoder_layers=NUM_ENC, num_decoder_layers=NUM_DEC,
        emb_size=EMB, nhead=NHEAD,
        src_vocab_size=SRC_VOCAB, tgt_vocab_size=TGT_VOCAB,
        dim_feedforward=FFN,
    )

    src = jax.random.randint(k_src, (S, B), 0, SRC_VOCAB, dtype=jnp.int32)
    trg = jax.random.randint(k_trg, (T, B), 0, TGT_VOCAB, dtype=jnp.int32)

    src_mask = jnp.zeros((S, S), jnp.float32)
    tgt_mask = jnp.where(jnp.triu(jnp.ones((T, T), bool), k=1),
                         -jnp.inf, 0.0).astype(jnp.float32)
    src_padding_mask = jnp.zeros((B, S), bool).at[1, S - 1].set(True)
    tgt_padding_mask = jnp.zeros((B, T), bool).at[1, T - 1].set(True)
    memory_key_padding_mask = src_padding_mask

    fwd = jax.jit(functools.partial(seq2seq_forward, nhead=NHEAD,
                                    tgt_vocab=TGT_VOCAB, block_b=1))
    logits = fwd(params, src, trg, src_mask, tgt_mask,
                 src_padding_mask, tgt_padding_mask, memory_key_padding_mask)
    jax.block_until_ready(logits)

    assert logits.shape == (T, B, TGT_VOCAB)
    assert bool(jnp.all(jnp.isfinite(logits)))
    print("KERNEL_OK")
</pallas_src>

<mosaic_0001>
module attributes {stable_mosaic.version = 11 : i64} {
  func.func @_encoder_kernel(%arg0: i32, %arg1: memref<1x8x32xf32, #tpu.memory_space<vmem>>, %arg2: memref<8x8xf32, #tpu.memory_space<vmem>>, %arg3: memref<1x1x8xf32, #tpu.memory_space<vmem>>, %arg4: memref<2x32x32xbf16, #tpu.memory_space<vmem>>, %arg5: memref<2x1x32xf32, #tpu.memory_space<vmem>>, %arg6: memref<2x32x32xbf16, #tpu.memory_space<vmem>>, %arg7: memref<2x1x32xf32, #tpu.memory_space<vmem>>, %arg8: memref<2x32x32xbf16, #tpu.memory_space<vmem>>, %arg9: memref<2x1x32xf32, #tpu.memory_space<vmem>>, %arg10: memref<2x32x32xbf16, #tpu.memory_space<vmem>>, %arg11: memref<2x1x32xf32, #tpu.memory_space<vmem>>, %arg12: memref<2x1x32xf32, #tpu.memory_space<vmem>>, %arg13: memref<2x1x32xf32, #tpu.memory_space<vmem>>, %arg14: memref<2x32x64xbf16, #tpu.memory_space<vmem>>, %arg15: memref<2x1x64xf32, #tpu.memory_space<vmem>>, %arg16: memref<2x64x32xbf16, #tpu.memory_space<vmem>>, %arg17: memref<2x1x32xf32, #tpu.memory_space<vmem>>, %arg18: memref<2x1x32xf32, #tpu.memory_space<vmem>>, %arg19: memref<2x1x32xf32, #tpu.memory_space<vmem>>, %arg20: memref<1x32xf32, #tpu.memory_space<vmem>>, %arg21: memref<1x32xf32, #tpu.memory_space<vmem>>, %arg22: memref<1x8x32xbf16, #tpu.memory_space<vmem>>) attributes {dimension_semantics = [#tpu.dimension_semantics<parallel>], iteration_bounds = array<i64: 2>, scalar_prefetch = 0 : i64, scratch_operands = 0 : i64, tpu.core_type = #tpu.core_type<tc>, window_params = [{transform_indices = @transform_0, window_bounds = array<i64: 1, 8, 32>}, {pipeline_mode = #tpu.pipeline_mode<synchronous>, transform_indices = @transform_1, window_bounds = array<i64: 8, 8>}, {transform_indices = @transform_2, window_bounds = array<i64: 1, 1, 8>}, {pipeline_mode = #tpu.pipeline_mode<synchronous>, transform_indices = @transform_3, window_bounds = array<i64: 2, 32, 32>}, {pipeline_mode = #tpu.pipeline_mode<synchronous>, transform_indices = @transform_4, window_bounds = array<i64: 2, 1, 32>}, {pipeline_mode = #tpu.pipeline_mode<synchronous>, transform_indices = @transform_5, window_bounds = array<i64: 2, 32, 32>}, {pipeline_mode = #tpu.pipeline_mode<synchronous>, transform_indices = @transform_6, window_bounds = array<i64: 2, 1, 32>}, {pipeline_mode = #tpu.pipeline_mode<synchronous>, transform_indices = @transform_7, window_bounds = array<i64: 2, 32, 32>}, {pipeline_mode = #tpu.pipeline_mode<synchronous>, transform_indices = @transform_8, window_bounds = array<i64: 2, 1, 32>}, {pipeline_mode = #tpu.pipeline_mode<synchronous>, transform_indices = @transform_9, window_bounds = array<i64: 2, 32, 32>}, {pipeline_mode = #tpu.pipeline_mode<synchronous>, transform_indices = @transform_10, window_bounds = array<i64: 2, 1, 32>}, {pipeline_mode = #tpu.pipeline_mode<synchronous>, transform_indices = @transform_11, window_bounds = array<i64: 2, 1, 32>}, {pipeline_mode = #tpu.pipeline_mode<synchronous>, transform_indices = @transform_12, window_bounds = array<i64: 2, 1, 32>}, {pipeline_mode = #tpu.pipeline_mode<synchronous>, transform_indices = @transform_13, window_bounds = array<i64: 2, 32, 64>}, {pipeline_mode = #tpu.pipeline_mode<synchronous>, transform_indices = @transform_14, window_bounds = array<i64: 2, 1, 64>}, {pipeline_mode = #tpu.pipeline_mode<synchronous>, transform_indices = @transform_15, window_bounds = array<i64: 2, 64, 32>}, {pipeline_mode = #tpu.pipeline_mode<synchronous>, transform_indices = @transform_16, window_bounds = array<i64: 2, 1, 32>}, {pipeline_mode = #tpu.pipeline_mode<synchronous>, transform_indices = @transform_17, window_bounds = array<i64: 2, 1, 32>}, {pipeline_mode = #tpu.pipeline_mode<synchronous>, transform_indices = @transform_18, window_bounds = array<i64: 2, 1, 32>}, {pipeline_mode = #tpu.pipeline_mode<synchronous>, transform_indices = @transform_19, window_bounds = array<i64: 1, 32>}, {pipeline_mode = #tpu.pipeline_mode<synchronous>, transform_indices = @transform_20, window_bounds = array<i64: 1, 32>}, {transform_indices = @transform_21, window_bounds = array<i64: 1, 8, 32>}]} {
    %c0 = arith.constant 0 : index
    %c0_0 = arith.constant 0 : index
    %c0_1 = arith.constant 0 : index
    %0 = vector.load %arg1[%c0, %c0_0, %c0_1] : memref<1x8x32xf32, #tpu.memory_space<vmem>>, vector<1x8x32xf32>
    %c0_2 = arith.constant 0 : index
    %c0_3 = arith.constant 0 : index
    %1 = vector.load %arg2[%c0_2, %c0_3] : memref<8x8xf32, #tpu.memory_space<vmem>>, vector<8x8xf32>
    %cst = arith.constant -1.000000e+30 : f32
    %2 = vector.broadcast %cst : f32 to vector<8x8xf32>
    %3 = arith.maximumf %1, %2 : vector<8x8xf32>
    %c0_4 = arith.constant 0 : index
    %c0_5 = arith.constant 0 : index
    %c0_6 = arith.constant 0 : index
    %4 = vector.load %arg3[%c0_4, %c0_5, %c0_6] : memref<1x1x8xf32, #tpu.memory_space<vmem>>, vector<1x1x8xf32>
    %5 = vector.shape_cast %3 : vector<8x8xf32> to vector<1x8x8xf32>
    %cst_7 = arith.constant 5.000000e-01 : f32
    %6 = vector.broadcast %cst_7 : f32 to vector<1x1x8xf32>
    %7 = arith.cmpf ogt, %4, %6 : vector<1x1x8xf32>
    %cst_8 = arith.constant -1.000000e+30 : f32
    %cst_9 = arith.constant 0.000000e+00 : f32
    %8 = vector.broadcast %cst_8 : f32 to vector<1x1x8xf32>
    %9 = vector.broadcast %cst_9 : f32 to vector<1x1x8xf32>
    %10 = arith.select %7, %8, %9 : vector<1x1x8xi1>, vector<1x1x8xf32>
    %11 = vector.broadcast %10 : vector<1x1x8xf32> to vector<1x8x8xf32>
    %12 = arith.addf %5, %11 : vector<1x8x8xf32>
    %cst_10 = arith.constant -1.000000e+30 : f32
    %13 = vector.broadcast %cst_10 : f32 to vector<1x8x8xf32>
    %14 = arith.maximumf %12, %13 : vector<1x8x8xf32>
    %c0_11 = arith.constant 0 : index
    %c0_12 = arith.constant 0 : index
    %c0_13 = arith.constant 0 : index
    %15 = vector.load %arg4[%c0_11, %c0_12, %c0_13] : memref<2x32x32xbf16, #tpu.memory_space<vmem>>, vector<1x32x32xbf16>
    %16 = vector.shape_cast %15 : vector<1x32x32xbf16> to vector<32x32xbf16>
    %c0_14 = arith.constant 0 : index
    %c0_15 = arith.constant 0 : index
    %c0_16 = arith.constant 0 : index
    %17 = vector.load %arg5[%c0_14, %c0_15, %c0_16] : memref<2x1x32xf32, #tpu.memory_space<vmem>>, vector<1x1x32xf32>
    %18 = vector.shape_cast %17 : vector<1x1x32xf32> to vector<1x32xf32>
    %c0_17 = arith.constant 0 : index
    %c0_18 = arith.constant 0 : index
    %c0_19 = arith.constant 0 : index
    %19 = vector.load %arg6[%c0_17, %c0_18, %c0_19] : memref<2x32x32xbf16, #tpu.memory_space<vmem>>, vector<1x32x32xbf16>
    %20 = vector.shape_cast %19 : vector<1x32x32xbf16> to vector<32x32xbf16>
    %c0_20 = arith.constant 0 : index
    %c0_21 = arith.constant 0 : index
    %c0_22 = arith.constant 0 : index
    %21 = vector.load %arg7[%c0_20, %c0_21, %c0_22] : memref<2x1x32xf32, #tpu.memory_space<vmem>>, vector<1x1x32xf32>
    %22 = vector.shape_cast %21 : vector<1x1x32xf32> to vector<1x32xf32>
    %c0_23 = arith.constant 0 : index
    %c0_24 = arith.constant 0 : index
    %c0_25 = arith.constant 0 : index
    %23 = vector.load %arg8[%c0_23, %c0_24, %c0_25] : memref<2x32x32xbf16, #tpu.memory_space<vmem>>, vector<1x32x32xbf16>
    %24 = vector.shape_cast %23 : vector<1x32x32xbf16> to vector<32x32xbf16>
    %c0_26 = arith.constant 0 : index
    %c0_27 = arith.constant 0 : index
    %c0_28 = arith.constant 0 : index
    %25 = vector.load %arg9[%c0_26, %c0_27, %c0_28] : memref<2x1x32xf32, #tpu.memory_space<vmem>>, vector<1x1x32xf32>
    %26 = vector.shape_cast %25 : vector<1x1x32xf32> to vector<1x32xf32>
    %c0_29 = arith.constant 0 : index
    %c0_30 = arith.constant 0 : index
    %c0_31 = arith.constant 0 : index
    %27 = vector.load %arg10[%c0_29, %c0_30, %c0_31] : memref<2x32x32xbf16, #tpu.memory_space<vmem>>, vector<1x32x32xbf16>
    %28 = vector.shape_cast %27 : vector<1x32x32xbf16> to vector<32x32xbf16>
    %c0_32 = arith.constant 0 : index
    %c0_33 = arith.constant 0 : index
    %c0_34 = arith.constant 0 : index
    %29 = vector.load %arg11[%c0_32, %c0_33, %c0_34] : memref<2x1x32xf32, #tpu.memory_space<vmem>>, vector<1x1x32xf32>
    %30 = vector.shape_cast %29 : vector<1x1x32xf32> to vector<1x32xf32>
    %31 = arith.truncf %0 : vector<1x8x32xf32> to vector<1x8x32xbf16>
    %32 = vector.shape_cast %31 : vector<1x8x32xbf16> to vector<8x32xbf16>
    %33 = arith.truncf %0 : vector<1x8x32xf32> to vector<1x8x32xbf16>
    %34 = vector.shape_cast %33 : vector<1x8x32xbf16> to vector<8x32xbf16>
    %cst_35 = arith.constant dense<0.000000e+00> : vector<8x32xf32>
    %35 = tpu.matmul %32, %16, %cst_35 {dimension_numbers = #tpu.dot_dimension_numbers<[1], [0], [0], [1], [0, 0, 1, 1], [], []>} : vector<8x32xbf16>, vector<32x32xbf16>, vector<8x32xf32> -> vector<8x32xf32>
    %36 = vector.broadcast %18 : vector<1x32xf32> to vector<8x32xf32>
    %37 = arith.addf %35, %36 : vector<8x32xf32>
    %38 = vector.shape_cast %37 : vector<8x32xf32> to vector<1x8x32xf32>
    %cst_36 = arith.constant dense<0.000000e+00> : vector<8x32xf32>
    %39 = tpu.matmul %34, %20, %cst_36 {dimension_numbers = #tpu.dot_dimension_numbers<[1], [0], [0], [1], [0, 0, 1, 1], [], []>} : vector<8x32xbf16>, vector<32x32xbf16>, vector<8x32xf32> -> vector<8x32xf32>
    %40 = vector.broadcast %22 : vector<1x32xf32> to vector<8x32xf32>
    %41 = arith.addf %39, %40 : vector<8x32xf32>
    %42 = vector.shape_cast %41 : vector<8x32xf32> to vector<1x8x32xf32>
    %cst_37 = arith.constant dense<0.000000e+00> : vector<8x32xf32>
    %43 = tpu.matmul %34, %24, %cst_37 {dimension_numbers = #tpu.dot_dimension_numbers<[1], [0], [0], [1], [0, 0, 1, 1], [], []>} : vector<8x32xbf16>, vector<32x32xbf16>, vector<8x32xf32> -> vector<8x32xf32>
    %44 = vector.broadcast %26 : vector<1x32xf32> to vector<8x32xf32>
    %45 = arith.addf %43, %44 : vector<8x32xf32>
    %46 = vector.shape_cast %45 : vector<8x32xf32> to vector<1x8x32xf32>
    %47 = vector.extract_strided_slice %38 {offsets = [0, 0, 0], sizes = [1, 8, 16], strides = [1, 1, 1]} : vector<1x8x32xf32> to vector<1x8x16xf32>
    %48 = arith.truncf %47 : vector<1x8x16xf32> to vector<1x8x16xbf16>
    %49 = vector.extract_strided_slice %42 {offsets = [0, 0, 0], sizes = [1, 8, 16], strides = [1, 1, 1]} : vector<1x8x32xf32> to vector<1x8x16xf32>
    %50 = arith.truncf %49 : vector<1x8x16xf32> to vector<1x8x16xbf16>
    %51 = vector.extract_strided_slice %46 {offsets = [0, 0, 0], sizes = [1, 8, 16], strides = [1, 1, 1]} : vector<1x8x32xf32> to vector<1x8x16xf32>
    %52 = arith.truncf %51 : vector<1x8x16xf32> to vector<1x8x16xbf16>
    "tpu.trace_start"() <{level = 10 : i32, message = "bqd,bkd->bqk"}> : () -> ()
    %cst_38 = arith.constant dense<0.000000e+00> : vector<1x8x8xf32>
    %53 = tpu.matmul %48, %50, %cst_38 {dimension_numbers = #tpu.dot_dimension_numbers<[2], [2], [1], [1], [0, 0, 0, 1, 1, 1], [0], [0]>} : vector<1x8x16xbf16>, vector<1x8x16xbf16>, vector<1x8x8xf32> -> vector<1x8x8xf32>
    "tpu.trace_stop"() : () -> ()
    %54 = arith.addf %53, %14 : vector<1x8x8xf32>
    %cst_39 = arith.constant dense<0xFF800000> : vector<1x8xf32>
    %55 = vector.multi_reduction <maximumf>, %54, %cst_39 [2] : vector<1x8x8xf32> to vector<1x8xf32>
    %56 = vector.shape_cast %55 : vector<1x8xf32> to vector<1x8x1xf32>
    %57 = vector.broadcast %56 : vector<1x8x1xf32> to vector<1x8x8xf32>
    %58 = arith.subf %54, %57 : vector<1x8x8xf32>
    %59 = math.exp %58 : vector<1x8x8xf32>
    %cst_40 = arith.constant dense<0.000000e+00> : vector<1x8xf32>
    %60 = vector.multi_reduction <add>, %59, %cst_40 [2] : vector<1x8x8xf32> to vector<1x8xf32>
    %61 = vector.shape_cast %60 : vector<1x8xf32> to vector<1x8x1xf32>
    %62 = tpu.reciprocal %61 {approx = true} : vector<1x8x1xf32> -> vector<1x8x1xf32>
    %63 = vector.broadcast %62 : vector<1x8x1xf32> to vector<1x8x8xf32>
    %64 = arith.mulf %59, %63 : vector<1x8x8xf32>
    %65 = arith.truncf %64 : vector<1x8x8xf32> to vector<1x8x8xbf16>
    "tpu.trace_start"() <{level = 10 : i32, message = "bqk,bkd->bqd"}> : () -> ()
    %cst_41 = arith.constant dense<0.000000e+00> : vector<1x8x16xf32>
    %66 = tpu.matmul %65, %52, %cst_41 {dimension_numbers = #tpu.dot_dimension_numbers<[2], [1], [1], [2], [0, 0, 0, 1, 1, 2], [0], [0]>} : vector<1x8x8xbf16>, vector<1x8x16xbf16>, vector<1x8x16xf32> -> vector<1x8x16xf32>
    "tpu.trace_stop"() : () -> ()
    %67 = vector.extract_strided_slice %38 {offsets = [0, 0, 16], sizes = [1, 8, 16], strides = [1, 1, 1]} : vector<1x8x32xf32> to vector<1x8x16xf32>
    %68 = arith.truncf %67 : vector<1x8x16xf32> to vector<1x8x16xbf16>
    %69 = vector.extract_strided_slice %42 {offsets = [0, 0, 16], sizes = [1, 8, 16], strides = [1, 1, 1]} : vector<1x8x32xf32> to vector<1x8x16xf32>
    %70 = arith.truncf %69 : vector<1x8x16xf32> to vector<1x8x16xbf16>
    %71 = vector.extract_strided_slice %46 {offsets = [0, 0, 16], sizes = [1, 8, 16], strides = [1, 1, 1]} : vector<1x8x32xf32> to vector<1x8x16xf32>
    %72 = arith.truncf %71 : vector<1x8x16xf32> to vector<1x8x16xbf16>
    "tpu.trace_start"() <{level = 10 : i32, message = "bqd,bkd->bqk"}> : () -> ()
    %cst_42 = arith.constant dense<0.000000e+00> : vector<1x8x8xf32>
    %73 = tpu.matmul %68, %70, %cst_42 {dimension_numbers = #tpu.dot_dimension_numbers<[2], [2], [1], [1], [0, 0, 0, 1, 1, 1], [0], [0]>} : vector<1x8x16xbf16>, vector<1x8x16xbf16>, vector<1x8x8xf32> -> vector<1x8x8xf32>
    "tpu.trace_stop"() : () -> ()
    %74 = arith.addf %73, %14 : vector<1x8x8xf32>
    %cst_43 = arith.constant dense<0xFF800000> : vector<1x8xf32>
    %75 = vector.multi_reduction <maximumf>, %74, %cst_43 [2] : vector<1x8x8xf32> to vector<1x8xf32>
    %76 = vector.shape_cast %75 : vector<1x8xf32> to vector<1x8x1xf32>
    %77 = vector.broadcast %76 : vector<1x8x1xf32> to vector<1x8x8xf32>
    %78 = arith.subf %74, %77 : vector<1x8x8xf32>
    %79 = math.exp %78 : vector<1x8x8xf32>
    %cst_44 = arith.constant dense<0.000000e+00> : vector<1x8xf32>
    %80 = vector.multi_reduction <add>, %79, %cst_44 [2] : vector<1x8x8xf32> to vector<1x8xf32>
    %81 = vector.shape_cast %80 : vector<1x8xf32> to vector<1x8x1xf32>
    %82 = tpu.reciprocal %81 {approx = true} : vector<1x8x1xf32> -> vector<1x8x1xf32>
    %83 = vector.broadcast %82 : vector<1x8x1xf32> to vector<1x8x8xf32>
    %84 = arith.mulf %79, %83 : vector<1x8x8xf32>
    %85 = arith.truncf %84 : vector<1x8x8xf32> to vector<1x8x8xbf16>
    "tpu.trace_start"() <{level = 10 : i32, message = "bqk,bkd->bqd"}> : () -> ()
    %cst_45 = arith.constant dense<0.000000e+00> : vector<1x8x16xf32>
    %86 = tpu.matmul %85, %72, %cst_45 {dimension_numbers = #tpu.dot_dimension_numbers<[2], [1], [1], [2], [0, 0, 0, 1, 1, 2], [0], [0]>} : vector<1x8x8xbf16>, vector<1x8x16xbf16>, vector<1x8x16xf32> -> vector<1x8x16xf32>
    "tpu.trace_stop"() : () -> ()
    %87 = tpu.concatenate %66, %86 in 2 : vector<1x8x16xf32>, vector<1x8x16xf32> -> vector<1x8x32xf32>
    %88 = arith.truncf %87 : vector<1x8x32xf32> to vector<1x8x32xbf16>
    %89 = vector.shape_cast %88 : vector<1x8x32xbf16> to vector<8x32xbf16>
    %cst_46 = arith.constant dense<0.000000e+00> : vector<8x32xf32>
    %90 = tpu.matmul %89, %28, %cst_46 {dimension_numbers = #tpu.dot_dimension_numbers<[1], [0], [0], [1], [0, 0, 1, 1], [], []>} : vector<8x32xbf16>, vector<32x32xbf16>, vector<8x32xf32> -> vector<8x32xf32>
    %91 = vector.broadcast %30 : vector<1x32xf32> to vector<8x32xf32>
    %92 = arith.addf %90, %91 : vector<8x32xf32>
    %93 = vector.shape_cast %92 : vector<8x32xf32> to vector<1x8x32xf32>
    %94 = arith.addf %0, %93 : vector<1x8x32xf32>
    %c0_47 = arith.constant 0 : index
    %c0_48 = arith.constant 0 : index
    %c0_49 = arith.constant 0 : index
    %95 = vector.load %arg12[%c0_47, %c0_48, %c0_49] : memref<2x1x32xf32, #tpu.memory_space<vmem>>, vector<1x1x32xf32>
    %96 = vector.shape_cast %95 : vector<1x1x32xf32> to vector<1x32xf32>
    %c0_50 = arith.constant 0 : index
    %c0_51 = arith.constant 0 : index
    %c0_52 = arith.constant 0 : index
    %97 = vector.load %arg13[%c0_50, %c0_51, %c0_52] : memref<2x1x32xf32, #tpu.memory_space<vmem>>, vector<1x1x32xf32>
    %98 = vector.shape_cast %97 : vector<1x1x32xf32> to vector<1x32xf32>
    %cst_53 = arith.constant dense<0.000000e+00> : vector<1x8xf32>
    %99 = vector.multi_reduction <add>, %94, %cst_53 [2] : vector<1x8x32xf32> to vector<1x8xf32>
    %100 = vector.shape_cast %99 : vector<1x8xf32> to vector<1x8x1xf32>
    %cst_54 = arith.constant 3.200000e+01 : f32
    %101 = vector.broadcast %cst_54 : f32 to vector<1x8x1xf32>
    %102 = arith.divf %100, %101 : vector<1x8x1xf32>
    %103 = vector.broadcast %102 : vector<1x8x1xf32> to vector<1x8x32xf32>
    %104 = arith.subf %94, %103 : vector<1x8x32xf32>
    %105 = arith.mulf %104, %104 : vector<1x8x32xf32>
    %cst_55 = arith.constant dense<0.000000e+00> : vector<1x8xf32>
    %106 = vector.multi_reduction <add>, %105, %cst_55 [2] : vector<1x8x32xf32> to vector<1x8xf32>
    %107 = vector.shape_cast %106 : vector<1x8xf32> to vector<1x8x1xf32>
    %cst_56 = arith.constant 3.200000e+01 : f32
    %108 = vector.broadcast %cst_56 : f32 to vector<1x8x1xf32>
    %109 = arith.divf %107, %108 : vector<1x8x1xf32>
    %cst_57 = arith.constant 9.99999974E-6 : f32
    %110 = vector.broadcast %cst_57 : f32 to vector<1x8x1xf32>
    %111 = arith.addf %109, %110 : vector<1x8x1xf32>
    %112 = math.rsqrt %111 : vector<1x8x1xf32>
    %113 = vector.broadcast %112 : vector<1x8x1xf32> to vector<1x8x32xf32>
    %114 = arith.mulf %104, %113 : vector<1x8x32xf32>
    %115 = vector.shape_cast %96 : vector<1x32xf32> to vector<1x1x32xf32>
    %116 = vector.broadcast %115 : vector<1x1x32xf32> to vector<1x8x32xf32>
    %117 = arith.mulf %114, %116 : vector<1x8x32xf32>
    %118 = vector.shape_cast %98 : vector<1x32xf32> to vector<1x1x32xf32>
    %119 = vector.broadcast %118 : vector<1x1x32xf32> to vector<1x8x32xf32>
    %120 = arith.addf %117, %119 : vector<1x8x32xf32>
    %c0_58 = arith.constant 0 : index
    %c0_59 = arith.constant 0 : index
    %c0_60 = arith.constant 0 : index
    %121 = vector.load %arg14[%c0_58, %c0_59, %c0_60] : memref<2x32x64xbf16, #tpu.memory_space<vmem>>, vector<1x32x64xbf16>
    %122 = vector.shape_cast %121 : vector<1x32x64xbf16> to vector<32x64xbf16>
    %c0_61 = arith.constant 0 : index
    %c0_62 = arith.constant 0 : index
    %c0_63 = arith.constant 0 : index
    %123 = vector.load %arg15[%c0_61, %c0_62, %c0_63] : memref<2x1x64xf32, #tpu.memory_space<vmem>>, vector<1x1x64xf32>
    %124 = vector.shape_cast %123 : vector<1x1x64xf32> to vector<1x64xf32>
    %c0_64 = arith.constant 0 : index
    %c0_65 = arith.constant 0 : index
    %c0_66 = arith.constant 0 : index
    %125 = vector.load %arg16[%c0_64, %c0_65, %c0_66] : memref<2x64x32xbf16, #tpu.memory_space<vmem>>, vector<1x64x32xbf16>
    %126 = vector.shape_cast %125 : vector<1x64x32xbf16> to vector<64x32xbf16>
    %c0_67 = arith.constant 0 : index
    %c0_68 = arith.constant 0 : index
    %c0_69 = arith.constant 0 : index
    %127 = vector.load %arg17[%c0_67, %c0_68, %c0_69] : memref<2x1x32xf32, #tpu.memory_space<vmem>>, vector<1x1x32xf32>
    %128 = vector.shape_cast %127 : vector<1x1x32xf32> to vector<1x32xf32>
    %129 = arith.truncf %120 : vector<1x8x32xf32> to vector<1x8x32xbf16>
    %130 = vector.shape_cast %129 : vector<1x8x32xbf16> to vector<8x32xbf16>
    %cst_70 = arith.constant dense<0.000000e+00> : vector<8x64xf32>
    %131 = tpu.matmul %130, %122, %cst_70 {dimension_numbers = #tpu.dot_dimension_numbers<[1], [0], [0], [1], [0, 0, 1, 1], [], []>} : vector<8x32xbf16>, vector<32x64xbf16>, vector<8x64xf32> -> vector<8x64xf32>
    %132 = vector.broadcast %124 : vector<1x64xf32> to vector<8x64xf32>
    %133 = arith.addf %131, %132 : vector<8x64xf32>
    %cst_71 = arith.constant 0.000000e+00 : f32
    %134 = vector.broadcast %cst_71 : f32 to vector<8x64xf32>
    %135 = arith.maximumf %133, %134 : vector<8x64xf32>
    %136 = arith.truncf %135 : vector<8x64xf32> to vector<8x64xbf16>
    %cst_72 = arith.constant dense<0.000000e+00> : vector<8x32xf32>
    %137 = tpu.matmul %136, %126, %cst_72 {dimension_numbers = #tpu.dot_dimension_numbers<[1], [0], [0], [1], [0, 0, 1, 1], [], []>} : vector<8x64xbf16>, vector<64x32xbf16>, vector<8x32xf32> -> vector<8x32xf32>
    %138 = vector.broadcast %128 : vector<1x32xf32> to vector<8x32xf32>
    %139 = arith.addf %137, %138 : vector<8x32xf32>
    %140 = vector.shape_cast %139 : vector<8x32xf32> to vector<1x8x32xf32>
    %141 = arith.addf %120, %140 : vector<1x8x32xf32>
    %c0_73 = arith.constant 0 : index
    %c0_74 = arith.constant 0 : index
    %c0_75 = arith.constant 0 : index
    %142 = vector.load %arg18[%c0_73, %c0_74, %c0_75] : memref<2x1x32xf32, #tpu.memory_space<vmem>>, vector<1x1x32xf32>
    %143 = vector.shape_cast %142 : vector<1x1x32xf32> to vector<1x32xf32>
    %c0_76 = arith.constant 0 : index
    %c0_77 = arith.constant 0 : index
    %c0_78 = arith.constant 0 : index
    %144 = vector.load %arg19[%c0_76, %c0_77, %c0_78] : memref<2x1x32xf32, #tpu.memory_space<vmem>>, vector<1x1x32xf32>
    %145 = vector.shape_cast %144 : vector<1x1x32xf32> to vector<1x32xf32>
    %cst_79 = arith.constant dense<0.000000e+00> : vector<1x8xf32>
    %146 = vector.multi_reduction <add>, %141, %cst_79 [2] : vector<1x8x32xf32> to vector<1x8xf32>
    %147 = vector.shape_cast %146 : vector<1x8xf32> to vector<1x8x1xf32>
    %cst_80 = arith.constant 3.200000e+01 : f32
    %148 = vector.broadcast %cst_80 : f32 to vector<1x8x1xf32>
    %149 = arith.divf %147, %148 : vector<1x8x1xf32>
    %150 = vector.broadcast %149 : vector<1x8x1xf32> to vector<1x8x32xf32>
    %151 = arith.subf %141, %150 : vector<1x8x32xf32>
    %152 = arith.mulf %151, %151 : vector<1x8x32xf32>
    %cst_81 = arith.constant dense<0.000000e+00> : vector<1x8xf32>
    %153 = vector.multi_reduction <add>, %152, %cst_81 [2] : vector<1x8x32xf32> to vector<1x8xf32>
    %154 = vector.shape_cast %153 : vector<1x8xf32> to vector<1x8x1xf32>
    %cst_82 = arith.constant 3.200000e+01 : f32
    %155 = vector.broadcast %cst_82 : f32 to vector<1x8x1xf32>
    %156 = arith.divf %154, %155 : vector<1x8x1xf32>
    %cst_83 = arith.constant 9.99999974E-6 : f32
    %157 = vector.broadcast %cst_83 : f32 to vector<1x8x1xf32>
    %158 = arith.addf %156, %157 : vector<1x8x1xf32>
    %159 = math.rsqrt %158 : vector<1x8x1xf32>
    %160 = vector.broadcast %159 : vector<1x8x1xf32> to vector<1x8x32xf32>
    %161 = arith.mulf %151, %160 : vector<1x8x32xf32>
    %162 = vector.shape_cast %143 : vector<1x32xf32> to vector<1x1x32xf32>
    %163 = vector.broadcast %162 : vector<1x1x32xf32> to vector<1x8x32xf32>
    %164 = arith.mulf %161, %163 : vector<1x8x32xf32>
    %165 = vector.shape_cast %145 : vector<1x32xf32> to vector<1x1x32xf32>
    %166 = vector.broadcast %165 : vector<1x1x32xf32> to vector<1x8x32xf32>
    %167 = arith.addf %164, %166 : vector<1x8x32xf32>
    %c1 = arith.constant 1 : index
    %c0_84 = arith.constant 0 : index
    %c0_85 = arith.constant 0 : index
    %168 = vector.load %arg4[%c1, %c0_84, %c0_85] : memref<2x32x32xbf16, #tpu.memory_space<vmem>>, vector<1x32x32xbf16>
    %169 = vector.shape_cast %168 : vector<1x32x32xbf16> to vector<32x32xbf16>
    %c1_86 = arith.constant 1 : index
    %c0_87 = arith.constant 0 : index
    %c0_88 = arith.constant 0 : index
    %170 = vector.load %arg5[%c1_86, %c0_87, %c0_88] : memref<2x1x32xf32, #tpu.memory_space<vmem>>, vector<1x1x32xf32>
    %171 = vector.shape_cast %170 : vector<1x1x32xf32> to vector<1x32xf32>
    %c1_89 = arith.constant 1 : index
    %c0_90 = arith.constant 0 : index
    %c0_91 = arith.constant 0 : index
    %172 = vector.load %arg6[%c1_89, %c0_90, %c0_91] : memref<2x32x32xbf16, #tpu.memory_space<vmem>>, vector<1x32x32xbf16>
    %173 = vector.shape_cast %172 : vector<1x32x32xbf16> to vector<32x32xbf16>
    %c1_92 = arith.constant 1 : index
    %c0_93 = arith.constant 0 : index
    %c0_94 = arith.constant 0 : index
    %174 = vector.load %arg7[%c1_92, %c0_93, %c0_94] : memref<2x1x32xf32, #tpu.memory_space<vmem>>, vector<1x1x32xf32>
    %175 = vector.shape_cast %174 : vector<1x1x32xf32> to vector<1x32xf32>
    %c1_95 = arith.constant 1 : index
    %c0_96 = arith.constant 0 : index
    %c0_97 = arith.constant 0 : index
    %176 = vector.load %arg8[%c1_95, %c0_96, %c0_97] : memref<2x32x32xbf16, #tpu.memory_space<vmem>>, vector<1x32x32xbf16>
    %177 = vector.shape_cast %176 : vector<1x32x32xbf16> to vector<32x32xbf16>
    %c1_98 = arith.constant 1 : index
    %c0_99 = arith.constant 0 : index
    %c0_100 = arith.constant 0 : index
    %178 = vector.load %arg9[%c1_98, %c0_99, %c0_100] : memref<2x1x32xf32, #tpu.memory_space<vmem>>, vector<1x1x32xf32>
    %179 = vector.shape_cast %178 : vector<1x1x32xf32> to vector<1x32xf32>
    %c1_101 = arith.constant 1 : index
    %c0_102 = arith.constant 0 : index
    %c0_103 = arith.constant 0 : index
    %180 = vector.load %arg10[%c1_101, %c0_102, %c0_103] : memref<2x32x32xbf16, #tpu.memory_space<vmem>>, vector<1x32x32xbf16>
    %181 = vector.shape_cast %180 : vector<1x32x32xbf16> to vector<32x32xbf16>
    %c1_104 = arith.constant 1 : index
    %c0_105 = arith.constant 0 : index
    %c0_106 = arith.constant 0 : index
    %182 = vector.load %arg11[%c1_104, %c0_105, %c0_106] : memref<2x1x32xf32, #tpu.memory_space<vmem>>, vector<1x1x32xf32>
    %183 = vector.shape_cast %182 : vector<1x1x32xf32> to vector<1x32xf32>
    %184 = arith.truncf %167 : vector<1x8x32xf32> to vector<1x8x32xbf16>
    %185 = vector.shape_cast %184 : vector<1x8x32xbf16> to vector<8x32xbf16>
    %186 = arith.truncf %167 : vector<1x8x32xf32> to vector<1x8x32xbf16>
    %187 = vector.shape_cast %186 : vector<1x8x32xbf16> to vector<8x32xbf16>
    %cst_107 = arith.constant dense<0.000000e+00> : vector<8x32xf32>
    %188 = tpu.matmul %185, %169, %cst_107 {dimension_numbers = #tpu.dot_dimension_numbers<[1], [0], [0], [1], [0, 0, 1, 1], [], []>} : vector<8x32xbf16>, vector<32x32xbf16>, vector<8x32xf32> -> vector<8x32xf32>
    %189 = vector.broadcast %171 : vector<1x32xf32> to vector<8x32xf32>
    %190 = arith.addf %188, %189 : vector<8x32xf32>
    %191 = vector.shape_cast %190 : vector<8x32xf32> to vector<1x8x32xf32>
    %cst_108 = arith.constant dense<0.000000e+00> : vector<8x32xf32>
    %192 = tpu.matmul %187, %173, %cst_108 {dimension_numbers = #tpu.dot_dimension_numbers<[1], [0], [0], [1], [0, 0, 1, 1], [], []>} : vector<8x32xbf16>, vector<32x32xbf16>, vector<8x32xf32> -> vector<8x32xf32>
    %193 = vector.broadcast %175 : vector<1x32xf32> to vector<8x32xf32>
    %194 = arith.addf %192, %193 : vector<8x32xf32>
    %195 = vector.shape_cast %194 : vector<8x32xf32> to vector<1x8x32xf32>
    %cst_109 = arith.constant dense<0.000000e+00> : vector<8x32xf32>
    %196 = tpu.matmul %187, %177, %cst_109 {dimension_numbers = #tpu.dot_dimension_numbers<[1], [0], [0], [1], [0, 0, 1, 1], [], []>} : vector<8x32xbf16>, vector<32x32xbf16>, vector<8x32xf32> -> vector<8x32xf32>
    %197 = vector.broadcast %179 : vector<1x32xf32> to vector<8x32xf32>
    %198 = arith.addf %196, %197 : vector<8x32xf32>
    %199 = vector.shape_cast %198 : vector<8x32xf32> to vector<1x8x32xf32>
    %200 = vector.extract_strided_slice %191 {offsets = [0, 0, 0], sizes = [1, 8, 16], strides = [1, 1, 1]} : vector<1x8x32xf32> to vector<1x8x16xf32>
    %201 = arith.truncf %200 : vector<1x8x16xf32> to vector<1x8x16xbf16>
    %202 = vector.extract_strided_slice %195 {offsets = [0, 0, 0], sizes = [1, 8, 16], strides = [1, 1, 1]} : vector<1x8x32xf32> to vector<1x8x16xf32>
    %203 = arith.truncf %202 : vector<1x8x16xf32> to vector<1x8x16xbf16>
    %204 = vector.extract_strided_slice %199 {offsets = [0, 0, 0], sizes = [1, 8, 16], strides = [1, 1, 1]} : vector<1x8x32xf32> to vector<1x8x16xf32>
    %205 = arith.truncf %204 : vector<1x8x16xf32> to vector<1x8x16xbf16>
    "tpu.trace_start"() <{level = 10 : i32, message = "bqd,bkd->bqk"}> : () -> ()
    %cst_110 = arith.constant dense<0.000000e+00> : vector<1x8x8xf32>
    %206 = tpu.matmul %201, %203, %cst_110 {dimension_numbers = #tpu.dot_dimension_numbers<[2], [2], [1], [1], [0, 0, 0, 1, 1, 1], [0], [0]>} : vector<1x8x16xbf16>, vector<1x8x16xbf16>, vector<1x8x8xf32> -> vector<1x8x8xf32>
    "tpu.trace_stop"() : () -> ()
    %207 = arith.addf %206, %14 : vector<1x8x8xf32>
    %cst_111 = arith.constant dense<0xFF800000> : vector<1x8xf32>
    %208 = vector.multi_reduction <maximumf>, %207, %cst_111 [2] : vector<1x8x8xf32> to vector<1x8xf32>
    %209 = vector.shape_cast %208 : vector<1x8xf32> to vector<1x8x1xf32>
    %210 = vector.broadcast %209 : vector<1x8x1xf32> to vector<1x8x8xf32>
    %211 = arith.subf %207, %210 : vector<1x8x8xf32>
    %212 = math.exp %211 : vector<1x8x8xf32>
    %cst_112 = arith.constant dense<0.000000e+00> : vector<1x8xf32>
    %213 = vector.multi_reduction <add>, %212, %cst_112 [2] : vector<1x8x8xf32> to vector<1x8xf32>
    %214 = vector.shape_cast %213 : vector<1x8xf32> to vector<1x8x1xf32>
    %215 = tpu.reciprocal %214 {approx = true} : vector<1x8x1xf32> -> vector<1x8x1xf32>
    %216 = vector.broadcast %215 : vector<1x8x1xf32> to vector<1x8x8xf32>
    %217 = arith.mulf %212, %216 : vector<1x8x8xf32>
    %218 = arith.truncf %217 : vector<1x8x8xf32> to vector<1x8x8xbf16>
    "tpu.trace_start"() <{level = 10 : i32, message = "bqk,bkd->bqd"}> : () -> ()
    %cst_113 = arith.constant dense<0.000000e+00> : vector<1x8x16xf32>
    %219 = tpu.matmul %218, %205, %cst_113 {dimension_numbers = #tpu.dot_dimension_numbers<[2], [1], [1], [2], [0, 0, 0, 1, 1, 2], [0], [0]>} : vector<1x8x8xbf16>, vector<1x8x16xbf16>, vector<1x8x16xf32> -> vector<1x8x16xf32>
    "tpu.trace_stop"() : () -> ()
    %220 = vector.extract_strided_slice %191 {offsets = [0, 0, 16], sizes = [1, 8, 16], strides = [1, 1, 1]} : vector<1x8x32xf32> to vector<1x8x16xf32>
    %221 = arith.truncf %220 : vector<1x8x16xf32> to vector<1x8x16xbf16>
    %222 = vector.extract_strided_slice %195 {offsets = [0, 0, 16], sizes = [1, 8, 16], strides = [1, 1, 1]} : vector<1x8x32xf32> to vector<1x8x16xf32>
    %223 = arith.truncf %222 : vector<1x8x16xf32> to vector<1x8x16xbf16>
    %224 = vector.extract_strided_slice %199 {offsets = [0, 0, 16], sizes = [1, 8, 16], strides = [1, 1, 1]} : vector<1x8x32xf32> to vector<1x8x16xf32>
    %225 = arith.truncf %224 : vector<1x8x16xf32> to vector<1x8x16xbf16>
    "tpu.trace_start"() <{level = 10 : i32, message = "bqd,bkd->bqk"}> : () -> ()
    %cst_114 = arith.constant dense<0.000000e+00> : vector<1x8x8xf32>
    %226 = tpu.matmul %221, %223, %cst_114 {dimension_numbers = #tpu.dot_dimension_numbers<[2], [2], [1], [1], [0, 0, 0, 1, 1, 1], [0], [0]>} : vector<1x8x16xbf16>, vector<1x8x16xbf16>, vector<1x8x8xf32> -> vector<1x8x8xf32>
    "tpu.trace_stop"() : () -> ()
    %227 = arith.addf %226, %14 : vector<1x8x8xf32>
    %cst_115 = arith.constant dense<0xFF800000> : vector<1x8xf32>
    %228 = vector.multi_reduction <maximumf>, %227, %cst_115 [2] : vector<1x8x8xf32> to vector<1x8xf32>
    %229 = vector.shape_cast %228 : vector<1x8xf32> to vector<1x8x1xf32>
    %230 = vector.broadcast %229 : vector<1x8x1xf32> to vector<1x8x8xf32>
    %231 = arith.subf %227, %230 : vector<1x8x8xf32>
    %232 = math.exp %231 : vector<1x8x8xf32>
    %cst_116 = arith.constant dense<0.000000e+00> : vector<1x8xf32>
    %233 = vector.multi_reduction <add>, %232, %cst_116 [2] : vector<1x8x8xf32> to vector<1x8xf32>
    %234 = vector.shape_cast %233 : vector<1x8xf32> to vector<1x8x1xf32>
    %235 = tpu.reciprocal %234 {approx = true} : vector<1x8x1xf32> -> vector<1x8x1xf32>
    %236 = vector.broadcast %235 : vector<1x8x1xf32> to vector<1x8x8xf32>
    %237 = arith.mulf %232, %236 : vector<1x8x8xf32>
    %238 = arith.truncf %237 : vector<1x8x8xf32> to vector<1x8x8xbf16>
    "tpu.trace_start"() <{level = 10 : i32, message = "bqk,bkd->bqd"}> : () -> ()
    %cst_117 = arith.constant dense<0.000000e+00> : vector<1x8x16xf32>
    %239 = tpu.matmul %238, %225, %cst_117 {dimension_numbers = #tpu.dot_dimension_numbers<[2], [1], [1], [2], [0, 0, 0, 1, 1, 2], [0], [0]>} : vector<1x8x8xbf16>, vector<1x8x16xbf16>, vector<1x8x16xf32> -> vector<1x8x16xf32>
    "tpu.trace_stop"() : () -> ()
    %240 = tpu.concatenate %219, %239 in 2 : vector<1x8x16xf32>, vector<1x8x16xf32> -> vector<1x8x32xf32>
    %241 = arith.truncf %240 : vector<1x8x32xf32> to vector<1x8x32xbf16>
    %242 = vector.shape_cast %241 : vector<1x8x32xbf16> to vector<8x32xbf16>
    %cst_118 = arith.constant dense<0.000000e+00> : vector<8x32xf32>
    %243 = tpu.matmul %242, %181, %cst_118 {dimension_numbers = #tpu.dot_dimension_numbers<[1], [0], [0], [1], [0, 0, 1, 1], [], []>} : vector<8x32xbf16>, vector<32x32xbf16>, vector<8x32xf32> -> vector<8x32xf32>
    %244 = vector.broadcast %183 : vector<1x32xf32> to vector<8x32xf32>
    %245 = arith.addf %243, %244 : vector<8x32xf32>
    %246 = vector.shape_cast %245 : vector<8x32xf32> to vector<1x8x32xf32>
    %247 = arith.addf %167, %246 : vector<1x8x32xf32>
    %c1_119 = arith.constant 1 : index
    %c0_120 = arith.constant 0 : index
    %c0_121 = arith.constant 0 : index
    %248 = vector.load %arg12[%c1_119, %c0_120, %c0_121] : memref<2x1x32xf32, #tpu.memory_space<vmem>>, vector<1x1x32xf32>
    %249 = vector.shape_cast %248 : vector<1x1x32xf32> to vector<1x32xf32>
    %c1_122 = arith.constant 1 : index
    %c0_123 = arith.constant 0 : index
    %c0_124 = arith.constant 0 : index
    %250 = vector.load %arg13[%c1_122, %c0_123, %c0_124] : memref<2x1x32xf32, #tpu.memory_space<vmem>>, vector<1x1x32xf32>
    %251 = vector.shape_cast %250 : vector<1x1x32xf32> to vector<1x32xf32>
    %cst_125 = arith.constant dense<0.000000e+00> : vector<1x8xf32>
    %252 = vector.multi_reduction <add>, %247, %cst_125 [2] : vector<1x8x32xf32> to vector<1x8xf32>
    %253 = vector.shape_cast %252 : vector<1x8xf32> to vector<1x8x1xf32>
    %cst_126 = arith.constant 3.200000e+01 : f32
    %254 = vector.broadcast %cst_126 : f32 to vector<1x8x1xf32>
    %255 = arith.divf %253, %254 : vector<1x8x1xf32>
    %256 = vector.broadcast %255 : vector<1x8x1xf32> to vector<1x8x32xf32>
    %257 = arith.subf %247, %256 : vector<1x8x32xf32>
    %258 = arith.mulf %257, %257 : vector<1x8x32xf32>
    %cst_127 = arith.constant dense<0.000000e+00> : vector<1x8xf32>
    %259 = vector.multi_reduction <add>, %258, %cst_127 [2] : vector<1x8x32xf32> to vector<1x8xf32>
    %260 = vector.shape_cast %259 : vector<1x8xf32> to vector<1x8x1xf32>
    %cst_128 = arith.constant 3.200000e+01 : f32
    %261 = vector.broadcast %cst_128 : f32 to vector<1x8x1xf32>
    %262 = arith.divf %260, %261 : vector<1x8x1xf32>
    %cst_129 = arith.constant 9.99999974E-6 : f32
    %263 = vector.broadcast %cst_129 : f32 to vector<1x8x1xf32>
    %264 = arith.addf %262, %263 : vector<1x8x1xf32>
    %265 = math.rsqrt %264 : vector<1x8x1xf32>
    %266 = vector.broadcast %265 : vector<1x8x1xf32> to vector<1x8x32xf32>
    %267 = arith.mulf %257, %266 : vector<1x8x32xf32>
    %268 = vector.shape_cast %249 : vector<1x32xf32> to vector<1x1x32xf32>
    %269 = vector.broadcast %268 : vector<1x1x32xf32> to vector<1x8x32xf32>
    %270 = arith.mulf %267, %269 : vector<1x8x32xf32>
    %271 = vector.shape_cast %251 : vector<1x32xf32> to vector<1x1x32xf32>
    %272 = vector.broadcast %271 : vector<1x1x32xf32> to vector<1x8x32xf32>
    %273 = arith.addf %270, %272 : vector<1x8x32xf32>
    %c1_130 = arith.constant 1 : index
    %c0_131 = arith.constant 0 : index
    %c0_132 = arith.constant 0 : index
    %274 = vector.load %arg14[%c1_130, %c0_131, %c0_132] : memref<2x32x64xbf16, #tpu.memory_space<vmem>>, vector<1x32x64xbf16>
    %275 = vector.shape_cast %274 : vector<1x32x64xbf16> to vector<32x64xbf16>
    %c1_133 = arith.constant 1 : index
    %c0_134 = arith.constant 0 : index
    %c0_135 = arith.constant 0 : index
    %276 = vector.load %arg15[%c1_133, %c0_134, %c0_135] : memref<2x1x64xf32, #tpu.memory_space<vmem>>, vector<1x1x64xf32>
    %277 = vector.shape_cast %276 : vector<1x1x64xf32> to vector<1x64xf32>
    %c1_136 = arith.constant 1 : index
    %c0_137 = arith.constant 0 : index
    %c0_138 = arith.constant 0 : index
    %278 = vector.load %arg16[%c1_136, %c0_137, %c0_138] : memref<2x64x32xbf16, #tpu.memory_space<vmem>>, vector<1x64x32xbf16>
    %279 = vector.shape_cast %278 : vector<1x64x32xbf16> to vector<64x32xbf16>
    %c1_139 = arith.constant 1 : index
    %c0_140 = arith.constant 0 : index
    %c0_141 = arith.constant 0 : index
    %280 = vector.load %arg17[%c1_139, %c0_140, %c0_141] : memref<2x1x32xf32, #tpu.memory_space<vmem>>, vector<1x1x32xf32>
    %281 = vector.shape_cast %280 : vector<1x1x32xf32> to vector<1x32xf32>
    %282 = arith.truncf %273 : vector<1x8x32xf32> to vector<1x8x32xbf16>
    %283 = vector.shape_cast %282 : vector<1x8x32xbf16> to vector<8x32xbf16>
    %cst_142 = arith.constant dense<0.000000e+00> : vector<8x64xf32>
    %284 = tpu.matmul %283, %275, %cst_142 {dimension_numbers = #tpu.dot_dimension_numbers<[1], [0], [0], [1], [0, 0, 1, 1], [], []>} : vector<8x32xbf16>, vector<32x64xbf16>, vector<8x64xf32> -> vector<8x64xf32>
    %285 = vector.broadcast %277 : vector<1x64xf32> to vector<8x64xf32>
    %286 = arith.addf %284, %285 : vector<8x64xf32>
    %cst_143 = arith.constant 0.000000e+00 : f32
    %287 = vector.broadcast %cst_143 : f32 to vector<8x64xf32>
    %288 = arith.maximumf %286, %287 : vector<8x64xf32>
    %289 = arith.truncf %288 : vector<8x64xf32> to vector<8x64xbf16>
    %cst_144 = arith.constant dense<0.000000e+00> : vector<8x32xf32>
    %290 = tpu.matmul %289, %279, %cst_144 {dimension_numbers = #tpu.dot_dimension_numbers<[1], [0], [0], [1], [0, 0, 1, 1], [], []>} : vector<8x64xbf16>, vector<64x32xbf16>, vector<8x32xf32> -> vector<8x32xf32>
    %291 = vector.broadcast %281 : vector<1x32xf32> to vector<8x32xf32>
    %292 = arith.addf %290, %291 : vector<8x32xf32>
    %293 = vector.shape_cast %292 : vector<8x32xf32> to vector<1x8x32xf32>
    %294 = arith.addf %273, %293 : vector<1x8x32xf32>
    %c1_145 = arith.constant 1 : index
    %c0_146 = arith.constant 0 : index
    %c0_147 = arith.constant 0 : index
    %295 = vector.load %arg18[%c1_145, %c0_146, %c0_147] : memref<2x1x32xf32, #tpu.memory_space<vmem>>, vector<1x1x32xf32>
    %296 = vector.shape_cast %295 : vector<1x1x32xf32> to vector<1x32xf32>
    %c1_148 = arith.constant 1 : index
    %c0_149 = arith.constant 0 : index
    %c0_150 = arith.constant 0 : index
    %297 = vector.load %arg19[%c1_148, %c0_149, %c0_150] : memref<2x1x32xf32, #tpu.memory_space<vmem>>, vector<1x1x32xf32>
    %298 = vector.shape_cast %297 : vector<1x1x32xf32> to vector<1x32xf32>
    %cst_151 = arith.constant dense<0.000000e+00> : vector<1x8xf32>
    %299 = vector.multi_reduction <add>, %294, %cst_151 [2] : vector<1x8x32xf32> to vector<1x8xf32>
    %300 = vector.shape_cast %299 : vector<1x8xf32> to vector<1x8x1xf32>
    %cst_152 = arith.constant 3.200000e+01 : f32
    %301 = vector.broadcast %cst_152 : f32 to vector<1x8x1xf32>
    %302 = arith.divf %300, %301 : vector<1x8x1xf32>
    %303 = vector.broadcast %302 : vector<1x8x1xf32> to vector<1x8x32xf32>
    %304 = arith.subf %294, %303 : vector<1x8x32xf32>
    %305 = arith.mulf %304, %304 : vector<1x8x32xf32>
    %cst_153 = arith.constant dense<0.000000e+00> : vector<1x8xf32>
    %306 = vector.multi_reduction <add>, %305, %cst_153 [2] : vector<1x8x32xf32> to vector<1x8xf32>
    %307 = vector.shape_cast %306 : vector<1x8xf32> to vector<1x8x1xf32>
    %cst_154 = arith.constant 3.200000e+01 : f32
    %308 = vector.broadcast %cst_154 : f32 to vector<1x8x1xf32>
    %309 = arith.divf %307, %308 : vector<1x8x1xf32>
    %cst_155 = arith.constant 9.99999974E-6 : f32
    %310 = vector.broadcast %cst_155 : f32 to vector<1x8x1xf32>
    %311 = arith.addf %309, %310 : vector<1x8x1xf32>
    %312 = math.rsqrt %311 : vector<1x8x1xf32>
    %313 = vector.broadcast %312 : vector<1x8x1xf32> to vector<1x8x32xf32>
    %314 = arith.mulf %304, %313 : vector<1x8x32xf32>
    %315 = vector.shape_cast %296 : vector<1x32xf32> to vector<1x1x32xf32>
    %316 = vector.broadcast %315 : vector<1x1x32xf32> to vector<1x8x32xf32>
    %317 = arith.mulf %314, %316 : vector<1x8x32xf32>
    %318 = vector.shape_cast %298 : vector<1x32xf32> to vector<1x1x32xf32>
    %319 = vector.broadcast %318 : vector<1x1x32xf32> to vector<1x8x32xf32>
    %320 = arith.addf %317, %319 : vector<1x8x32xf32>
    %c0_156 = arith.constant 0 : index
    %c0_157 = arith.constant 0 : index
    %321 = vector.load %arg20[%c0_156, %c0_157] : memref<1x32xf32, #tpu.memory_space<vmem>>, vector<1x32xf32>
    %c0_158 = arith.constant 0 : index
    %c0_159 = arith.constant 0 : index
    %322 = vector.load %arg21[%c0_158, %c0_159] : memref<1x32xf32, #tpu.memory_space<vmem>>, vector<1x32xf32>
    %cst_160 = arith.constant dense<0.000000e+00> : vector<1x8xf32>
    %323 = vector.multi_reduction <add>, %320, %cst_160 [2] : vector<1x8x32xf32> to vector<1x8xf32>
    %324 = vector.shape_cast %323 : vector<1x8xf32> to vector<1x8x1xf32>
    %cst_161 = arith.constant 3.200000e+01 : f32
    %325 = vector.broadcast %cst_161 : f32 to vector<1x8x1xf32>
    %326 = arith.divf %324, %325 : vector<1x8x1xf32>
    %327 = vector.broadcast %326 : vector<1x8x1xf32> to vector<1x8x32xf32>
    %328 = arith.subf %320, %327 : vector<1x8x32xf32>
    %329 = arith.mulf %328, %328 : vector<1x8x32xf32>
    %cst_162 = arith.constant dense<0.000000e+00> : vector<1x8xf32>
    %330 = vector.multi_reduction <add>, %329, %cst_162 [2] : vector<1x8x32xf32> to vector<1x8xf32>
    %331 = vector.shape_cast %330 : vector<1x8xf32> to vector<1x8x1xf32>
    %cst_163 = arith.constant 3.200000e+01 : f32
    %332 = vector.broadcast %cst_163 : f32 to vector<1x8x1xf32>
    %333 = arith.divf %331, %332 : vector<1x8x1xf32>
    %cst_164 = arith.constant 9.99999974E-6 : f32
    %334 = vector.broadcast %cst_164 : f32 to vector<1x8x1xf32>
    %335 = arith.addf %333, %334 : vector<1x8x1xf32>
    %336 = math.rsqrt %335 : vector<1x8x1xf32>
    %337 = vector.broadcast %336 : vector<1x8x1xf32> to vector<1x8x32xf32>
    %338 = arith.mulf %328, %337 : vector<1x8x32xf32>
    %339 = vector.shape_cast %321 : vector<1x32xf32> to vector<1x1x32xf32>
    %340 = vector.broadcast %339 : vector<1x1x32xf32> to vector<1x8x32xf32>
    %341 = arith.mulf %338, %340 : vector<1x8x32xf32>
    %342 = vector.shape_cast %322 : vector<1x32xf32> to vector<1x1x32xf32>
    %343 = vector.broadcast %342 : vector<1x1x32xf32> to vector<1x8x32xf32>
    %344 = arith.addf %341, %343 : vector<1x8x32xf32>
    %345 = arith.truncf %344 : vector<1x8x32xf32> to vector<1x8x32xbf16>
    %c0_165 = arith.constant 0 : index
    %c0_166 = arith.constant 0 : index
    %c0_167 = arith.constant 0 : index
    %346 = vector.load %arg22[%c0_165, %c0_166, %c0_167] : memref<1x8x32xbf16, #tpu.memory_space<vmem>>, vector<1x8x32xbf16>
    tpu.vector_store %arg22[%c0_165, %c0_166, %c0_167], %345 {strides = array<i32>} : memref<1x8x32xbf16, #tpu.memory_space<vmem>>, vector<1x8x32xbf16>,
    return
  }
  func.func @transform_0(%arg0: i32) -> (i32, i32, i32) {
    %c0_i32 = arith.constant 0 : i32
    %c0_i32_0 = arith.constant 0 : i32
    %c0_i32_1 = arith.constant 0 : i32
    return %arg0, %c0_i32, %c0_i32_0 : i32, i32, i32
  }
  func.func @transform_1(%arg0: i32) -> (i32, i32) {
    %c0_i32 = arith.constant 0 : i32
    %c0_i32_0 = arith.constant 0 : i32
    %c0_i32_1 = arith.constant 0 : i32
    return %c0_i32, %c0_i32_0 : i32, i32
  }
  func.func @transform_2(%arg0: i32) -> (i32, i32, i32) {
    %c0_i32 = arith.constant 0 : i32
    %c0_i32_0 = arith.constant 0 : i32
    %c0_i32_1 = arith.constant 0 : i32
    return %arg0, %c0_i32, %c0_i32_0 : i32, i32, i32
  }
  func.func @transform_3(%arg0: i32) -> (i32, i32, i32) {
    %c0_i32 = arith.constant 0 : i32
    %c0_i32_0 = arith.constant 0 : i32
    %c0_i32_1 = arith.constant 0 : i32
    %c0_i32_2 = arith.constant 0 : i32
    return %c0_i32, %c0_i32_0, %c0_i32_1 : i32, i32, i32
  }
  func.func @transform_4(%arg0: i32) -> (i32, i32, i32) {
    %c0_i32 = arith.constant 0 : i32
    %c0_i32_0 = arith.constant 0 : i32
    %c0_i32_1 = arith.constant 0 : i32
    %c0_i32_2 = arith.constant 0 : i32
    return %c0_i32, %c0_i32_0, %c0_i32_1 : i32, i32, i32
  }
  func.func @transform_5(%arg0: i32) -> (i32, i32, i32) {
    %c0_i32 = arith.constant 0 : i32
    %c0_i32_0 = arith.constant 0 : i32
    %c0_i32_1 = arith.constant 0 : i32
    %c0_i32_2 = arith.constant 0 : i32
    return %c0_i32, %c0_i32_0, %c0_i32_1 : i32, i32, i32
  }
  func.func @transform_6(%arg0: i32) -> (i32, i32, i32) {
    %c0_i32 = arith.constant 0 : i32
    %c0_i32_0 = arith.constant 0 : i32
    %c0_i32_1 = arith.constant 0 : i32
    %c0_i32_2 = arith.constant 0 : i32
    return %c0_i32, %c0_i32_0, %c0_i32_1 : i32, i32, i32
  }
  func.func @transform_7(%arg0: i32) -> (i32, i32, i32) {
    %c0_i32 = arith.constant 0 : i32
    %c0_i32_0 = arith.constant 0 : i32
    %c0_i32_1 = arith.constant 0 : i32
    %c0_i32_2 = arith.constant 0 : i32
    return %c0_i32, %c0_i32_0, %c0_i32_1 : i32, i32, i32
  }
  func.func @transform_8(%arg0: i32) -> (i32, i32, i32) {
    %c0_i32 = arith.constant 0 : i32
    %c0_i32_0 = arith.constant 0 : i32
    %c0_i32_1 = arith.constant 0 : i32
    %c0_i32_2 = arith.constant 0 : i32
    return %c0_i32, %c0_i32_0, %c0_i32_1 : i32, i32, i32
  }
  func.func @transform_9(%arg0: i32) -> (i32, i32, i32) {
    %c0_i32 = arith.constant 0 : i32
    %c0_i32_0 = arith.constant 0 : i32
    %c0_i32_1 = arith.constant 0 : i32
    %c0_i32_2 = arith.constant 0 : i32
    return %c0_i32, %c0_i32_0, %c0_i32_1 : i32, i32, i32
  }
  func.func @transform_10(%arg0: i32) -> (i32, i32, i32) {
    %c0_i32 = arith.constant 0 : i32
    %c0_i32_0 = arith.constant 0 : i32
    %c0_i32_1 = arith.constant 0 : i32
    %c0_i32_2 = arith.constant 0 : i32
    return %c0_i32, %c0_i32_0, %c0_i32_1 : i32, i32, i32
  }
  func.func @transform_11(%arg0: i32) -> (i32, i32, i32) {
    %c0_i32 = arith.constant 0 : i32
    %c0_i32_0 = arith.constant 0 : i32
    %c0_i32_1 = arith.constant 0 : i32
    %c0_i32_2 = arith.constant 0 : i32
    return %c0_i32, %c0_i32_0, %c0_i32_1 : i32, i32, i32
  }
  func.func @transform_12(%arg0: i32) -> (i32, i32, i32) {
    %c0_i32 = arith.constant 0 : i32
    %c0_i32_0 = arith.constant 0 : i32
    %c0_i32_1 = arith.constant 0 : i32
    %c0_i32_2 = arith.constant 0 : i32
    return %c0_i32, %c0_i32_0, %c0_i32_1 : i32, i32, i32
  }
  func.func @transform_13(%arg0: i32) -> (i32, i32, i32) {
    %c0_i32 = arith.constant 0 : i32
    %c0_i32_0 = arith.constant 0 : i32
    %c0_i32_1 = arith.constant 0 : i32
    %c0_i32_2 = arith.constant 0 : i32
    return %c0_i32, %c0_i32_0, %c0_i32_1 : i32, i32, i32
  }
  func.func @transform_14(%arg0: i32) -> (i32, i32, i32) {
    %c0_i32 = arith.constant 0 : i32
    %c0_i32_0 = arith.constant 0 : i32
    %c0_i32_1 = arith.constant 0 : i32
    %c0_i32_2 = arith.constant 0 : i32
    return %c0_i32, %c0_i32_0, %c0_i32_1 : i32, i32, i32
  }
  func.func @transform_15(%arg0: i32) -> (i32, i32, i32) {
    %c0_i32 = arith.constant 0 : i32
    %c0_i32_0 = arith.constant 0 : i32
    %c0_i32_1 = arith.constant 0 : i32
    %c0_i32_2 = arith.constant 0 : i32
    return %c0_i32, %c0_i32_0, %c0_i32_1 : i32, i32, i32
  }
  func.func @transform_16(%arg0: i32) -> (i32, i32, i32) {
    %c0_i32 = arith.constant 0 : i32
    %c0_i32_0 = arith.constant 0 : i32
    %c0_i32_1 = arith.constant 0 : i32
    %c0_i32_2 = arith.constant 0 : i32
    return %c0_i32, %c0_i32_0, %c0_i32_1 : i32, i32, i32
  }
  func.func @transform_17(%arg0: i32) -> (i32, i32, i32) {
    %c0_i32 = arith.constant 0 : i32
    %c0_i32_0 = arith.constant 0 : i32
    %c0_i32_1 = arith.constant 0 : i32
    %c0_i32_2 = arith.constant 0 : i32
    return %c0_i32, %c0_i32_0, %c0_i32_1 : i32, i32, i32
  }
  func.func @transform_18(%arg0: i32) -> (i32, i32, i32) {
    %c0_i32 = arith.constant 0 : i32
    %c0_i32_0 = arith.constant 0 : i32
    %c0_i32_1 = arith.constant 0 : i32
    %c0_i32_2 = arith.constant 0 : i32
    return %c0_i32, %c0_i32_0, %c0_i32_1 : i32, i32, i32
  }
  func.func @transform_19(%arg0: i32) -> (i32, i32) {
    %c0_i32 = arith.constant 0 : i32
    %c0_i32_0 = arith.constant 0 : i32
    %c0_i32_1 = arith.constant 0 : i32
    return %c0_i32, %c0_i32_0 : i32, i32
  }
  func.func @transform_20(%arg0: i32) -> (i32, i32) {
    %c0_i32 = arith.constant 0 : i32
    %c0_i32_0 = arith.constant 0 : i32
    %c0_i32_1 = arith.constant 0 : i32
    return %c0_i32, %c0_i32_0 : i32, i32
  }
  func.func @transform_21(%arg0: i32) -> (i32, i32, i32) {
    %c0_i32 = arith.constant 0 : i32
    %c0_i32_0 = arith.constant 0 : i32
    %c0_i32_1 = arith.constant 0 : i32
    return %arg0, %c0_i32, %c0_i32_0 : i32, i32, i32
  }
}

module attributes {stable_mosaic.version = 11 : i64} {
  func.func @_decoder_kernel(%arg0: i32, %arg1: memref<1x8x32xf32, #tpu.memory_space<vmem>>, %arg2: memref<1x8x32xbf16, #tpu.memory_space<vmem>>, %arg3: memref<8x8xf32, #tpu.memory_space<vmem>>, %arg4: memref<1x1x8xf32, #tpu.memory_space<vmem>>, %arg5: memref<1x1x8xf32, #tpu.memory_space<vmem>>, %arg6: memref<2x32x32xbf16, #tpu.memory_space<vmem>>, %arg7: memref<2x1x32xf32, #tpu.memory_space<vmem>>, %arg8: memref<2x32x32xbf16, #tpu.memory_space<vmem>>, %arg9: memref<2x1x32xf32, #tpu.memory_space<vmem>>, %arg10: memref<2x32x32xbf16, #tpu.memory_space<vmem>>, %arg11: memref<2x1x32xf32, #tpu.memory_space<vmem>>, %arg12: memref<2x32x32xbf16, #tpu.memory_space<vmem>>, %arg13: memref<2x1x32xf32, #tpu.memory_space<vmem>>, %arg14: memref<2x1x32xf32, #tpu.memory_space<vmem>>, %arg15: memref<2x1x32xf32, #tpu.memory_space<vmem>>, %arg16: memref<2x32x32xbf16, #tpu.memory_space<vmem>>, %arg17: memref<2x1x32xf32, #tpu.memory_space<vmem>>, %arg18: memref<2x32x32xbf16, #tpu.memory_space<vmem>>, %arg19: memref<2x1x32xf32, #tpu.memory_space<vmem>>, %arg20: memref<2x32x32xbf16, #tpu.memory_space<vmem>>, %arg21: memref<2x1x32xf32, #tpu.memory_space<vmem>>, %arg22: memref<2x32x32xbf16, #tpu.memory_space<vmem>>, %arg23: memref<2x1x32xf32, #tpu.memory_space<vmem>>, %arg24: memref<2x1x32xf32, #tpu.memory_space<vmem>>, %arg25: memref<2x1x32xf32, #tpu.memory_space<vmem>>, %arg26: memref<2x32x64xbf16, #tpu.memory_space<vmem>>, %arg27: memref<2x1x64xf32, #tpu.memory_space<vmem>>, %arg28: memref<2x64x32xbf16, #tpu.memory_space<vmem>>, %arg29: memref<2x1x32xf32, #tpu.memory_space<vmem>>, %arg30: memref<2x1x32xf32, #tpu.memory_space<vmem>>, %arg31: memref<2x1x32xf32, #tpu.memory_space<vmem>>, %arg32: memref<1x32xf32, #tpu.memory_space<vmem>>, %arg33: memref<1x32xf32, #tpu.memory_space<vmem>>, %arg34: memref<32x128xbf16, #tpu.memory_space<vmem>>, %arg35: memref<1x128xf32, #tpu.memory_space<vmem>>, %arg36: memref<1x8x128xf32, #tpu.memory_space<vmem>>) attributes {dimension_semantics = [#tpu.dimension_semantics<parallel>], iteration_bounds = array<i64: 2>, scalar_prefetch = 0 : i64, scratch_operands = 0 : i64, tpu.core_type = #tpu.core_type<tc>, window_params = [{transform_indices = @transform_0, window_bounds = array<i64: 1, 8, 32>}, {transform_indices = @transform_1, window_bounds = array<i64: 1, 8, 32>}, {pipeline_mode = #tpu.pipeline_mode<synchronous>, transform_indices = @transform_2, window_bounds = array<i64: 8, 8>}, {transform_indices = @transform_3, window_bounds = array<i64: 1, 1, 8>}, {transform_indices = @transform_4, window_bounds = array<i64: 1, 1, 8>}, {pipeline_mode = #tpu.pipeline_mode<synchronous>, transform_indices = @transform_5, window_bounds = array<i64: 2, 32, 32>}, {pipeline_mode = #tpu.pipeline_mode<synchronous>, transform_indices = @transform_6, window_bounds = array<i64: 2, 1, 32>}, {pipeline_mode = #tpu.pipeline_mode<synchronous>, transform_indices = @transform_7, window_bounds = array<i64: 2, 32, 32>}, {pipeline_mode = #tpu.pipeline_mode<synchronous>, transform_indices = @transform_8, window_bounds = array<i64: 2, 1, 32>}, {pipeline_mode = #tpu.pipeline_mode<synchronous>, transform_indices = @transform_9, window_bounds = array<i64: 2, 32, 32>}, {pipeline_mode = #tpu.pipeline_mode<synchronous>, transform_indices = @transform_10, window_bounds = array<i64: 2, 1, 32>}, {pipeline_mode = #tpu.pipeline_mode<synchronous>, transform_indices = @transform_11, window_bounds = array<i64: 2, 32, 32>}, {pipeline_mode = #tpu.pipeline_mode<synchronous>, transform_indices = @transform_12, window_bounds = array<i64: 2, 1, 32>}, {pipeline_mode = #tpu.pipeline_mode<synchronous>, transform_indices = @transform_13, window_bounds = array<i64: 2, 1, 32>}, {pipeline_mode = #tpu.pipeline_mode<synchronous>, transform_indices = @transform_14, window_bounds = array<i64: 2, 1, 32>}, {pipeline_mode = #tpu.pipeline_mode<synchronous>, transform_indices = @transform_15, window_bounds = array<i64: 2, 32, 32>}, {pipeline_mode = #tpu.pipeline_mode<synchronous>, transform_indices = @transform_16, window_bounds = array<i64: 2, 1, 32>}, {pipeline_mode = #tpu.pipeline_mode<synchronous>, transform_indices = @transform_17, window_bounds = array<i64: 2, 32, 32>}, {pipeline_mode = #tpu.pipeline_mode<synchronous>, transform_indices = @transform_18, window_bounds = array<i64: 2, 1, 32>}, {pipeline_mode = #tpu.pipeline_mode<synchronous>, transform_indices = @transform_19, window_bounds = array<i64: 2, 32, 32>}, {pipeline_mode = #tpu.pipeline_mode<synchronous>, transform_indices = @transform_20, window_bounds = array<i64: 2, 1, 32>}, {pipeline_mode = #tpu.pipeline_mode<synchronous>, transform_indices = @transform_21, window_bounds = array<i64: 2, 32, 32>}, {pipeline_mode = #tpu.pipeline_mode<synchronous>, transform_indices = @transform_22, window_bounds = array<i64: 2, 1, 32>}, {pipeline_mode = #tpu.pipeline_mode<synchronous>, transform_indices = @transform_23, window_bounds = array<i64: 2, 1, 32>}, {pipeline_mode = #tpu.pipeline_mode<synchronous>, transform_indices = @transform_24, window_bounds = array<i64: 2, 1, 32>}, {pipeline_mode = #tpu.pipeline_mode<synchronous>, transform_indices = @transform_25, window_bounds = array<i64: 2, 32, 64>}, {pipeline_mode = #tpu.pipeline_mode<synchronous>, transform_indices = @transform_26, window_bounds = array<i64: 2, 1, 64>}, {pipeline_mode = #tpu.pipeline_mode<synchronous>, transform_indices = @transform_27, window_bounds = array<i64: 2, 64, 32>}, {pipeline_mode = #tpu.pipeline_mode<synchronous>, transform_indices = @transform_28, window_bounds = array<i64: 2, 1, 32>}, {pipeline_mode = #tpu.pipeline_mode<synchronous>, transform_indices = @transform_29, window_bounds = array<i64: 2, 1, 32>}, {pipeline_mode = #tpu.pipeline_mode<synchronous>, transform_indices = @transform_30, window_bounds = array<i64: 2, 1, 32>}, {pipeline_mode = #tpu.pipeline_mode<synchronous>, transform_indices = @transform_31, window_bounds = array<i64: 1, 32>}, {pipeline_mode = #tpu.pipeline_mode<synchronous>, transform_indices = @transform_32, window_bounds = array<i64: 1, 32>}, {pipeline_mode = #tpu.pipeline_mode<synchronous>, transform_indices = @transform_33, window_bounds = array<i64: 32, 128>}, {pipeline_mode = #tpu.pipeline_mode<synchronous>, transform_indices = @transform_34, window_bounds = array<i64: 1, 128>}, {transform_indices = @transform_35, window_bounds = array<i64: 1, 8, 128>}]} {
    %c0 = arith.constant 0 : index
    %c0_0 = arith.constant 0 : index
    %c0_1 = arith.constant 0 : index
    %0 = vector.load %arg1[%c0, %c0_0, %c0_1] : memref<1x8x32xf32, #tpu.memory_space<vmem>>, vector<1x8x32xf32>
    %c0_2 = arith.constant 0 : index
    %c0_3 = arith.constant 0 : index
    %c0_4 = arith.constant 0 : index
    %1 = vector.load %arg2[%c0_2, %c0_3, %c0_4] : memref<1x8x32xbf16, #tpu.memory_space<vmem>>, vector<1x8x32xbf16>
    %c0_5 = arith.constant 0 : index
    %c0_6 = arith.constant 0 : index
    %2 = vector.load %arg3[%c0_5, %c0_6] : memref<8x8xf32, #tpu.memory_space<vmem>>, vector<8x8xf32>
    %cst = arith.constant -1.000000e+30 : f32
    %3 = vector.broadcast %cst : f32 to vector<8x8xf32>
    %4 = arith.maximumf %2, %3 : vector<8x8xf32>
    %c0_7 = arith.constant 0 : index
    %c0_8 = arith.constant 0 : index
    %c0_9 = arith.constant 0 : index
    %5 = vector.load %arg4[%c0_7, %c0_8, %c0_9] : memref<1x1x8xf32, #tpu.memory_space<vmem>>, vector<1x1x8xf32>
    %6 = vector.shape_cast %4 : vector<8x8xf32> to vector<1x8x8xf32>
    %cst_10 = arith.constant 5.000000e-01 : f32
    %7 = vector.broadcast %cst_10 : f32 to vector<1x1x8xf32>
    %8 = arith.cmpf ogt, %5, %7 : vector<1x1x8xf32>
    %cst_11 = arith.constant -1.000000e+30 : f32
    %cst_12 = arith.constant 0.000000e+00 : f32
    %9 = vector.broadcast %cst_11 : f32 to vector<1x1x8xf32>
    %10 = vector.broadcast %cst_12 : f32 to vector<1x1x8xf32>
    %11 = arith.select %8, %9, %10 : vector<1x1x8xi1>, vector<1x1x8xf32>
    %12 = vector.broadcast %11 : vector<1x1x8xf32> to vector<1x8x8xf32>
    %13 = arith.addf %6, %12 : vector<1x8x8xf32>
    %cst_13 = arith.constant -1.000000e+30 : f32
    %14 = vector.broadcast %cst_13 : f32 to vector<1x8x8xf32>
    %15 = arith.maximumf %13, %14 : vector<1x8x8xf32>
    %c0_14 = arith.constant 0 : index
    %c0_15 = arith.constant 0 : index
    %c0_16 = arith.constant 0 : index
    %16 = vector.load %arg5[%c0_14, %c0_15, %c0_16] : memref<1x1x8xf32, #tpu.memory_space<vmem>>, vector<1x1x8xf32>
    %cst_17 = arith.constant 5.000000e-01 : f32
    %17 = vector.broadcast %cst_17 : f32 to vector<1x1x8xf32>
    %18 = arith.cmpf ogt, %16, %17 : vector<1x1x8xf32>
    %cst_18 = arith.constant -1.000000e+30 : f32
    %cst_19 = arith.constant 0.000000e+00 : f32
    %19 = vector.broadcast %cst_18 : f32 to vector<1x1x8xf32>
    %20 = vector.broadcast %cst_19 : f32 to vector<1x1x8xf32>
    %21 = arith.select %18, %19, %20 : vector<1x1x8xi1>, vector<1x1x8xf32>
    %c0_20 = arith.constant 0 : index
    %c0_21 = arith.constant 0 : index
    %c0_22 = arith.constant 0 : index
    %22 = vector.load %arg6[%c0_20, %c0_21, %c0_22] : memref<2x32x32xbf16, #tpu.memory_space<vmem>>, vector<1x32x32xbf16>
    %23 = vector.shape_cast %22 : vector<1x32x32xbf16> to vector<32x32xbf16>
    %c0_23 = arith.constant 0 : index
    %c0_24 = arith.constant 0 : index
    %c0_25 = arith.constant 0 : index
    %24 = vector.load %arg7[%c0_23, %c0_24, %c0_25] : memref<2x1x32xf32, #tpu.memory_space<vmem>>, vector<1x1x32xf32>
    %25 = vector.shape_cast %24 : vector<1x1x32xf32> to vector<1x32xf32>
    %c0_26 = arith.constant 0 : index
    %c0_27 = arith.constant 0 : index
    %c0_28 = arith.constant 0 : index
    %26 = vector.load %arg8[%c0_26, %c0_27, %c0_28] : memref<2x32x32xbf16, #tpu.memory_space<vmem>>, vector<1x32x32xbf16>
    %27 = vector.shape_cast %26 : vector<1x32x32xbf16> to vector<32x32xbf16>
    %c0_29 = arith.constant 0 : index
    %c0_30 = arith.constant 0 : index
    %c0_31 = arith.constant 0 : index
    %28 = vector.load %arg9[%c0_29, %c0_30, %c0_31] : memref<2x1x32xf32, #tpu.memory_space<vmem>>, vector<1x1x32xf32>
    %29 = vector.shape_cast %28 : vector<1x1x32xf32> to vector<1x32xf32>
    %c0_32 = arith.constant 0 : index
    %c0_33 = arith.constant 0 : index
    %c0_34 = arith.constant 0 : index
    %30 = vector.load %arg10[%c0_32, %c0_33, %c0_34] : memref<2x32x32xbf16, #tpu.memory_space<vmem>>, vector<1x32x32xbf16>
    %31 = vector.shape_cast %30 : vector<1x32x32xbf16> to vector<32x32xbf16>
    %c0_35 = arith.constant 0 : index
    %c0_36 = arith.constant 0 : index
    %c0_37 = arith.constant 0 : index
    %32 = vector.load %arg11[%c0_35, %c0_36, %c0_37] : memref<2x1x32xf32, #tpu.memory_space<vmem>>, vector<1x1x32xf32>
    %33 = vector.shape_cast %32 : vector<1x1x32xf32> to vector<1x32xf32>
    %c0_38 = arith.constant 0 : index
    %c0_39 = arith.constant 0 : index
    %c0_40 = arith.constant 0 : index
    %34 = vector.load %arg12[%c0_38, %c0_39, %c0_40] : memref<2x32x32xbf16, #tpu.memory_space<vmem>>, vector<1x32x32xbf16>
    %35 = vector.shape_cast %34 : vector<1x32x32xbf16> to vector<32x32xbf16>
    %c0_41 = arith.constant 0 : index
    %c0_42 = arith.constant 0 : index
    %c0_43 = arith.constant 0 : index
    %36 = vector.load %arg13[%c0_41, %c0_42, %c0_43] : memref<2x1x32xf32, #tpu.memory_space<vmem>>, vector<1x1x32xf32>
    %37 = vector.shape_cast %36 : vector<1x1x32xf32> to vector<1x32xf32>
    %38 = arith.truncf %0 : vector<1x8x32xf32> to vector<1x8x32xbf16>
    %39 = vector.shape_cast %38 : vector<1x8x32xbf16> to vector<8x32xbf16>
    %40 = arith.truncf %0 : vector<1x8x32xf32> to vector<1x8x32xbf16>
    %41 = vector.shape_cast %40 : vector<1x8x32xbf16> to vector<8x32xbf16>
    %cst_44 = arith.constant dense<0.000000e+00> : vector<8x32xf32>
    %42 = tpu.matmul %39, %23, %cst_44 {dimension_numbers = #tpu.dot_dimension_numbers<[1], [0], [0], [1], [0, 0, 1, 1], [], []>} : vector<8x32xbf16>, vector<32x32xbf16>, vector<8x32xf32> -> vector<8x32xf32>
    %43 = vector.broadcast %25 : vector<1x32xf32> to vector<8x32xf32>
    %44 = arith.addf %42, %43 : vector<8x32xf32>
    %45 = vector.shape_cast %44 : vector<8x32xf32> to vector<1x8x32xf32>
    %cst_45 = arith.constant dense<0.000000e+00> : vector<8x32xf32>
    %46 = tpu.matmul %41, %27, %cst_45 {dimension_numbers = #tpu.dot_dimension_numbers<[1], [0], [0], [1], [0, 0, 1, 1], [], []>} : vector<8x32xbf16>, vector<32x32xbf16>, vector<8x32xf32> -> vector<8x32xf32>
    %47 = vector.broadcast %29 : vector<1x32xf32> to vector<8x32xf32>
    %48 = arith.addf %46, %47 : vector<8x32xf32>
    %49 = vector.shape_cast %48 : vector<8x32xf32> to vector<1x8x32xf32>
    %cst_46 = arith.constant dense<0.000000e+00> : vector<8x32xf32>
    %50 = tpu.matmul %41, %31, %cst_46 {dimension_numbers = #tpu.dot_dimension_numbers<[1], [0], [0], [1], [0, 0, 1, 1], [], []>} : vector<8x32xbf16>, vector<32x32xbf16>, vector<8x32xf32> -> vector<8x32xf32>
    %51 = vector.broadcast %33 : vector<1x32xf32> to vector<8x32xf32>
    %52 = arith.addf %50, %51 : vector<8x32xf32>
    %53 = vector.shape_cast %52 : vector<8x32xf32> to vector<1x8x32xf32>
    %54 = vector.extract_strided_slice %45 {offsets = [0, 0, 0], sizes = [1, 8, 16], strides = [1, 1, 1]} : vector<1x8x32xf32> to vector<1x8x16xf32>
    %55 = arith.truncf %54 : vector<1x8x16xf32> to vector<1x8x16xbf16>
    %56 = vector.extract_strided_slice %49 {offsets = [0, 0, 0], sizes = [1, 8, 16], strides = [1, 1, 1]} : vector<1x8x32xf32> to vector<1x8x16xf32>
    %57 = arith.truncf %56 : vector<1x8x16xf32> to vector<1x8x16xbf16>
    %58 = vector.extract_strided_slice %53 {offsets = [0, 0, 0], sizes = [1, 8, 16], strides = [1, 1, 1]} : vector<1x8x32xf32> to vector<1x8x16xf32>
    %59 = arith.truncf %58 : vector<1x8x16xf32> to vector<1x8x16xbf16>
    "tpu.trace_start"() <{level = 10 : i32, message = "bqd,bkd->bqk"}> : () -> ()
    %cst_47 = arith.constant dense<0.000000e+00> : vector<1x8x8xf32>
    %60 = tpu.matmul %55, %57, %cst_47 {dimension_numbers = #tpu.dot_dimension_numbers<[2], [2], [1], [1], [0, 0, 0, 1, 1, 1], [0], [0]>} : vector<1x8x16xbf16>, vector<1x8x16xbf16>, vector<1x8x8xf32> -> vector<1x8x8xf32>
    "tpu.trace_stop"() : () -> ()
    %61 = arith.addf %60, %15 : vector<1x8x8xf32>
    %cst_48 = arith.constant dense<0xFF800000> : vector<1x8xf32>
    %62 = vector.multi_reduction <maximumf>, %61, %cst_48 [2] : vector<1x8x8xf32> to vector<1x8xf32>
    %63 = vector.shape_cast %62 : vector<1x8xf32> to vector<1x8x1xf32>
    %64 = vector.broadcast %63 : vector<1x8x1xf32> to vector<1x8x8xf32>
    %65 = arith.subf %61, %64 : vector<1x8x8xf32>
    %66 = math.exp %65 : vector<1x8x8xf32>
    %cst_49 = arith.constant dense<0.000000e+00> : vector<1x8xf32>
    %67 = vector.multi_reduction <add>, %66, %cst_49 [2] : vector<1x8x8xf32> to vector<1x8xf32>
    %68 = vector.shape_cast %67 : vector<1x8xf32> to vector<1x8x1xf32>
    %69 = tpu.reciprocal %68 {approx = true} : vector<1x8x1xf32> -> vector<1x8x1xf32>
    %70 = vector.broadcast %69 : vector<1x8x1xf32> to vector<1x8x8xf32>
    %71 = arith.mulf %66, %70 : vector<1x8x8xf32>
    %72 = arith.truncf %71 : vector<1x8x8xf32> to vector<1x8x8xbf16>
    "tpu.trace_start"() <{level = 10 : i32, message = "bqk,bkd->bqd"}> : () -> ()
    %cst_50 = arith.constant dense<0.000000e+00> : vector<1x8x16xf32>
    %73 = tpu.matmul %72, %59, %cst_50 {dimension_numbers = #tpu.dot_dimension_numbers<[2], [1], [1], [2], [0, 0, 0, 1, 1, 2], [0], [0]>} : vector<1x8x8xbf16>, vector<1x8x16xbf16>, vector<1x8x16xf32> -> vector<1x8x16xf32>
    "tpu.trace_stop"() : () -> ()
    %74 = vector.extract_strided_slice %45 {offsets = [0, 0, 16], sizes = [1, 8, 16], strides = [1, 1, 1]} : vector<1x8x32xf32> to vector<1x8x16xf32>
    %75 = arith.truncf %74 : vector<1x8x16xf32> to vector<1x8x16xbf16>
    %76 = vector.extract_strided_slice %49 {offsets = [0, 0, 16], sizes = [1, 8, 16], strides = [1, 1, 1]} : vector<1x8x32xf32> to vector<1x8x16xf32>
    %77 = arith.truncf %76 : vector<1x8x16xf32> to vector<1x8x16xbf16>
    %78 = vector.extract_strided_slice %53 {offsets = [0, 0, 16], sizes = [1, 8, 16], strides = [1, 1, 1]} : vector<1x8x32xf32> to vector<1x8x16xf32>
    %79 = arith.truncf %78 : vector<1x8x16xf32> to vector<1x8x16xbf16>
    "tpu.trace_start"() <{level = 10 : i32, message = "bqd,bkd->bqk"}> : () -> ()
    %cst_51 = arith.constant dense<0.000000e+00> : vector<1x8x8xf32>
    %80 = tpu.matmul %75, %77, %cst_51 {dimension_numbers = #tpu.dot_dimension_numbers<[2], [2], [1], [1], [0, 0, 0, 1, 1, 1], [0], [0]>} : vector<1x8x16xbf16>, vector<1x8x16xbf16>, vector<1x8x8xf32> -> vector<1x8x8xf32>
    "tpu.trace_stop"() : () -> ()
    %81 = arith.addf %80, %15 : vector<1x8x8xf32>
    %cst_52 = arith.constant dense<0xFF800000> : vector<1x8xf32>
    %82 = vector.multi_reduction <maximumf>, %81, %cst_52 [2] : vector<1x8x8xf32> to vector<1x8xf32>
    %83 = vector.shape_cast %82 : vector<1x8xf32> to vector<1x8x1xf32>
    %84 = vector.broadcast %83 : vector<1x8x1xf32> to vector<1x8x8xf32>
    %85 = arith.subf %81, %84 : vector<1x8x8xf32>
    %86 = math.exp %85 : vector<1x8x8xf32>
    %cst_53 = arith.constant dense<0.000000e+00> : vector<1x8xf32>
    %87 = vector.multi_reduction <add>, %86, %cst_53 [2] : vector<1x8x8xf32> to vector<1x8xf32>
    %88 = vector.shape_cast %87 : vector<1x8xf32> to vector<1x8x1xf32>
    %89 = tpu.reciprocal %88 {approx = true} : vector<1x8x1xf32> -> vector<1x8x1xf32>
    %90 = vector.broadcast %89 : vector<1x8x1xf32> to vector<1x8x8xf32>
    %91 = arith.mulf %86, %90 : vector<1x8x8xf32>
    %92 = arith.truncf %91 : vector<1x8x8xf32> to vector<1x8x8xbf16>
    "tpu.trace_start"() <{level = 10 : i32, message = "bqk,bkd->bqd"}> : () -> ()
    %cst_54 = arith.constant dense<0.000000e+00> : vector<1x8x16xf32>
    %93 = tpu.matmul %92, %79, %cst_54 {dimension_numbers = #tpu.dot_dimension_numbers<[2], [1], [1], [2], [0, 0, 0, 1, 1, 2], [0], [0]>} : vector<1x8x8xbf16>, vector<1x8x16xbf16>, vector<1x8x16xf32> -> vector<1x8x16xf32>
    "tpu.trace_stop"() : () -> ()
    %94 = tpu.concatenate %73, %93 in 2 : vector<1x8x16xf32>, vector<1x8x16xf32> -> vector<1x8x32xf32>
    %95 = arith.truncf %94 : vector<1x8x32xf32> to vector<1x8x32xbf16>
    %96 = vector.shape_cast %95 : vector<1x8x32xbf16> to vector<8x32xbf16>
    %cst_55 = arith.constant dense<0.000000e+00> : vector<8x32xf32>
    %97 = tpu.matmul %96, %35, %cst_55 {dimension_numbers = #tpu.dot_dimension_numbers<[1], [0], [0], [1], [0, 0, 1, 1], [], []>} : vector<8x32xbf16>, vector<32x32xbf16>, vector<8x32xf32> -> vector<8x32xf32>
    %98 = vector.broadcast %37 : vector<1x32xf32> to vector<8x32xf32>
    %99 = arith.addf %97, %98 : vector<8x32xf32>
    %100 = vector.shape_cast %99 : vector<8x32xf32> to vector<1x8x32xf32>
    %101 = arith.addf %0, %100 : vector<1x8x32xf32>
    %c0_56 = arith.constant 0 : index
    %c0_57 = arith.constant 0 : index
    %c0_58 = arith.constant 0 : index
    %102 = vector.load %arg14[%c0_56, %c0_57, %c0_58] : memref<2x1x32xf32, #tpu.memory_space<vmem>>, vector<1x1x32xf32>
    %103 = vector.shape_cast %102 : vector<1x1x32xf32> to vector<1x32xf32>
    %c0_59 = arith.constant 0 : index
    %c0_60 = arith.constant 0 : index
    %c0_61 = arith.constant 0 : index
    %104 = vector.load %arg15[%c0_59, %c0_60, %c0_61] : memref<2x1x32xf32, #tpu.memory_space<vmem>>, vector<1x1x32xf32>
    %105 = vector.shape_cast %104 : vector<1x1x32xf32> to vector<1x32xf32>
    %cst_62 = arith.constant dense<0.000000e+00> : vector<1x8xf32>
    %106 = vector.multi_reduction <add>, %101, %cst_62 [2] : vector<1x8x32xf32> to vector<1x8xf32>
    %107 = vector.shape_cast %106 : vector<1x8xf32> to vector<1x8x1xf32>
    %cst_63 = arith.constant 3.200000e+01 : f32
    %108 = vector.broadcast %cst_63 : f32 to vector<1x8x1xf32>
    %109 = arith.divf %107, %108 : vector<1x8x1xf32>
    %110 = vector.broadcast %109 : vector<1x8x1xf32> to vector<1x8x32xf32>
    %111 = arith.subf %101, %110 : vector<1x8x32xf32>
    %112 = arith.mulf %111, %111 : vector<1x8x32xf32>
    %cst_64 = arith.constant dense<0.000000e+00> : vector<1x8xf32>
    %113 = vector.multi_reduction <add>, %112, %cst_64 [2] : vector<1x8x32xf32> to vector<1x8xf32>
    %114 = vector.shape_cast %113 : vector<1x8xf32> to vector<1x8x1xf32>
    %cst_65 = arith.constant 3.200000e+01 : f32
    %115 = vector.broadcast %cst_65 : f32 to vector<1x8x1xf32>
    %116 = arith.divf %114, %115 : vector<1x8x1xf32>
    %cst_66 = arith.constant 9.99999974E-6 : f32
    %117 = vector.broadcast %cst_66 : f32 to vector<1x8x1xf32>
    %118 = arith.addf %116, %117 : vector<1x8x1xf32>
    %119 = math.rsqrt %118 : vector<1x8x1xf32>
    %120 = vector.broadcast %119 : vector<1x8x1xf32> to vector<1x8x32xf32>
    %121 = arith.mulf %111, %120 : vector<1x8x32xf32>
    %122 = vector.shape_cast %103 : vector<1x32xf32> to vector<1x1x32xf32>
    %123 = vector.broadcast %122 : vector<1x1x32xf32> to vector<1x8x32xf32>
    %124 = arith.mulf %121, %123 : vector<1x8x32xf32>
    %125 = vector.shape_cast %105 : vector<1x32xf32> to vector<1x1x32xf32>
    %126 = vector.broadcast %125 : vector<1x1x32xf32> to vector<1x8x32xf32>
    %127 = arith.addf %124, %126 : vector<1x8x32xf32>
    %c0_67 = arith.constant 0 : index
    %c0_68 = arith.constant 0 : index
    %c0_69 = arith.constant 0 : index
    %128 = vector.load %arg16[%c0_67, %c0_68, %c0_69] : memref<2x32x32xbf16, #tpu.memory_space<vmem>>, vector<1x32x32xbf16>
    %129 = vector.shape_cast %128 : vector<1x32x32xbf16> to vector<32x32xbf16>
    %c0_70 = arith.constant 0 : index
    %c0_71 = arith.constant 0 : index
    %c0_72 = arith.constant 0 : index
    %130 = vector.load %arg17[%c0_70, %c0_71, %c0_72] : memref<2x1x32xf32, #tpu.memory_space<vmem>>, vector<1x1x32xf32>
    %131 = vector.shape_cast %130 : vector<1x1x32xf32> to vector<1x32xf32>
    %c0_73 = arith.constant 0 : index
    %c0_74 = arith.constant 0 : index
    %c0_75 = arith.constant 0 : index
    %132 = vector.load %arg18[%c0_73, %c0_74, %c0_75] : memref<2x32x32xbf16, #tpu.memory_space<vmem>>, vector<1x32x32xbf16>
    %133 = vector.shape_cast %132 : vector<1x32x32xbf16> to vector<32x32xbf16>
    %c0_76 = arith.constant 0 : index
    %c0_77 = arith.constant 0 : index
    %c0_78 = arith.constant 0 : index
    %134 = vector.load %arg19[%c0_76, %c0_77, %c0_78] : memref<2x1x32xf32, #tpu.memory_space<vmem>>, vector<1x1x32xf32>
    %135 = vector.shape_cast %134 : vector<1x1x32xf32> to vector<1x32xf32>
    %c0_79 = arith.constant 0 : index
    %c0_80 = arith.constant 0 : index
    %c0_81 = arith.constant 0 : index
    %136 = vector.load %arg20[%c0_79, %c0_80, %c0_81] : memref<2x32x32xbf16, #tpu.memory_space<vmem>>, vector<1x32x32xbf16>
    %137 = vector.shape_cast %136 : vector<1x32x32xbf16> to vector<32x32xbf16>
    %c0_82 = arith.constant 0 : index
    %c0_83 = arith.constant 0 : index
    %c0_84 = arith.constant 0 : index
    %138 = vector.load %arg21[%c0_82, %c0_83, %c0_84] : memref<2x1x32xf32, #tpu.memory_space<vmem>>, vector<1x1x32xf32>
    %139 = vector.shape_cast %138 : vector<1x1x32xf32> to vector<1x32xf32>
    %c0_85 = arith.constant 0 : index
    %c0_86 = arith.constant 0 : index
    %c0_87 = arith.constant 0 : index
    %140 = vector.load %arg22[%c0_85, %c0_86, %c0_87] : memref<2x32x32xbf16, #tpu.memory_space<vmem>>, vector<1x32x32xbf16>
    %141 = vector.shape_cast %140 : vector<1x32x32xbf16> to vector<32x32xbf16>
    %c0_88 = arith.constant 0 : index
    %c0_89 = arith.constant 0 : index
    %c0_90 = arith.constant 0 : index
    %142 = vector.load %arg23[%c0_88, %c0_89, %c0_90] : memref<2x1x32xf32, #tpu.memory_space<vmem>>, vector<1x1x32xf32>
    %143 = vector.shape_cast %142 : vector<1x1x32xf32> to vector<1x32xf32>
    %144 = arith.truncf %127 : vector<1x8x32xf32> to vector<1x8x32xbf16>
    %145 = vector.shape_cast %144 : vector<1x8x32xbf16> to vector<8x32xbf16>
    %146 = vector.shape_cast %1 : vector<1x8x32xbf16> to vector<8x32xbf16>
    %cst_91 = arith.constant dense<0.000000e+00> : vector<8x32xf32>
    %147 = tpu.matmul %145, %129, %cst_91 {dimension_numbers = #tpu.dot_dimension_numbers<[1], [0], [0], [1], [0, 0, 1, 1], [], []>} : vector<8x32xbf16>, vector<32x32xbf16>, vector<8x32xf32> -> vector<8x32xf32>
    %148 = vector.broadcast %131 : vector<1x32xf32> to vector<8x32xf32>
    %149 = arith.addf %147, %148 : vector<8x32xf32>
    %150 = vector.shape_cast %149 : vector<8x32xf32> to vector<1x8x32xf32>
    %cst_92 = arith.constant dense<0.000000e+00> : vector<8x32xf32>
    %151 = tpu.matmul %146, %133, %cst_92 {dimension_numbers = #tpu.dot_dimension_numbers<[1], [0], [0], [1], [0, 0, 1, 1], [], []>} : vector<8x32xbf16>, vector<32x32xbf16>, vector<8x32xf32> -> vector<8x32xf32>
    %152 = vector.broadcast %135 : vector<1x32xf32> to vector<8x32xf32>
    %153 = arith.addf %151, %152 : vector<8x32xf32>
    %154 = vector.shape_cast %153 : vector<8x32xf32> to vector<1x8x32xf32>
    %cst_93 = arith.constant dense<0.000000e+00> : vector<8x32xf32>
    %155 = tpu.matmul %146, %137, %cst_93 {dimension_numbers = #tpu.dot_dimension_numbers<[1], [0], [0], [1], [0, 0, 1, 1], [], []>} : vector<8x32xbf16>, vector<32x32xbf16>, vector<8x32xf32> -> vector<8x32xf32>
    %156 = vector.broadcast %139 : vector<1x32xf32> to vector<8x32xf32>
    %157 = arith.addf %155, %156 : vector<8x32xf32>
    %158 = vector.shape_cast %157 : vector<8x32xf32> to vector<1x8x32xf32>
    %159 = vector.extract_strided_slice %150 {offsets = [0, 0, 0], sizes = [1, 8, 16], strides = [1, 1, 1]} : vector<1x8x32xf32> to vector<1x8x16xf32>
    %160 = arith.truncf %159 : vector<1x8x16xf32> to vector<1x8x16xbf16>
    %161 = vector.extract_strided_slice %154 {offsets = [0, 0, 0], sizes = [1, 8, 16], strides = [1, 1, 1]} : vector<1x8x32xf32> to vector<1x8x16xf32>
    %162 = arith.truncf %161 : vector<1x8x16xf32> to vector<1x8x16xbf16>
    %163 = vector.extract_strided_slice %158 {offsets = [0, 0, 0], sizes = [1, 8, 16], strides = [1, 1, 1]} : vector<1x8x32xf32> to vector<1x8x16xf32>
    %164 = arith.truncf %163 : vector<1x8x16xf32> to vector<1x8x16xbf16>
    "tpu.trace_start"() <{level = 10 : i32, message = "bqd,bkd->bqk"}> : () -> ()
    %cst_94 = arith.constant dense<0.000000e+00> : vector<1x8x8xf32>
    %165 = tpu.matmul %160, %162, %cst_94 {dimension_numbers = #tpu.dot_dimension_numbers<[2], [2], [1], [1], [0, 0, 0, 1, 1, 1], [0], [0]>} : vector<1x8x16xbf16>, vector<1x8x16xbf16>, vector<1x8x8xf32> -> vector<1x8x8xf32>
    "tpu.trace_stop"() : () -> ()
    %166 = vector.broadcast %21 : vector<1x1x8xf32> to vector<1x8x8xf32>
    %167 = arith.addf %165, %166 : vector<1x8x8xf32>
    %cst_95 = arith.constant dense<0xFF800000> : vector<1x8xf32>
    %168 = vector.multi_reduction <maximumf>, %167, %cst_95 [2] : vector<1x8x8xf32> to vector<1x8xf32>
    %169 = vector.shape_cast %168 : vector<1x8xf32> to vector<1x8x1xf32>
    %170 = vector.broadcast %169 : vector<1x8x1xf32> to vector<1x8x8xf32>
    %171 = arith.subf %167, %170 : vector<1x8x8xf32>
    %172 = math.exp %171 : vector<1x8x8xf32>
    %cst_96 = arith.constant dense<0.000000e+00> : vector<1x8xf32>
    %173 = vector.multi_reduction <add>, %172, %cst_96 [2] : vector<1x8x8xf32> to vector<1x8xf32>
    %174 = vector.shape_cast %173 : vector<1x8xf32> to vector<1x8x1xf32>
    %175 = tpu.reciprocal %174 {approx = true} : vector<1x8x1xf32> -> vector<1x8x1xf32>
    %176 = vector.broadcast %175 : vector<1x8x1xf32> to vector<1x8x8xf32>
    %177 = arith.mulf %172, %176 : vector<1x8x8xf32>
    %178 = arith.truncf %177 : vector<1x8x8xf32> to vector<1x8x8xbf16>
    "tpu.trace_start"() <{level = 10 : i32, message = "bqk,bkd->bqd"}> : () -> ()
    %cst_97 = arith.constant dense<0.000000e+00> : vector<1x8x16xf32>
    %179 = tpu.matmul %178, %164, %cst_97 {dimension_numbers = #tpu.dot_dimension_numbers<[2], [1], [1], [2], [0, 0, 0, 1, 1, 2], [0], [0]>} : vector<1x8x8xbf16>, vector<1x8x16xbf16>, vector<1x8x16xf32> -> vector<1x8x16xf32>
    "tpu.trace_stop"() : () -> ()
    %180 = vector.extract_strided_slice %150 {offsets = [0, 0, 16], sizes = [1, 8, 16], strides = [1, 1, 1]} : vector<1x8x32xf32> to vector<1x8x16xf32>
    %181 = arith.truncf %180 : vector<1x8x16xf32> to vector<1x8x16xbf16>
    %182 = vector.extract_strided_slice %154 {offsets = [0, 0, 16], sizes = [1, 8, 16], strides = [1, 1, 1]} : vector<1x8x32xf32> to vector<1x8x16xf32>
    %183 = arith.truncf %182 : vector<1x8x16xf32> to vector<1x8x16xbf16>
    %184 = vector.extract_strided_slice %158 {offsets = [0, 0, 16], sizes = [1, 8, 16], strides = [1, 1, 1]} : vector<1x8x32xf32> to vector<1x8x16xf32>
    %185 = arith.truncf %184 : vector<1x8x16xf32> to vector<1x8x16xbf16>
    "tpu.trace_start"() <{level = 10 : i32, message = "bqd,bkd->bqk"}> : () -> ()
    %cst_98 = arith.constant dense<0.000000e+00> : vector<1x8x8xf32>
    %186 = tpu.matmul %181, %183, %cst_98 {dimension_numbers = #tpu.dot_dimension_numbers<[2], [2], [1], [1], [0, 0, 0, 1, 1, 1], [0], [0]>} : vector<1x8x16xbf16>, vector<1x8x16xbf16>, vector<1x8x8xf32> -> vector<1x8x8xf32>
    "tpu.trace_stop"() : () -> ()
    %187 = vector.broadcast %21 : vector<1x1x8xf32> to vector<1x8x8xf32>
    %188 = arith.addf %186, %187 : vector<1x8x8xf32>
    %cst_99 = arith.constant dense<0xFF800000> : vector<1x8xf32>
    %189 = vector.multi_reduction <maximumf>, %188, %cst_99 [2] : vector<1x8x8xf32> to vector<1x8xf32>
    %190 = vector.shape_cast %189 : vector<1x8xf32> to vector<1x8x1xf32>
    %191 = vector.broadcast %190 : vector<1x8x1xf32> to vector<1x8x8xf32>
    %192 = arith.subf %188, %191 : vector<1x8x8xf32>
    %193 = math.exp %192 : vector<1x8x8xf32>
    %cst_100 = arith.constant dense<0.000000e+00> : vector<1x8xf32>
    %194 = vector.multi_reduction <add>, %193, %cst_100 [2] : vector<1x8x8xf32> to vector<1x8xf32>
    %195 = vector.shape_cast %194 : vector<1x8xf32> to vector<1x8x1xf32>
    %196 = tpu.reciprocal %195 {approx = true} : vector<1x8x1xf32> -> vector<1x8x1xf32>
    %197 = vector.broadcast %196 : vector<1x8x1xf32> to vector<1x8x8xf32>
    %198 = arith.mulf %193, %197 : vector<1x8x8xf32>
    %199 = arith.truncf %198 : vector<1x8x8xf32> to vector<1x8x8xbf16>
    "tpu.trace_start"() <{level = 10 : i32, message = "bqk,bkd->bqd"}> : () -> ()
    %cst_101 = arith.constant dense<0.000000e+00> : vector<1x8x16xf32>
    %200 = tpu.matmul %199, %185, %cst_101 {dimension_numbers = #tpu.dot_dimension_numbers<[2], [1], [1], [2], [0, 0, 0, 1, 1, 2], [0], [0]>} : vector<1x8x8xbf16>, vector<1x8x16xbf16>, vector<1x8x16xf32> -> vector<1x8x16xf32>
    "tpu.trace_stop"() : () -> ()
    %201 = tpu.concatenate %179, %200 in 2 : vector<1x8x16xf32>, vector<1x8x16xf32> -> vector<1x8x32xf32>
    %202 = arith.truncf %201 : vector<1x8x32xf32> to vector<1x8x32xbf16>
    %203 = vector.shape_cast %202 : vector<1x8x32xbf16> to vector<8x32xbf16>
    %cst_102 = arith.constant dense<0.000000e+00> : vector<8x32xf32>
    %204 = tpu.matmul %203, %141, %cst_102 {dimension_numbers = #tpu.dot_dimension_numbers<[1], [0], [0], [1], [0, 0, 1, 1], [], []>} : vector<8x32xbf16>, vector<32x32xbf16>, vector<8x32xf32> -> vector<8x32xf32>
    %205 = vector.broadcast %143 : vector<1x32xf32> to vector<8x32xf32>
    %206 = arith.addf %204, %205 : vector<8x32xf32>
    %207 = vector.shape_cast %206 : vector<8x32xf32> to vector<1x8x32xf32>
    %208 = arith.addf %127, %207 : vector<1x8x32xf32>
    %c0_103 = arith.constant 0 : index
    %c0_104 = arith.constant 0 : index
    %c0_105 = arith.constant 0 : index
    %209 = vector.load %arg24[%c0_103, %c0_104, %c0_105] : memref<2x1x32xf32, #tpu.memory_space<vmem>>, vector<1x1x32xf32>
    %210 = vector.shape_cast %209 : vector<1x1x32xf32> to vector<1x32xf32>
    %c0_106 = arith.constant 0 : index
    %c0_107 = arith.constant 0 : index
    %c0_108 = arith.constant 0 : index
    %211 = vector.load %arg25[%c0_106, %c0_107, %c0_108] : memref<2x1x32xf32, #tpu.memory_space<vmem>>, vector<1x1x32xf32>
    %212 = vector.shape_cast %211 : vector<1x1x32xf32> to vector<1x32xf32>
    %cst_109 = arith.constant dense<0.000000e+00> : vector<1x8xf32>
    %213 = vector.multi_reduction <add>, %208, %cst_109 [2] : vector<1x8x32xf32> to vector<1x8xf32>
    %214 = vector.shape_cast %213 : vector<1x8xf32> to vector<1x8x1xf32>
    %cst_110 = arith.constant 3.200000e+01 : f32
    %215 = vector.broadcast %cst_110 : f32 to vector<1x8x1xf32>
    %216 = arith.divf %214, %215 : vector<1x8x1xf32>
    %217 = vector.broadcast %216 : vector<1x8x1xf32> to vector<1x8x32xf32>
    %218 = arith.subf %208, %217 : vector<1x8x32xf32>
    %219 = arith.mulf %218, %218 : vector<1x8x32xf32>
    %cst_111 = arith.constant dense<0.000000e+00> : vector<1x8xf32>
    %220 = vector.multi_reduction <add>, %219, %cst_111 [2] : vector<1x8x32xf32> to vector<1x8xf32>
    %221 = vector.shape_cast %220 : vector<1x8xf32> to vector<1x8x1xf32>
    %cst_112 = arith.constant 3.200000e+01 : f32
    %222 = vector.broadcast %cst_112 : f32 to vector<1x8x1xf32>
    %223 = arith.divf %221, %222 : vector<1x8x1xf32>
    %cst_113 = arith.constant 9.99999974E-6 : f32
    %224 = vector.broadcast %cst_113 : f32 to vector<1x8x1xf32>
    %225 = arith.addf %223, %224 : vector<1x8x1xf32>
    %226 = math.rsqrt %225 : vector<1x8x1xf32>
    %227 = vector.broadcast %226 : vector<1x8x1xf32> to vector<1x8x32xf32>
    %228 = arith.mulf %218, %227 : vector<1x8x32xf32>
    %229 = vector.shape_cast %210 : vector<1x32xf32> to vector<1x1x32xf32>
    %230 = vector.broadcast %229 : vector<1x1x32xf32> to vector<1x8x32xf32>
    %231 = arith.mulf %228, %230 : vector<1x8x32xf32>
    %232 = vector.shape_cast %212 : vector<1x32xf32> to vector<1x1x32xf32>
    %233 = vector.broadcast %232 : vector<1x1x32xf32> to vector<1x8x32xf32>
    %234 = arith.addf %231, %233 : vector<1x8x32xf32>
    %c0_114 = arith.constant 0 : index
    %c0_115 = arith.constant 0 : index
    %c0_116 = arith.constant 0 : index
    %235 = vector.load %arg26[%c0_114, %c0_115, %c0_116] : memref<2x32x64xbf16, #tpu.memory_space<vmem>>, vector<1x32x64xbf16>
    %236 = vector.shape_cast %235 : vector<1x32x64xbf16> to vector<32x64xbf16>
    %c0_117 = arith.constant 0 : index
    %c0_118 = arith.constant 0 : index
    %c0_119 = arith.constant 0 : index
    %237 = vector.load %arg27[%c0_117, %c0_118, %c0_119] : memref<2x1x64xf32, #tpu.memory_space<vmem>>, vector<1x1x64xf32>
    %238 = vector.shape_cast %237 : vector<1x1x64xf32> to vector<1x64xf32>
    %c0_120 = arith.constant 0 : index
    %c0_121 = arith.constant 0 : index
    %c0_122 = arith.constant 0 : index
    %239 = vector.load %arg28[%c0_120, %c0_121, %c0_122] : memref<2x64x32xbf16, #tpu.memory_space<vmem>>, vector<1x64x32xbf16>
    %240 = vector.shape_cast %239 : vector<1x64x32xbf16> to vector<64x32xbf16>
    %c0_123 = arith.constant 0 : index
    %c0_124 = arith.constant 0 : index
    %c0_125 = arith.constant 0 : index
    %241 = vector.load %arg29[%c0_123, %c0_124, %c0_125] : memref<2x1x32xf32, #tpu.memory_space<vmem>>, vector<1x1x32xf32>
    %242 = vector.shape_cast %241 : vector<1x1x32xf32> to vector<1x32xf32>
    %243 = arith.truncf %234 : vector<1x8x32xf32> to vector<1x8x32xbf16>
    %244 = vector.shape_cast %243 : vector<1x8x32xbf16> to vector<8x32xbf16>
    %cst_126 = arith.constant dense<0.000000e+00> : vector<8x64xf32>
    %245 = tpu.matmul %244, %236, %cst_126 {dimension_numbers = #tpu.dot_dimension_numbers<[1], [0], [0], [1], [0, 0, 1, 1], [], []>} : vector<8x32xbf16>, vector<32x64xbf16>, vector<8x64xf32> -> vector<8x64xf32>
    %246 = vector.broadcast %238 : vector<1x64xf32> to vector<8x64xf32>
    %247 = arith.addf %245, %246 : vector<8x64xf32>
    %cst_127 = arith.constant 0.000000e+00 : f32
    %248 = vector.broadcast %cst_127 : f32 to vector<8x64xf32>
    %249 = arith.maximumf %247, %248 : vector<8x64xf32>
    %250 = arith.truncf %249 : vector<8x64xf32> to vector<8x64xbf16>
    %cst_128 = arith.constant dense<0.000000e+00> : vector<8x32xf32>
    %251 = tpu.matmul %250, %240, %cst_128 {dimension_numbers = #tpu.dot_dimension_numbers<[1], [0], [0], [1], [0, 0, 1, 1], [], []>} : vector<8x64xbf16>, vector<64x32xbf16>, vector<8x32xf32> -> vector<8x32xf32>
    %252 = vector.broadcast %242 : vector<1x32xf32> to vector<8x32xf32>
    %253 = arith.addf %251, %252 : vector<8x32xf32>
    %254 = vector.shape_cast %253 : vector<8x32xf32> to vector<1x8x32xf32>
    %255 = arith.addf %234, %254 : vector<1x8x32xf32>
    %c0_129 = arith.constant 0 : index
    %c0_130 = arith.constant 0 : index
    %c0_131 = arith.constant 0 : index
    %256 = vector.load %arg30[%c0_129, %c0_130, %c0_131] : memref<2x1x32xf32, #tpu.memory_space<vmem>>, vector<1x1x32xf32>
    %257 = vector.shape_cast %256 : vector<1x1x32xf32> to vector<1x32xf32>
    %c0_132 = arith.constant 0 : index
    %c0_133 = arith.constant 0 : index
    %c0_134 = arith.constant 0 : index
    %258 = vector.load %arg31[%c0_132, %c0_133, %c0_134] : memref<2x1x32xf32, #tpu.memory_space<vmem>>, vector<1x1x32xf32>
    %259 = vector.shape_cast %258 : vector<1x1x32xf32> to vector<1x32xf32>
    %cst_135 = arith.constant dense<0.000000e+00> : vector<1x8xf32>
    %260 = vector.multi_reduction <add>, %255, %cst_135 [2] : vector<1x8x32xf32> to vector<1x8xf32>
    %261 = vector.shape_cast %260 : vector<1x8xf32> to vector<1x8x1xf32>
    %cst_136 = arith.constant 3.200000e+01 : f32
    %262 = vector.broadcast %cst_136 : f32 to vector<1x8x1xf32>
    %263 = arith.divf %261, %262 : vector<1x8x1xf32>
    %264 = vector.broadcast %263 : vector<1x8x1xf32> to vector<1x8x32xf32>
    %265 = arith.subf %255, %264 : vector<1x8x32xf32>
    %266 = arith.mulf %265, %265 : vector<1x8x32xf32>
    %cst_137 = arith.constant dense<0.000000e+00> : vector<1x8xf32>
    %267 = vector.multi_reduction <add>, %266, %cst_137 [2] : vector<1x8x32xf32> to vector<1x8xf32>
    %268 = vector.shape_cast %267 : vector<1x8xf32> to vector<1x8x1xf32>
    %cst_138 = arith.constant 3.200000e+01 : f32
    %269 = vector.broadcast %cst_138 : f32 to vector<1x8x1xf32>
    %270 = arith.divf %268, %269 : vector<1x8x1xf32>
    %cst_139 = arith.constant 9.99999974E-6 : f32
    %271 = vector.broadcast %cst_139 : f32 to vector<1x8x1xf32>
    %272 = arith.addf %270, %271 : vector<1x8x1xf32>
    %273 = math.rsqrt %272 : vector<1x8x1xf32>
    %274 = vector.broadcast %273 : vector<1x8x1xf32> to vector<1x8x32xf32>
    %275 = arith.mulf %265, %274 : vector<1x8x32xf32>
    %276 = vector.shape_cast %257 : vector<1x32xf32> to vector<1x1x32xf32>
    %277 = vector.broadcast %276 : vector<1x1x32xf32> to vector<1x8x32xf32>
    %278 = arith.mulf %275, %277 : vector<1x8x32xf32>
    %279 = vector.shape_cast %259 : vector<1x32xf32> to vector<1x1x32xf32>
    %280 = vector.broadcast %279 : vector<1x1x32xf32> to vector<1x8x32xf32>
    %281 = arith.addf %278, %280 : vector<1x8x32xf32>
    %c1 = arith.constant 1 : index
    %c0_140 = arith.constant 0 : index
    %c0_141 = arith.constant 0 : index
    %282 = vector.load %arg6[%c1, %c0_140, %c0_141] : memref<2x32x32xbf16, #tpu.memory_space<vmem>>, vector<1x32x32xbf16>
    %283 = vector.shape_cast %282 : vector<1x32x32xbf16> to vector<32x32xbf16>
    %c1_142 = arith.constant 1 : index
    %c0_143 = arith.constant 0 : index
    %c0_144 = arith.constant 0 : index
    %284 = vector.load %arg7[%c1_142, %c0_143, %c0_144] : memref<2x1x32xf32, #tpu.memory_space<vmem>>, vector<1x1x32xf32>
    %285 = vector.shape_cast %284 : vector<1x1x32xf32> to vector<1x32xf32>
    %c1_145 = arith.constant 1 : index
    %c0_146 = arith.constant 0 : index
    %c0_147 = arith.constant 0 : index
    %286 = vector.load %arg8[%c1_145, %c0_146, %c0_147] : memref<2x32x32xbf16, #tpu.memory_space<vmem>>, vector<1x32x32xbf16>
    %287 = vector.shape_cast %286 : vector<1x32x32xbf16> to vector<32x32xbf16>
    %c1_148 = arith.constant 1 : index
    %c0_149 = arith.constant 0 : index
    %c0_150 = arith.constant 0 : index
    %288 = vector.load %arg9[%c1_148, %c0_149, %c0_150] : memref<2x1x32xf32, #tpu.memory_space<vmem>>, vector<1x1x32xf32>
    %289 = vector.shape_cast %288 : vector<1x1x32xf32> to vector<1x32xf32>
    %c1_151 = arith.constant 1 : index
    %c0_152 = arith.constant 0 : index
    %c0_153 = arith.constant 0 : index
    %290 = vector.load %arg10[%c1_151, %c0_152, %c0_153] : memref<2x32x32xbf16, #tpu.memory_space<vmem>>, vector<1x32x32xbf16>
    %291 = vector.shape_cast %290 : vector<1x32x32xbf16> to vector<32x32xbf16>
    %c1_154 = arith.constant 1 : index
    %c0_155 = arith.constant 0 : index
    %c0_156 = arith.constant 0 : index
    %292 = vector.load %arg11[%c1_154, %c0_155, %c0_156] : memref<2x1x32xf32, #tpu.memory_space<vmem>>, vector<1x1x32xf32>
    %293 = vector.shape_cast %292 : vector<1x1x32xf32> to vector<1x32xf32>
    %c1_157 = arith.constant 1 : index
    %c0_158 = arith.constant 0 : index
    %c0_159 = arith.constant 0 : index
    %294 = vector.load %arg12[%c1_157, %c0_158, %c0_159] : memref<2x32x32xbf16, #tpu.memory_space<vmem>>, vector<1x32x32xbf16>
    %295 = vector.shape_cast %294 : vector<1x32x32xbf16> to vector<32x32xbf16>
    %c1_160 = arith.constant 1 : index
    %c0_161 = arith.constant 0 : index
    %c0_162 = arith.constant 0 : index
    %296 = vector.load %arg13[%c1_160, %c0_161, %c0_162] : memref<2x1x32xf32, #tpu.memory_space<vmem>>, vector<1x1x32xf32>
    %297 = vector.shape_cast %296 : vector<1x1x32xf32> to vector<1x32xf32>
    %298 = arith.truncf %281 : vector<1x8x32xf32> to vector<1x8x32xbf16>
    %299 = vector.shape_cast %298 : vector<1x8x32xbf16> to vector<8x32xbf16>
    %300 = arith.truncf %281 : vector<1x8x32xf32> to vector<1x8x32xbf16>
    %301 = vector.shape_cast %300 : vector<1x8x32xbf16> to vector<8x32xbf16>
    %cst_163 = arith.constant dense<0.000000e+00> : vector<8x32xf32>
    %302 = tpu.matmul %299, %283, %cst_163 {dimension_numbers = #tpu.dot_dimension_numbers<[1], [0], [0], [1], [0, 0, 1, 1], [], []>} : vector<8x32xbf16>, vector<32x32xbf16>, vector<8x32xf32> -> vector<8x32xf32>
    %303 = vector.broadcast %285 : vector<1x32xf32> to vector<8x32xf32>
    %304 = arith.addf %302, %303 : vector<8x32xf32>
    %305 = vector.shape_cast %304 : vector<8x32xf32> to vector<1x8x32xf32>
    %cst_164 = arith.constant dense<0.000000e+00> : vector<8x32xf32>
    %306 = tpu.matmul %301, %287, %cst_164 {dimension_numbers = #tpu.dot_dimension_numbers<[1], [0], [0], [1], [0, 0, 1, 1], [], []>} : vector<8x32xbf16>, vector<32x32xbf16>, vector<8x32xf32> -> vector<8x32xf32>
    %307 = vector.broadcast %289 : vector<1x32xf32> to vector<8x32xf32>
    %308 = arith.addf %306, %307 : vector<8x32xf32>
    %309 = vector.shape_cast %308 : vector<8x32xf32> to vector<1x8x32xf32>
    %cst_165 = arith.constant dense<0.000000e+00> : vector<8x32xf32>
    %310 = tpu.matmul %301, %291, %cst_165 {dimension_numbers = #tpu.dot_dimension_numbers<[1], [0], [0], [1], [0, 0, 1, 1], [], []>} : vector<8x32xbf16>, vector<32x32xbf16>, vector<8x32xf32> -> vector<8x32xf32>
    %311 = vector.broadcast %293 : vector<1x32xf32> to vector<8x32xf32>
    %312 = arith.addf %310, %311 : vector<8x32xf32>
    %313 = vector.shape_cast %312 : vector<8x32xf32> to vector<1x8x32xf32>
    %314 = vector.extract_strided_slice %305 {offsets = [0, 0, 0], sizes = [1, 8, 16], strides = [1, 1, 1]} : vector<1x8x32xf32> to vector<1x8x16xf32>
    %315 = arith.truncf %314 : vector<1x8x16xf32> to vector<1x8x16xbf16>
    %316 = vector.extract_strided_slice %309 {offsets = [0, 0, 0], sizes = [1, 8, 16], strides = [1, 1, 1]} : vector<1x8x32xf32> to vector<1x8x16xf32>
    %317 = arith.truncf %316 : vector<1x8x16xf32> to vector<1x8x16xbf16>
    %318 = vector.extract_strided_slice %313 {offsets = [0, 0, 0], sizes = [1, 8, 16], strides = [1, 1, 1]} : vector<1x8x32xf32> to vector<1x8x16xf32>
    %319 = arith.truncf %318 : vector<1x8x16xf32> to vector<1x8x16xbf16>
    "tpu.trace_start"() <{level = 10 : i32, message = "bqd,bkd->bqk"}> : () -> ()
    %cst_166 = arith.constant dense<0.000000e+00> : vector<1x8x8xf32>
    %320 = tpu.matmul %315, %317, %cst_166 {dimension_numbers = #tpu.dot_dimension_numbers<[2], [2], [1], [1], [0, 0, 0, 1, 1, 1], [0], [0]>} : vector<1x8x16xbf16>, vector<1x8x16xbf16>, vector<1x8x8xf32> -> vector<1x8x8xf32>
    "tpu.trace_stop"() : () -> ()
    %321 = arith.addf %320, %15 : vector<1x8x8xf32>
    %cst_167 = arith.constant dense<0xFF800000> : vector<1x8xf32>
    %322 = vector.multi_reduction <maximumf>, %321, %cst_167 [2] : vector<1x8x8xf32> to vector<1x8xf32>
    %323 = vector.shape_cast %322 : vector<1x8xf32> to vector<1x8x1xf32>
    %324 = vector.broadcast %323 : vector<1x8x1xf32> to vector<1x8x8xf32>
    %325 = arith.subf %321, %324 : vector<1x8x8xf32>
    %326 = math.exp %325 : vector<1x8x8xf32>
    %cst_168 = arith.constant dense<0.000000e+00> : vector<1x8xf32>
    %327 = vector.multi_reduction <add>, %326, %cst_168 [2] : vector<1x8x8xf32> to vector<1x8xf32>
    %328 = vector.shape_cast %327 : vector<1x8xf32> to vector<1x8x1xf32>
    %329 = tpu.reciprocal %328 {approx = true} : vector<1x8x1xf32> -> vector<1x8x1xf32>
    %330 = vector.broadcast %329 : vector<1x8x1xf32> to vector<1x8x8xf32>
    %331 = arith.mulf %326, %330 : vector<1x8x8xf32>
    %332 = arith.truncf %331 : vector<1x8x8xf32> to vector<1x8x8xbf16>
    "tpu.trace_start"() <{level = 10 : i32, message = "bqk,bkd->bqd"}> : () -> ()
    %cst_169 = arith.constant dense<0.000000e+00> : vector<1x8x16xf32>
    %333 = tpu.matmul %332, %319, %cst_169 {dimension_numbers = #tpu.dot_dimension_numbers<[2], [1], [1], [2], [0, 0, 0, 1, 1, 2], [0], [0]>} : vector<1x8x8xbf16>, vector<1x8x16xbf16>, vector<1x8x16xf32> -> vector<1x8x16xf32>
    "tpu.trace_stop"() : () -> ()
    %334 = vector.extract_strided_slice %305 {offsets = [0, 0, 16], sizes = [1, 8, 16], strides = [1, 1, 1]} : vector<1x8x32xf32> to vector<1x8x16xf32>
    %335 = arith.truncf %334 : vector<1x8x16xf32> to vector<1x8x16xbf16>
    %336 = vector.extract_strided_slice %309 {offsets = [0, 0, 16], sizes = [1, 8, 16], strides = [1, 1, 1]} : vector<1x8x32xf32> to vector<1x8x16xf32>
    %337 = arith.truncf %336 : vector<1x8x16xf32> to vector<1x8x16xbf16>
    %338 = vector.extract_strided_slice %313 {offsets = [0, 0, 16], sizes = [1, 8, 16], strides = [1, 1, 1]} : vector<1x8x32xf32> to vector<1x8x16xf32>
    %339 = arith.truncf %338 : vector<1x8x16xf32> to vector<1x8x16xbf16>
    "tpu.trace_start"() <{level = 10 : i32, message = "bqd,bkd->bqk"}> : () -> ()
    %cst_170 = arith.constant dense<0.000000e+00> : vector<1x8x8xf32>
    %340 = tpu.matmul %335, %337, %cst_170 {dimension_numbers = #tpu.dot_dimension_numbers<[2], [2], [1], [1], [0, 0, 0, 1, 1, 1], [0], [0]>} : vector<1x8x16xbf16>, vector<1x8x16xbf16>, vector<1x8x8xf32> -> vector<1x8x8xf32>
    "tpu.trace_stop"() : () -> ()
    %341 = arith.addf %340, %15 : vector<1x8x8xf32>
    %cst_171 = arith.constant dense<0xFF800000> : vector<1x8xf32>
    %342 = vector.multi_reduction <maximumf>, %341, %cst_171 [2] : vector<1x8x8xf32> to vector<1x8xf32>
    %343 = vector.shape_cast %342 : vector<1x8xf32> to vector<1x8x1xf32>
    %344 = vector.broadcast %343 : vector<1x8x1xf32> to vector<1x8x8xf32>
    %345 = arith.subf %341, %344 : vector<1x8x8xf32>
    %346 = math.exp %345 : vector<1x8x8xf32>
    %cst_172 = arith.constant dense<0.000000e+00> : vector<1x8xf32>
    %347 = vector.multi_reduction <add>, %346, %cst_172 [2] : vector<1x8x8xf32> to vector<1x8xf32>
    %348 = vector.shape_cast %347 : vector<1x8xf32> to vector<1x8x1xf32>
    %349 = tpu.reciprocal %348 {approx = true} : vector<1x8x1xf32> -> vector<1x8x1xf32>
    %350 = vector.broadcast %349 : vector<1x8x1xf32> to vector<1x8x8xf32>
    %351 = arith.mulf %346, %350 : vector<1x8x8xf32>
    %352 = arith.truncf %351 : vector<1x8x8xf32> to vector<1x8x8xbf16>
    "tpu.trace_start"() <{level = 10 : i32, message = "bqk,bkd->bqd"}> : () -> ()
    %cst_173 = arith.constant dense<0.000000e+00> : vector<1x8x16xf32>
    %353 = tpu.matmul %352, %339, %cst_173 {dimension_numbers = #tpu.dot_dimension_numbers<[2], [1], [1], [2], [0, 0, 0, 1, 1, 2], [0], [0]>} : vector<1x8x8xbf16>, vector<1x8x16xbf16>, vector<1x8x16xf32> -> vector<1x8x16xf32>
    "tpu.trace_stop"() : () -> ()
    %354 = tpu.concatenate %333, %353 in 2 : vector<1x8x16xf32>, vector<1x8x16xf32> -> vector<1x8x32xf32>
    %355 = arith.truncf %354 : vector<1x8x32xf32> to vector<1x8x32xbf16>
    %356 = vector.shape_cast %355 : vector<1x8x32xbf16> to vector<8x32xbf16>
    %cst_174 = arith.constant dense<0.000000e+00> : vector<8x32xf32>
    %357 = tpu.matmul %356, %295, %cst_174 {dimension_numbers = #tpu.dot_dimension_numbers<[1], [0], [0], [1], [0, 0, 1, 1], [], []>} : vector<8x32xbf16>, vector<32x32xbf16>, vector<8x32xf32> -> vector<8x32xf32>
    %358 = vector.broadcast %297 : vector<1x32xf32> to vector<8x32xf32>
    %359 = arith.addf %357, %358 : vector<8x32xf32>
    %360 = vector.shape_cast %359 : vector<8x32xf32> to vector<1x8x32xf32>
    %361 = arith.addf %281, %360 : vector<1x8x32xf32>
    %c1_175 = arith.constant 1 : index
    %c0_176 = arith.constant 0 : index
    %c0_177 = arith.constant 0 : index
    %362 = vector.load %arg14[%c1_175, %c0_176, %c0_177] : memref<2x1x32xf32, #tpu.memory_space<vmem>>, vector<1x1x32xf32>
    %363 = vector.shape_cast %362 : vector<1x1x32xf32> to vector<1x32xf32>
    %c1_178 = arith.constant 1 : index
    %c0_179 = arith.constant 0 : index
    %c0_180 = arith.constant 0 : index
    %364 = vector.load %arg15[%c1_178, %c0_179, %c0_180] : memref<2x1x32xf32, #tpu.memory_space<vmem>>, vector<1x1x32xf32>
    %365 = vector.shape_cast %364 : vector<1x1x32xf32> to vector<1x32xf32>
    %cst_181 = arith.constant dense<0.000000e+00> : vector<1x8xf32>
    %366 = vector.multi_reduction <add>, %361, %cst_181 [2] : vector<1x8x32xf32> to vector<1x8xf32>
    %367 = vector.shape_cast %366 : vector<1x8xf32> to vector<1x8x1xf32>
    %cst_182 = arith.constant 3.200000e+01 : f32
    %368 = vector.broadcast %cst_182 : f32 to vector<1x8x1xf32>
    %369 = arith.divf %367, %368 : vector<1x8x1xf32>
    %370 = vector.broadcast %369 : vector<1x8x1xf32> to vector<1x8x32xf32>
    %371 = arith.subf %361, %370 : vector<1x8x32xf32>
    %372 = arith.mulf %371, %371 : vector<1x8x32xf32>
    %cst_183 = arith.constant dense<0.000000e+00> : vector<1x8xf32>
    %373 = vector.multi_reduction <add>, %372, %cst_183 [2] : vector<1x8x32xf32> to vector<1x8xf32>
    %374 = vector.shape_cast %373 : vector<1x8xf32> to vector<1x8x1xf32>
    %cst_184 = arith.constant 3.200000e+01 : f32
    %375 = vector.broadcast %cst_184 : f32 to vector<1x8x1xf32>
    %376 = arith.divf %374, %375 : vector<1x8x1xf32>
    %cst_185 = arith.constant 9.99999974E-6 : f32
    %377 = vector.broadcast %cst_185 : f32 to vector<1x8x1xf32>
    %378 = arith.addf %376, %377 : vector<1x8x1xf32>
    %379 = math.rsqrt %378 : vector<1x8x1xf32>
    %380 = vector.broadcast %379 : vector<1x8x1xf32> to vector<1x8x32xf32>
    %381 = arith.mulf %371, %380 : vector<1x8x32xf32>
    %382 = vector.shape_cast %363 : vector<1x32xf32> to vector<1x1x32xf32>
    %383 = vector.broadcast %382 : vector<1x1x32xf32> to vector<1x8x32xf32>
    %384 = arith.mulf %381, %383 : vector<1x8x32xf32>
    %385 = vector.shape_cast %365 : vector<1x32xf32> to vector<1x1x32xf32>
    %386 = vector.broadcast %385 : vector<1x1x32xf32> to vector<1x8x32xf32>
    %387 = arith.addf %384, %386 : vector<1x8x32xf32>
    %c1_186 = arith.constant 1 : index
    %c0_187 = arith.constant 0 : index
    %c0_188 = arith.constant 0 : index
    %388 = vector.load %arg16[%c1_186, %c0_187, %c0_188] : memref<2x32x32xbf16, #tpu.memory_space<vmem>>, vector<1x32x32xbf16>
    %389 = vector.shape_cast %388 : vector<1x32x32xbf16> to vector<32x32xbf16>
    %c1_189 = arith.constant 1 : index
    %c0_190 = arith.constant 0 : index
    %c0_191 = arith.constant 0 : index
    %390 = vector.load %arg17[%c1_189, %c0_190, %c0_191] : memref<2x1x32xf32, #tpu.memory_space<vmem>>, vector<1x1x32xf32>
    %391 = vector.shape_cast %390 : vector<1x1x32xf32> to vector<1x32xf32>
    %c1_192 = arith.constant 1 : index
    %c0_193 = arith.constant 0 : index
    %c0_194 = arith.constant 0 : index
    %392 = vector.load %arg18[%c1_192, %c0_193, %c0_194] : memref<2x32x32xbf16, #tpu.memory_space<vmem>>, vector<1x32x32xbf16>
    %393 = vector.shape_cast %392 : vector<1x32x32xbf16> to vector<32x32xbf16>
    %c1_195 = arith.constant 1 : index
    %c0_196 = arith.constant 0 : index
    %c0_197 = arith.constant 0 : index
    %394 = vector.load %arg19[%c1_195, %c0_196, %c0_197] : memref<2x1x32xf32, #tpu.memory_space<vmem>>, vector<1x1x32xf32>
    %395 = vector.shape_cast %394 : vector<1x1x32xf32> to vector<1x32xf32>
    %c1_198 = arith.constant 1 : index
    %c0_199 = arith.constant 0 : index
    %c0_200 = arith.constant 0 : index
    %396 = vector.load %arg20[%c1_198, %c0_199, %c0_200] : memref<2x32x32xbf16, #tpu.memory_space<vmem>>, vector<1x32x32xbf16>
    %397 = vector.shape_cast %396 : vector<1x32x32xbf16> to vector<32x32xbf16>
    %c1_201 = arith.constant 1 : index
    %c0_202 = arith.constant 0 : index
    %c0_203 = arith.constant 0 : index
    %398 = vector.load %arg21[%c1_201, %c0_202, %c0_203] : memref<2x1x32xf32, #tpu.memory_space<vmem>>, vector<1x1x32xf32>
    %399 = vector.shape_cast %398 : vector<1x1x32xf32> to vector<1x32xf32>
    %c1_204 = arith.constant 1 : index
    %c0_205 = arith.constant 0 : index
    %c0_206 = arith.constant 0 : index
    %400 = vector.load %arg22[%c1_204, %c0_205, %c0_206] : memref<2x32x32xbf16, #tpu.memory_space<vmem>>, vector<1x32x32xbf16>
    %401 = vector.shape_cast %400 : vector<1x32x32xbf16> to vector<32x32xbf16>
    %c1_207 = arith.constant 1 : index
    %c0_208 = arith.constant 0 : index
    %c0_209 = arith.constant 0 : index
    %402 = vector.load %arg23[%c1_207, %c0_208, %c0_209] : memref<2x1x32xf32, #tpu.memory_space<vmem>>, vector<1x1x32xf32>
    %403 = vector.shape_cast %402 : vector<1x1x32xf32> to vector<1x32xf32>
    %404 = arith.truncf %387 : vector<1x8x32xf32> to vector<1x8x32xbf16>
    %405 = vector.shape_cast %404 : vector<1x8x32xbf16> to vector<8x32xbf16>
    %406 = vector.shape_cast %1 : vector<1x8x32xbf16> to vector<8x32xbf16>
    %cst_210 = arith.constant dense<0.000000e+00> : vector<8x32xf32>
    %407 = tpu.matmul %405, %389, %cst_210 {dimension_numbers = #tpu.dot_dimension_numbers<[1], [0], [0], [1], [0, 0, 1, 1], [], []>} : vector<8x32xbf16>, vector<32x32xbf16>, vector<8x32xf32> -> vector<8x32xf32>
    %408 = vector.broadcast %391 : vector<1x32xf32> to vector<8x32xf32>
    %409 = arith.addf %407, %408 : vector<8x32xf32>
    %410 = vector.shape_cast %409 : vector<8x32xf32> to vector<1x8x32xf32>
    %cst_211 = arith.constant dense<0.000000e+00> : vector<8x32xf32>
    %411 = tpu.matmul %406, %393, %cst_211 {dimension_numbers = #tpu.dot_dimension_numbers<[1], [0], [0], [1], [0, 0, 1, 1], [], []>} : vector<8x32xbf16>, vector<32x32xbf16>, vector<8x32xf32> -> vector<8x32xf32>
    %412 = vector.broadcast %395 : vector<1x32xf32> to vector<8x32xf32>
    %413 = arith.addf %411, %412 : vector<8x32xf32>
    %414 = vector.shape_cast %413 : vector<8x32xf32> to vector<1x8x32xf32>
    %cst_212 = arith.constant dense<0.000000e+00> : vector<8x32xf32>
    %415 = tpu.matmul %406, %397, %cst_212 {dimension_numbers = #tpu.dot_dimension_numbers<[1], [0], [0], [1], [0, 0, 1, 1], [], []>} : vector<8x32xbf16>, vector<32x32xbf16>, vector<8x32xf32> -> vector<8x32xf32>
    %416 = vector.broadcast %399 : vector<1x32xf32> to vector<8x32xf32>
    %417 = arith.addf %415, %416 : vector<8x32xf32>
    %418 = vector.shape_cast %417 : vector<8x32xf32> to vector<1x8x32xf32>
    %419 = vector.extract_strided_slice %410 {offsets = [0, 0, 0], sizes = [1, 8, 16], strides = [1, 1, 1]} : vector<1x8x32xf32> to vector<1x8x16xf32>
    %420 = arith.truncf %419 : vector<1x8x16xf32> to vector<1x8x16xbf16>
    %421 = vector.extract_strided_slice %414 {offsets = [0, 0, 0], sizes = [1, 8, 16], strides = [1, 1, 1]} : vector<1x8x32xf32> to vector<1x8x16xf32>
    %422 = arith.truncf %421 : vector<1x8x16xf32> to vector<1x8x16xbf16>
    %423 = vector.extract_strided_slice %418 {offsets = [0, 0, 0], sizes = [1, 8, 16], strides = [1, 1, 1]} : vector<1x8x32xf32> to vector<1x8x16xf32>
    %424 = arith.truncf %423 : vector<1x8x16xf32> to vector<1x8x16xbf16>
    "tpu.trace_start"() <{level = 10 : i32, message = "bqd,bkd->bqk"}> : () -> ()
    %cst_213 = arith.constant dense<0.000000e+00> : vector<1x8x8xf32>
    %425 = tpu.matmul %420, %422, %cst_213 {dimension_numbers = #tpu.dot_dimension_numbers<[2], [2], [1], [1], [0, 0, 0, 1, 1, 1], [0], [0]>} : vector<1x8x16xbf16>, vector<1x8x16xbf16>, vector<1x8x8xf32> -> vector<1x8x8xf32>
    "tpu.trace_stop"() : () -> ()
    %426 = vector.broadcast %21 : vector<1x1x8xf32> to vector<1x8x8xf32>
    %427 = arith.addf %425, %426 : vector<1x8x8xf32>
    %cst_214 = arith.constant dense<0xFF800000> : vector<1x8xf32>
    %428 = vector.multi_reduction <maximumf>, %427, %cst_214 [2] : vector<1x8x8xf32> to vector<1x8xf32>
    %429 = vector.shape_cast %428 : vector<1x8xf32> to vector<1x8x1xf32>
    %430 = vector.broadcast %429 : vector<1x8x1xf32> to vector<1x8x8xf32>
    %431 = arith.subf %427, %430 : vector<1x8x8xf32>
    %432 = math.exp %431 : vector<1x8x8xf32>
    %cst_215 = arith.constant dense<0.000000e+00> : vector<1x8xf32>
    %433 = vector.multi_reduction <add>, %432, %cst_215 [2] : vector<1x8x8xf32> to vector<1x8xf32>
    %434 = vector.shape_cast %433 : vector<1x8xf32> to vector<1x8x1xf32>
    %435 = tpu.reciprocal %434 {approx = true} : vector<1x8x1xf32> -> vector<1x8x1xf32>
    %436 = vector.broadcast %435 : vector<1x8x1xf32> to vector<1x8x8xf32>
    %437 = arith.mulf %432, %436 : vector<1x8x8xf32>
    %438 = arith.truncf %437 : vector<1x8x8xf32> to vector<1x8x8xbf16>
    "tpu.trace_start"() <{level = 10 : i32, message = "bqk,bkd->bqd"}> : () -> ()
    %cst_216 = arith.constant dense<0.000000e+00> : vector<1x8x16xf32>
    %439 = tpu.matmul %438, %424, %cst_216 {dimension_numbers = #tpu.dot_dimension_numbers<[2], [1], [1], [2], [0, 0, 0, 1, 1, 2], [0], [0]>} : vector<1x8x8xbf16>, vector<1x8x16xbf16>, vector<1x8x16xf32> -> vector<1x8x16xf32>
    "tpu.trace_stop"() : () -> ()
    %440 = vector.extract_strided_slice %410 {offsets = [0, 0, 16], sizes = [1, 8, 16], strides = [1, 1, 1]} : vector<1x8x32xf32> to vector<1x8x16xf32>
    %441 = arith.truncf %440 : vector<1x8x16xf32> to vector<1x8x16xbf16>
    %442 = vector.extract_strided_slice %414 {offsets = [0, 0, 16], sizes = [1, 8, 16], strides = [1, 1, 1]} : vector<1x8x32xf32> to vector<1x8x16xf32>
    %443 = arith.truncf %442 : vector<1x8x16xf32> to vector<1x8x16xbf16>
    %444 = vector.extract_strided_slice %418 {offsets = [0, 0, 16], sizes = [1, 8, 16], strides = [1, 1, 1]} : vector<1x8x32xf32> to vector<1x8x16xf32>
    %445 = arith.truncf %444 : vector<1x8x16xf32> to vector<1x8x16xbf16>
    "tpu.trace_start"() <{level = 10 : i32, message = "bqd,bkd->bqk"}> : () -> ()
    %cst_217 = arith.constant dense<0.000000e+00> : vector<1x8x8xf32>
    %446 = tpu.matmul %441, %443, %cst_217 {dimension_numbers = #tpu.dot_dimension_numbers<[2], [2], [1], [1], [0, 0, 0, 1, 1, 1], [0], [0]>} : vector<1x8x16xbf16>, vector<1x8x16xbf16>, vector<1x8x8xf32> -> vector<1x8x8xf32>
    "tpu.trace_stop"() : () -> ()
    %447 = vector.broadcast %21 : vector<1x1x8xf32> to vector<1x8x8xf32>
    %448 = arith.addf %446, %447 : vector<1x8x8xf32>
    %cst_218 = arith.constant dense<0xFF800000> : vector<1x8xf32>
    %449 = vector.multi_reduction <maximumf>, %448, %cst_218 [2] : vector<1x8x8xf32> to vector<1x8xf32>
    %450 = vector.shape_cast %449 : vector<1x8xf32> to vector<1x8x1xf32>
    %451 = vector.broadcast %450 : vector<1x8x1xf32> to vector<1x8x8xf32>
    %452 = arith.subf %448, %451 : vector<1x8x8xf32>
    %453 = math.exp %452 : vector<1x8x8xf32>
    %cst_219 = arith.constant dense<0.000000e+00> : vector<1x8xf32>
    %454 = vector.multi_reduction <add>, %453, %cst_219 [2] : vector<1x8x8xf32> to vector<1x8xf32>
    %455 = vector.shape_cast %454 : vector<1x8xf32> to vector<1x8x1xf32>
    %456 = tpu.reciprocal %455 {approx = true} : vector<1x8x1xf32> -> vector<1x8x1xf32>
    %457 = vector.broadcast %456 : vector<1x8x1xf32> to vector<1x8x8xf32>
    %458 = arith.mulf %453, %457 : vector<1x8x8xf32>
    %459 = arith.truncf %458 : vector<1x8x8xf32> to vector<1x8x8xbf16>
    "tpu.trace_start"() <{level = 10 : i32, message = "bqk,bkd->bqd"}> : () -> ()
    %cst_220 = arith.constant dense<0.000000e+00> : vector<1x8x16xf32>
    %460 = tpu.matmul %459, %445, %cst_220 {dimension_numbers = #tpu.dot_dimension_numbers<[2], [1], [1], [2], [0, 0, 0, 1, 1, 2], [0], [0]>} : vector<1x8x8xbf16>, vector<1x8x16xbf16>, vector<1x8x16xf32> -> vector<1x8x16xf32>
    "tpu.trace_stop"() : () -> ()
    %461 = tpu.concatenate %439, %460 in 2 : vector<1x8x16xf32>, vector<1x8x16xf32> -> vector<1x8x32xf32>
    %462 = arith.truncf %461 : vector<1x8x32xf32> to vector<1x8x32xbf16>
    %463 = vector.shape_cast %462 : vector<1x8x32xbf16> to vector<8x32xbf16>
    %cst_221 = arith.constant dense<0.000000e+00> : vector<8x32xf32>
    %464 = tpu.matmul %463, %401, %cst_221 {dimension_numbers = #tpu.dot_dimension_numbers<[1], [0], [0], [1], [0, 0, 1, 1], [], []>} : vector<8x32xbf16>, vector<32x32xbf16>, vector<8x32xf32> -> vector<8x32xf32>
    %465 = vector.broadcast %403 : vector<1x32xf32> to vector<8x32xf32>
    %466 = arith.addf %464, %465 : vector<8x32xf32>
    %467 = vector.shape_cast %466 : vector<8x32xf32> to vector<1x8x32xf32>
    %468 = arith.addf %387, %467 : vector<1x8x32xf32>
    %c1_222 = arith.constant 1 : index
    %c0_223 = arith.constant 0 : index
    %c0_224 = arith.constant 0 : index
    %469 = vector.load %arg24[%c1_222, %c0_223, %c0_224] : memref<2x1x32xf32, #tpu.memory_space<vmem>>, vector<1x1x32xf32>
    %470 = vector.shape_cast %469 : vector<1x1x32xf32> to vector<1x32xf32>
    %c1_225 = arith.constant 1 : index
    %c0_226 = arith.constant 0 : index
    %c0_227 = arith.constant 0 : index
    %471 = vector.load %arg25[%c1_225, %c0_226, %c0_227] : memref<2x1x32xf32, #tpu.memory_space<vmem>>, vector<1x1x32xf32>
    %472 = vector.shape_cast %471 : vector<1x1x32xf32> to vector<1x32xf32>
    %cst_228 = arith.constant dense<0.000000e+00> : vector<1x8xf32>
    %473 = vector.multi_reduction <add>, %468, %cst_228 [2] : vector<1x8x32xf32> to vector<1x8xf32>
    %474 = vector.shape_cast %473 : vector<1x8xf32> to vector<1x8x1xf32>
    %cst_229 = arith.constant 3.200000e+01 : f32
    %475 = vector.broadcast %cst_229 : f32 to vector<1x8x1xf32>
    %476 = arith.divf %474, %475 : vector<1x8x1xf32>
    %477 = vector.broadcast %476 : vector<1x8x1xf32> to vector<1x8x32xf32>
    %478 = arith.subf %468, %477 : vector<1x8x32xf32>
    %479 = arith.mulf %478, %478 : vector<1x8x32xf32>
    %cst_230 = arith.constant dense<0.000000e+00> : vector<1x8xf32>
    %480 = vector.multi_reduction <add>, %479, %cst_230 [2] : vector<1x8x32xf32> to vector<1x8xf32>
    %481 = vector.shape_cast %480 : vector<1x8xf32> to vector<1x8x1xf32>
    %cst_231 = arith.constant 3.200000e+01 : f32
    %482 = vector.broadcast %cst_231 : f32 to vector<1x8x1xf32>
    %483 = arith.divf %481, %482 : vector<1x8x1xf32>
    %cst_232 = arith.constant 9.99999974E-6 : f32
    %484 = vector.broadcast %cst_232 : f32 to vector<1x8x1xf32>
    %485 = arith.addf %483, %484 : vector<1x8x1xf32>
    %486 = math.rsqrt %485 : vector<1x8x1xf32>
    %487 = vector.broadcast %486 : vector<1x8x1xf32> to vector<1x8x32xf32>
    %488 = arith.mulf %478, %487 : vector<1x8x32xf32>
    %489 = vector.shape_cast %470 : vector<1x32xf32> to vector<1x1x32xf32>
    %490 = vector.broadcast %489 : vector<1x1x32xf32> to vector<1x8x32xf32>
    %491 = arith.mulf %488, %490 : vector<1x8x32xf32>
    %492 = vector.shape_cast %472 : vector<1x32xf32> to vector<1x1x32xf32>
    %493 = vector.broadcast %492 : vector<1x1x32xf32> to vector<1x8x32xf32>
    %494 = arith.addf %491, %493 : vector<1x8x32xf32>
    %c1_233 = arith.constant 1 : index
    %c0_234 = arith.constant 0 : index
    %c0_235 = arith.constant 0 : index
    %495 = vector.load %arg26[%c1_233, %c0_234, %c0_235] : memref<2x32x64xbf16, #tpu.memory_space<vmem>>, vector<1x32x64xbf16>
    %496 = vector.shape_cast %495 : vector<1x32x64xbf16> to vector<32x64xbf16>
    %c1_236 = arith.constant 1 : index
    %c0_237 = arith.constant 0 : index
    %c0_238 = arith.constant 0 : index
    %497 = vector.load %arg27[%c1_236, %c0_237, %c0_238] : memref<2x1x64xf32, #tpu.memory_space<vmem>>, vector<1x1x64xf32>
    %498 = vector.shape_cast %497 : vector<1x1x64xf32> to vector<1x64xf32>
    %c1_239 = arith.constant 1 : index
    %c0_240 = arith.constant 0 : index
    %c0_241 = arith.constant 0 : index
    %499 = vector.load %arg28[%c1_239, %c0_240, %c0_241] : memref<2x64x32xbf16, #tpu.memory_space<vmem>>, vector<1x64x32xbf16>
    %500 = vector.shape_cast %499 : vector<1x64x32xbf16> to vector<64x32xbf16>
    %c1_242 = arith.constant 1 : index
    %c0_243 = arith.constant 0 : index
    %c0_244 = arith.constant 0 : index
    %501 = vector.load %arg29[%c1_242, %c0_243, %c0_244] : memref<2x1x32xf32, #tpu.memory_space<vmem>>, vector<1x1x32xf32>
    %502 = vector.shape_cast %501 : vector<1x1x32xf32> to vector<1x32xf32>
    %503 = arith.truncf %494 : vector<1x8x32xf32> to vector<1x8x32xbf16>
    %504 = vector.shape_cast %503 : vector<1x8x32xbf16> to vector<8x32xbf16>
    %cst_245 = arith.constant dense<0.000000e+00> : vector<8x64xf32>
    %505 = tpu.matmul %504, %496, %cst_245 {dimension_numbers = #tpu.dot_dimension_numbers<[1], [0], [0], [1], [0, 0, 1, 1], [], []>} : vector<8x32xbf16>, vector<32x64xbf16>, vector<8x64xf32> -> vector<8x64xf32>
    %506 = vector.broadcast %498 : vector<1x64xf32> to vector<8x64xf32>
    %507 = arith.addf %505, %506 : vector<8x64xf32>
    %cst_246 = arith.constant 0.000000e+00 : f32
    %508 = vector.broadcast %cst_246 : f32 to vector<8x64xf32>
    %509 = arith.maximumf %507, %508 : vector<8x64xf32>
    %510 = arith.truncf %509 : vector<8x64xf32> to vector<8x64xbf16>
    %cst_247 = arith.constant dense<0.000000e+00> : vector<8x32xf32>
    %511 = tpu.matmul %510, %500, %cst_247 {dimension_numbers = #tpu.dot_dimension_numbers<[1], [0], [0], [1], [0, 0, 1, 1], [], []>} : vector<8x64xbf16>, vector<64x32xbf16>, vector<8x32xf32> -> vector<8x32xf32>
    %512 = vector.broadcast %502 : vector<1x32xf32> to vector<8x32xf32>
    %513 = arith.addf %511, %512 : vector<8x32xf32>
    %514 = vector.shape_cast %513 : vector<8x32xf32> to vector<1x8x32xf32>
    %515 = arith.addf %494, %514 : vector<1x8x32xf32>
    %c1_248 = arith.constant 1 : index
    %c0_249 = arith.constant 0 : index
    %c0_250 = arith.constant 0 : index
    %516 = vector.load %arg30[%c1_248, %c0_249, %c0_250] : memref<2x1x32xf32, #tpu.memory_space<vmem>>, vector<1x1x32xf32>
    %517 = vector.shape_cast %516 : vector<1x1x32xf32> to vector<1x32xf32>
    %c1_251 = arith.constant 1 : index
    %c0_252 = arith.constant 0 : index
    %c0_253 = arith.constant 0 : index
    %518 = vector.load %arg31[%c1_251, %c0_252, %c0_253] : memref<2x1x32xf32, #tpu.memory_space<vmem>>, vector<1x1x32xf32>
    %519 = vector.shape_cast %518 : vector<1x1x32xf32> to vector<1x32xf32>
    %cst_254 = arith.constant dense<0.000000e+00> : vector<1x8xf32>
    %520 = vector.multi_reduction <add>, %515, %cst_254 [2] : vector<1x8x32xf32> to vector<1x8xf32>
    %521 = vector.shape_cast %520 : vector<1x8xf32> to vector<1x8x1xf32>
    %cst_255 = arith.constant 3.200000e+01 : f32
    %522 = vector.broadcast %cst_255 : f32 to vector<1x8x1xf32>
    %523 = arith.divf %521, %522 : vector<1x8x1xf32>
    %524 = vector.broadcast %523 : vector<1x8x1xf32> to vector<1x8x32xf32>
    %525 = arith.subf %515, %524 : vector<1x8x32xf32>
    %526 = arith.mulf %525, %525 : vector<1x8x32xf32>
    %cst_256 = arith.constant dense<0.000000e+00> : vector<1x8xf32>
    %527 = vector.multi_reduction <add>, %526, %cst_256 [2] : vector<1x8x32xf32> to vector<1x8xf32>
    %528 = vector.shape_cast %527 : vector<1x8xf32> to vector<1x8x1xf32>
    %cst_257 = arith.constant 3.200000e+01 : f32
    %529 = vector.broadcast %cst_257 : f32 to vector<1x8x1xf32>
    %530 = arith.divf %528, %529 : vector<1x8x1xf32>
    %cst_258 = arith.constant 9.99999974E-6 : f32
    %531 = vector.broadcast %cst_258 : f32 to vector<1x8x1xf32>
    %532 = arith.addf %530, %531 : vector<1x8x1xf32>
    %533 = math.rsqrt %532 : vector<1x8x1xf32>
    %534 = vector.broadcast %533 : vector<1x8x1xf32> to vector<1x8x32xf32>
    %535 = arith.mulf %525, %534 : vector<1x8x32xf32>
    %536 = vector.shape_cast %517 : vector<1x32xf32> to vector<1x1x32xf32>
    %537 = vector.broadcast %536 : vector<1x1x32xf32> to vector<1x8x32xf32>
    %538 = arith.mulf %535, %537 : vector<1x8x32xf32>
    %539 = vector.shape_cast %519 : vector<1x32xf32> to vector<1x1x32xf32>
    %540 = vector.broadcast %539 : vector<1x1x32xf32> to vector<1x8x32xf32>
    %541 = arith.addf %538, %540 : vector<1x8x32xf32>
    %c0_259 = arith.constant 0 : index
    %c0_260 = arith.constant 0 : index
    %542 = vector.load %arg32[%c0_259, %c0_260] : memref<1x32xf32, #tpu.memory_space<vmem>>, vector<1x32xf32>
    %c0_261 = arith.constant 0 : index
    %c0_262 = arith.constant 0 : index
    %543 = vector.load %arg33[%c0_261, %c0_262] : memref<1x32xf32, #tpu.memory_space<vmem>>, vector<1x32xf32>
    %cst_263 = arith.constant dense<0.000000e+00> : vector<1x8xf32>
    %544 = vector.multi_reduction <add>, %541, %cst_263 [2] : vector<1x8x32xf32> to vector<1x8xf32>
    %545 = vector.shape_cast %544 : vector<1x8xf32> to vector<1x8x1xf32>
    %cst_264 = arith.constant 3.200000e+01 : f32
    %546 = vector.broadcast %cst_264 : f32 to vector<1x8x1xf32>
    %547 = arith.divf %545, %546 : vector<1x8x1xf32>
    %548 = vector.broadcast %547 : vector<1x8x1xf32> to vector<1x8x32xf32>
    %549 = arith.subf %541, %548 : vector<1x8x32xf32>
    %550 = arith.mulf %549, %549 : vector<1x8x32xf32>
    %cst_265 = arith.constant dense<0.000000e+00> : vector<1x8xf32>
    %551 = vector.multi_reduction <add>, %550, %cst_265 [2] : vector<1x8x32xf32> to vector<1x8xf32>
    %552 = vector.shape_cast %551 : vector<1x8xf32> to vector<1x8x1xf32>
    %cst_266 = arith.constant 3.200000e+01 : f32
    %553 = vector.broadcast %cst_266 : f32 to vector<1x8x1xf32>
    %554 = arith.divf %552, %553 : vector<1x8x1xf32>
    %cst_267 = arith.constant 9.99999974E-6 : f32
    %555 = vector.broadcast %cst_267 : f32 to vector<1x8x1xf32>
    %556 = arith.addf %554, %555 : vector<1x8x1xf32>
    %557 = math.rsqrt %556 : vector<1x8x1xf32>
    %558 = vector.broadcast %557 : vector<1x8x1xf32> to vector<1x8x32xf32>
    %559 = arith.mulf %549, %558 : vector<1x8x32xf32>
    %560 = vector.shape_cast %542 : vector<1x32xf32> to vector<1x1x32xf32>
    %561 = vector.broadcast %560 : vector<1x1x32xf32> to vector<1x8x32xf32>
    %562 = arith.mulf %559, %561 : vector<1x8x32xf32>
    %563 = vector.shape_cast %543 : vector<1x32xf32> to vector<1x1x32xf32>
    %564 = vector.broadcast %563 : vector<1x1x32xf32> to vector<1x8x32xf32>
    %565 = arith.addf %562, %564 : vector<1x8x32xf32>
    %566 = arith.truncf %565 : vector<1x8x32xf32> to vector<1x8x32xbf16>
    %567 = vector.shape_cast %566 : vector<1x8x32xbf16> to vector<8x32xbf16>
    %c0_268 = arith.constant 0 : index
    %c0_269 = arith.constant 0 : index
    %568 = vector.load %arg34[%c0_268, %c0_269] : memref<32x128xbf16, #tpu.memory_space<vmem>>, vector<32x128xbf16>
    %cst_270 = arith.constant dense<0.000000e+00> : vector<8x128xf32>
    %569 = tpu.matmul %567, %568, %cst_270 {dimension_numbers = #tpu.dot_dimension_numbers<[1], [0], [0], [1], [0, 0, 1, 1], [], []>} : vector<8x32xbf16>, vector<32x128xbf16>, vector<8x128xf32> -> vector<8x128xf32>
    %c0_271 = arith.constant 0 : index
    %c0_272 = arith.constant 0 : index
    %570 = vector.load %arg35[%c0_271, %c0_272] : memref<1x128xf32, #tpu.memory_space<vmem>>, vector<1x128xf32>
    %571 = vector.broadcast %570 : vector<1x128xf32> to vector<8x128xf32>
    %572 = arith.addf %569, %571 : vector<8x128xf32>
    %573 = vector.shape_cast %572 : vector<8x128xf32> to vector<1x8x128xf32>
    %c0_273 = arith.constant 0 : index
    %c0_274 = arith.constant 0 : index
    %c0_275 = arith.constant 0 : index
    %574 = vector.load %arg36[%c0_273, %c0_274, %c0_275] : memref<1x8x128xf32, #tpu.memory_space<vmem>>, vector<1x8x128xf32>
    tpu.vector_store %arg36[%c0_273, %c0_274, %c0_275], %573 {strides = array<i32>} : memref<1x8x128xf32, #tpu.memory_space<vmem>>, vector<1x8x128xf32>,
    return
  }
  func.func @transform_0(%arg0: i32) -> (i32, i32, i32) {
    %c0_i32 = arith.constant 0 : i32
    %c0_i32_0 = arith.constant 0 : i32
    %c0_i32_1 = arith.constant 0 : i32
    return %arg0, %c0_i32, %c0_i32_0 : i32, i32, i32
  }
  func.func @transform_1(%arg0: i32) -> (i32, i32, i32) {
    %c0_i32 = arith.constant 0 : i32
    %c0_i32_0 = arith.constant 0 : i32
    %c0_i32_1 = arith.constant 0 : i32
    return %arg0, %c0_i32, %c0_i32_0 : i32, i32, i32
  }
  func.func @transform_2(%arg0: i32) -> (i32, i32) {
    %c0_i32 = arith.constant 0 : i32
    %c0_i32_0 = arith.constant 0 : i32
    %c0_i32_1 = arith.constant 0 : i32
    return %c0_i32, %c0_i32_0 : i32, i32
  }
  func.func @transform_3(%arg0: i32) -> (i32, i32, i32) {
    %c0_i32 = arith.constant 0 : i32
    %c0_i32_0 = arith.constant 0 : i32
    %c0_i32_1 = arith.constant 0 : i32
    return %arg0, %c0_i32, %c0_i32_0 : i32, i32, i32
  }
  func.func @transform_4(%arg0: i32) -> (i32, i32, i32) {
    %c0_i32 = arith.constant 0 : i32
    %c0_i32_0 = arith.constant 0 : i32
    %c0_i32_1 = arith.constant 0 : i32
    return %arg0, %c0_i32, %c0_i32_0 : i32, i32, i32
  }
  func.func @transform_5(%arg0: i32) -> (i32, i32, i32) {
    %c0_i32 = arith.constant 0 : i32
    %c0_i32_0 = arith.constant 0 : i32
    %c0_i32_1 = arith.constant 0 : i32
    %c0_i32_2 = arith.constant 0 : i32
    return %c0_i32, %c0_i32_0, %c0_i32_1 : i32, i32, i32
  }
  func.func @transform_6(%arg0: i32) -> (i32, i32, i32) {
    %c0_i32 = arith.constant 0 : i32
    %c0_i32_0 = arith.constant 0 : i32
    %c0_i32_1 = arith.constant 0 : i32
    %c0_i32_2 = arith.constant 0 : i32
    return %c0_i32, %c0_i32_0, %c0_i32_1 : i32, i32, i32
  }
  func.func @transform_7(%arg0: i32) -> (i32, i32, i32) {
    %c0_i32 = arith.constant 0 : i32
    %c0_i32_0 = arith.constant 0 : i32
    %c0_i32_1 = arith.constant 0 : i32
    %c0_i32_2 = arith.constant 0 : i32
    return %c0_i32, %c0_i32_0, %c0_i32_1 : i32, i32, i32
  }
  func.func @transform_8(%arg0: i32) -> (i32, i32, i32) {
    %c0_i32 = arith.constant 0 : i32
    %c0_i32_0 = arith.constant 0 : i32
    %c0_i32_1 = arith.constant 0 : i32
    %c0_i32_2 = arith.constant 0 : i32
    return %c0_i32, %c0_i32_0, %c0_i32_1 : i32, i32, i32
  }
  func.func @transform_9(%arg0: i32) -> (i32, i32, i32) {
    %c0_i32 = arith.constant 0 : i32
    %c0_i32_0 = arith.constant 0 : i32
    %c0_i32_1 = arith.constant 0 : i32
    %c0_i32_2 = arith.constant 0 : i32
    return %c0_i32, %c0_i32_0, %c0_i32_1 : i32, i32, i32
  }
  func.func @transform_10(%arg0: i32) -> (i32, i32, i32) {
    %c0_i32 = arith.constant 0 : i32
    %c0_i32_0 = arith.constant 0 : i32
    %c0_i32_1 = arith.constant 0 : i32
    %c0_i32_2 = arith.constant 0 : i32
    return %c0_i32, %c0_i32_0, %c0_i32_1 : i32, i32, i32
  }
  func.func @transform_11(%arg0: i32) -> (i32, i32, i32) {
    %c0_i32 = arith.constant 0 : i32
    %c0_i32_0 = arith.constant 0 : i32
    %c0_i32_1 = arith.constant 0 : i32
    %c0_i32_2 = arith.constant 0 : i32
    return %c0_i32, %c0_i32_0, %c0_i32_1 : i32, i32, i32
  }
  func.func @transform_12(%arg0: i32) -> (i32, i32, i32) {
    %c0_i32 = arith.constant 0 : i32
    %c0_i32_0 = arith.constant 0 : i32
    %c0_i32_1 = arith.constant 0 : i32
    %c0_i32_2 = arith.constant 0 : i32
    return %c0_i32, %c0_i32_0, %c0_i32_1 : i32, i32, i32
  }
  func.func @transform_13(%arg0: i32) -> (i32, i32, i32) {
    %c0_i32 = arith.constant 0 : i32
    %c0_i32_0 = arith.constant 0 : i32
    %c0_i32_1 = arith.constant 0 : i32
    %c0_i32_2 = arith.constant 0 : i32
    return %c0_i32, %c0_i32_0, %c0_i32_1 : i32, i32, i32
  }
  func.func @transform_14(%arg0: i32) -> (i32, i32, i32) {
    %c0_i32 = arith.constant 0 : i32
    %c0_i32_0 = arith.constant 0 : i32
    %c0_i32_1 = arith.constant 0 : i32
    %c0_i32_2 = arith.constant 0 : i32
    return %c0_i32, %c0_i32_0, %c0_i32_1 : i32, i32, i32
  }
  func.func @transform_15(%arg0: i32) -> (i32, i32, i32) {
    %c0_i32 = arith.constant 0 : i32
    %c0_i32_0 = arith.constant 0 : i32
    %c0_i32_1 = arith.constant 0 : i32
    %c0_i32_2 = arith.constant 0 : i32
    return %c0_i32, %c0_i32_0, %c0_i32_1 : i32, i32, i32
  }
  func.func @transform_16(%arg0: i32) -> (i32, i32, i32) {
    %c0_i32 = arith.constant 0 : i32
    %c0_i32_0 = arith.constant 0 : i32
    %c0_i32_1 = arith.constant 0 : i32
    %c0_i32_2 = arith.constant 0 : i32
    return %c0_i32, %c0_i32_0, %c0_i32_1 : i32, i32, i32
  }
  func.func @transform_17(%arg0: i32) -> (i32, i32, i32) {
    %c0_i32 = arith.constant 0 : i32
    %c0_i32_0 = arith.constant 0 : i32
    %c0_i32_1 = arith.constant 0 : i32
    %c0_i32_2 = arith.constant 0 : i32
    return %c0_i32, %c0_i32_0, %c0_i32_1 : i32, i32, i32
  }
  func.func @transform_18(%arg0: i32) -> (i32, i32, i32) {
    %c0_i32 = arith.constant 0 : i32
    %c0_i32_0 = arith.constant 0 : i32
    %c0_i32_1 = arith.constant 0 : i32
    %c0_i32_2 = arith.constant 0 : i32
    return %c0_i32, %c0_i32_0, %c0_i32_1 : i32, i32, i32
  }
  func.func @transform_19(%arg0: i32) -> (i32, i32, i32) {
    %c0_i32 = arith.constant 0 : i32
    %c0_i32_0 = arith.constant 0 : i32
    %c0_i32_1 = arith.constant 0 : i32
    %c0_i32_2 = arith.constant 0 : i32
    return %c0_i32, %c0_i32_0, %c0_i32_1 : i32, i32, i32
  }
  func.func @transform_20(%arg0: i32) -> (i32, i32, i32) {
    %c0_i32 = arith.constant 0 : i32
    %c0_i32_0 = arith.constant 0 : i32
    %c0_i32_1 = arith.constant 0 : i32
    %c0_i32_2 = arith.constant 0 : i32
    return %c0_i32, %c0_i32_0, %c0_i32_1 : i32, i32, i32
  }
  func.func @transform_21(%arg0: i32) -> (i32, i32, i32) {
    %c0_i32 = arith.constant 0 : i32
    %c0_i32_0 = arith.constant 0 : i32
    %c0_i32_1 = arith.constant 0 : i32
    %c0_i32_2 = arith.constant 0 : i32
    return %c0_i32, %c0_i32_0, %c0_i32_1 : i32, i32, i32
  }
  func.func @transform_22(%arg0: i32) -> (i32, i32, i32) {
    %c0_i32 = arith.constant 0 : i32
    %c0_i32_0 = arith.constant 0 : i32
    %c0_i32_1 = arith.constant 0 : i32
    %c0_i32_2 = arith.constant 0 : i32
    return %c0_i32, %c0_i32_0, %c0_i32_1 : i32, i32, i32
  }
  func.func @transform_23(%arg0: i32) -> (i32, i32, i32) {
    %c0_i32 = arith.constant 0 : i32
    %c0_i32_0 = arith.constant 0 : i32
    %c0_i32_1 = arith.constant 0 : i32
    %c0_i32_2 = arith.constant 0 : i32
    return %c0_i32, %c0_i32_0, %c0_i32_1 : i32, i32, i32
  }
  func.func @transform_24(%arg0: i32) -> (i32, i32, i32) {
    %c0_i32 = arith.constant 0 : i32
    %c0_i32_0 = arith.constant 0 : i32
    %c0_i32_1 = arith.constant 0 : i32
    %c0_i32_2 = arith.constant 0 : i32
    return %c0_i32, %c0_i32_0, %c0_i32_1 : i32, i32, i32
  }
  func.func @transform_25(%arg0: i32) -> (i32, i32, i32) {
    %c0_i32 = arith.constant 0 : i32
    %c0_i32_0 = arith.constant 0 : i32
    %c0_i32_1 = arith.constant 0 : i32
    %c0_i32_2 = arith.constant 0 : i32
    return %c0_i32, %c0_i32_0, %c0_i32_1 : i32, i32, i32
  }
  func.func @transform_26(%arg0: i32) -> (i32, i32, i32) {
    %c0_i32 = arith.constant 0 : i32
    %c0_i32_0 = arith.constant 0 : i32
    %c0_i32_1 = arith.constant 0 : i32
    %c0_i32_2 = arith.constant 0 : i32
    return %c0_i32, %c0_i32_0, %c0_i32_1 : i32, i32, i32
  }
  func.func @transform_27(%arg0: i32) -> (i32, i32, i32) {
    %c0_i32 = arith.constant 0 : i32
    %c0_i32_0 = arith.constant 0 : i32
    %c0_i32_1 = arith.constant 0 : i32
    %c0_i32_2 = arith.constant 0 : i32
    return %c0_i32, %c0_i32_0, %c0_i32_1 : i32, i32, i32
  }
  func.func @transform_28(%arg0: i32) -> (i32, i32, i32) {
    %c0_i32 = arith.constant 0 : i32
    %c0_i32_0 = arith.constant 0 : i32
    %c0_i32_1 = arith.constant 0 : i32
    %c0_i32_2 = arith.constant 0 : i32
    return %c0_i32, %c0_i32_0, %c0_i32_1 : i32, i32, i32
  }
  func.func @transform_29(%arg0: i32) -> (i32, i32, i32) {
    %c0_i32 = arith.constant 0 : i32
    %c0_i32_0 = arith.constant 0 : i32
    %c0_i32_1 = arith.constant 0 : i32
    %c0_i32_2 = arith.constant 0 : i32
    return %c0_i32, %c0_i32_0, %c0_i32_1 : i32, i32, i32
  }
  func.func @transform_30(%arg0: i32) -> (i32, i32, i32) {
    %c0_i32 = arith.constant 0 : i32
    %c0_i32_0 = arith.constant 0 : i32
    %c0_i32_1 = arith.constant 0 : i32
    %c0_i32_2 = arith.constant 0 : i32
    return %c0_i32, %c0_i32_0, %c0_i32_1 : i32, i32, i32
  }
  func.func @transform_31(%arg0: i32) -> (i32, i32) {
    %c0_i32 = arith.constant 0 : i32
    %c0_i32_0 = arith.constant 0 : i32
    %c0_i32_1 = arith.constant 0 : i32
    return %c0_i32, %c0_i32_0 : i32, i32
  }
  func.func @transform_32(%arg0: i32) -> (i32, i32) {
    %c0_i32 = arith.constant 0 : i32
    %c0_i32_0 = arith.constant 0 : i32
    %c0_i32_1 = arith.constant 0 : i32
    return %c0_i32, %c0_i32_0 : i32, i32
  }
  func.func @transform_33(%arg0: i32) -> (i32, i32) {
    %c0_i32 = arith.constant 0 : i32
    %c0_i32_0 = arith.constant 0 : i32
    %c0_i32_1 = arith.constant 0 : i32
    return %c0_i32, %c0_i32_0 : i32, i32
  }
  func.func @transform_34(%arg0: i32) -> (i32, i32) {
    %c0_i32 = arith.constant 0 : i32
    %c0_i32_0 = arith.constant 0 : i32
    %c0_i32_1 = arith.constant 0 : i32
    return %c0_i32, %c0_i32_0 : i32, i32
  }
  func.func @transform_35(%arg0: i32) -> (i32, i32, i32) {
    %c0_i32 = arith.constant 0 : i32
    %c0_i32_0 = arith.constant 0 : i32
    %c0_i32_1 = arith.constant 0 : i32
    return %arg0, %c0_i32, %c0_i32_0 : i32, i32, i32
  }
}

</mosaic_0001>

<bundles_post_ra>
// kernel: seq2seq_forward.2
= control target key start
LH: loop header
LB: loop body
LE: loop exit
PB: predicated region body
PF: predicated region fallthrough
CT: control target
= control target key end

     0   :  { %s2296_s0 = inlined_call_operand.vmem [shape: f32[2,8,32], index: 0, kind: input, shape index: {}]   ;;  %s2297_s1 = inlined_call_operand.vmem [shape: f32[8,8], index: 1, kind: input, shape index: {}]   ;;  %s2298_s2 = inlined_call_operand.vmem [shape: f32[2,1,8], index: 2, kind: input, shape index: {}]   ;;  %s2299_s3 = inlined_call_operand.vmem [shape: bf16[2,32,32], index: 3, kind: input, shape index: {}]   ;;  %s2300_s4 = inlined_call_operand.vmem [shape: f32[2,1,32], index: 4, kind: input, shape index: {}]   ;;  %s2301_s5 = inlined_call_operand.vmem [shape: bf16[2,32,32], index: 5, kind: input, shape index: {}]   ;;  %s2302_s6 = inlined_call_operand.vmem [shape: f32[2,1,32], index: 6, kind: input, shape index: {}]   ;;  %s2303_s7 = inlined_call_operand.vmem [shape: bf16[2,32,32], index: 7, kind: input, shape index: {}]   ;;  %s2304_s8 = inlined_call_operand.vmem [shape: f32[2,1,32], index: 8, kind: input, shape index: {}]   ;;  %s2305_s9 = inlined_call_operand.vmem [shape: bf16[2,32,32], index: 9, kind: input, shape index: {}]   ;;  %s2306_s10 = inlined_call_operand.vmem [shape: f32[2,1,32], index: 10, kind: input, shape index: {}]   ;;  %s2307_s11 = inlined_call_operand.vmem [shape: f32[2,1,32], index: 11, kind: input, shape index: {}]   ;;  %s2308_s12 = inlined_call_operand.vmem [shape: f32[2,1,32], index: 12, kind: input, shape index: {}]   ;;  %s2309_s13 = inlined_call_operand.vmem [shape: bf16[2,32,64], index: 13, kind: input, shape index: {}]   ;;  %s2310_s14 = inlined_call_operand.vmem [shape: f32[2,1,64], index: 14, kind: input, shape index: {}]   ;;  %s2311_s15 = inlined_call_operand.vmem [shape: bf16[2,64,32], index: 15, kind: input, shape index: {}]   ;;  %s2312_s16 = inlined_call_operand.vmem [shape: f32[2,1,32], index: 16, kind: input, shape index: {}]   ;;  %s2313_s17 = inlined_call_operand.vmem [shape: f32[2,1,32], index: 17, kind: input, shape index: {}]   ;;  %s2314_s18 = inlined_call_operand.vmem [shape: f32[2,1,32], index: 18, kind: input, shape index: {}]   ;;  %s2315_s19 = inlined_call_operand.vmem [shape: f32[1,32], index: 19, kind: input, shape index: {}]   ;;  %s2316_s20 = inlined_call_operand.vmem [shape: f32[1,32], index: 20, kind: input, shape index: {}]   ;;  %s2317_s21 = inlined_call_operand.vmem [shape: bf16[2,8,32], index: 21, kind: output, shape index: {}]  }
   0x1   :  { %2325 = sst [smem:[#allocation3_spill]] %s2296_s0 }
   0x2   :  { %2326 = sst [smem:[#allocation4_spill]] %s2297_s1 }
   0x3   :  { %2327 = sst [smem:[#allocation5_spill]] %s2298_s2  ;;  %s2034_s2 = smov 0  }
   0x4   :  { %2328 = sst [smem:[#allocation6_spill]] %s2299_s3 }
   0x5   :  { %2329 = sst [smem:[#allocation7_spill]] %s2300_s4 }
   0x6   :  { %2330 = sst [smem:[#allocation8_spill]] %s2301_s5 }
   0x7 LB: > { %2331 = sst [smem:[#allocation2_spill]] %s1918_s2  ;;  %s1643_s25 = sadd.s32 4294967295, %s1918_s2   ;;  %s1918_s2 = sphi %s2034_s2, %s31_s2  }
   0x8   : > { %p1647_p0 = scmp.ge.s32.totalorder %s1918_s2, 1  ;;  %p594_p1 = scmp.lt.s32.totalorder %s1918_s2, 3 }
   0xa   : > { %p595_p2 = pnand %p1647_p0, %p594_p1 }
   0xb   : > { %s2332_s3 = sld [smem:[#allocation6_spill]] (!%p595_p2)  ;;  %p655_p3 = scmp.lt.s32.totalorder (!%p595_p2), %s1643_s25, 1 }
   0xc   : > { %598 = sbr.rel (%p595_p2) target bundleno = 3934 (0xf5e), region = 104  ;;  %s2333_s0 = sld [smem:[#allocation8_spill]] (!%p595_p2) }
   0xd   : > { %s2334_s26 = sld [smem:[#allocation3_spill]] (!%p595_p2)  ;;  %s2321_s22 = smov (!%p595_p2), 112  }
   0xe   : > { %s2335_s4 = sld [smem:[#allocation7_spill]] (!%p595_p2)  ;;  %s2339_s24 = smov (!%p595_p2), 16  }
   0xf   : > { %s2337_s2 = sld [smem:[#allocation4_spill]] (!%p595_p2) }
  0x11   : > { %v1823_v0 = vld [vmem:[%s2332_s3 + $0x8] sm:$0xff]  ;;  %v1822_v2 = vld [vmem:[%s2332_s3] sm:$0xff]  ;;  %s2342_s25 = smov (!%p655_p3, %s1643_s25), 1  ;;  %vm714_vm0 = vcmask 261120   ;;  %vm790_vm1 = vcmask 130048   ;;  %v1921_v30 = vmov 0.0  }
  0x12   : > { %v1825_v1 = vld [vmem:[%s2333_s0 + $0x8] sm:$0xff]  ;;  %724 = vmatpush.bf16.msra.mxu0 %v1823_v0  ;;  %v1824_v3 = vld [vmem:[%s2333_s0] sm:$0xff]  ;;  %s1648_s23 = sshll.u32 %s2342_s25, 3  ;;  %vm810_vm3 = vcmask 64512   ;;  %vm826_vm4 = vcmask 1043456   ;;  %vm1060_vm9 = vcmask 523264  }
  0x13   : > { %752 = vmatpush.bf16.msra.mxu1 %v1825_v1  ;;  %s658_s27 = scalar_lea.vmem %s2334_s26, %s1648_s23  ;;  %v1863_v7 = vld [vmem:[%s2302_s6] ss:$0 sm:$0xff]  ;;  %v1827_v26 = vld [vmem:[%s2303_s7 + $0x8] sm:$0xff]  ;;  %s2338_s23 = smov 112  }
  0x14   : > { %v2060_v4 = vld [vmem:[%s658_s27] sm:$0xff]  ;;  %780 = vmatpush.bf16.msra.mxu2 %v1827_v26  ;;  %s2336_s27 = sld [smem:[#allocation5_spill]]  ;;  %s2324_s26 = smov 16  }
  0x15   : > { %v698_v5 = vpack.c.bf16 %v2060_v4, %v2060_v4  ;;  %v1862_v6 = vld [vmem:[%s2335_s4] ss:$0 sm:$0xff] }
  0x16   : > { %725 = vmatpush.bf16.msra.mxu0 %v1822_v2  ;;  %v1826_v27 = vld [vmem:[%s2303_s7] sm:$0xff] }
  0x17   : > { %753 = vmatpush.bf16.msra.mxu1 %v1824_v3  ;;  %v668_v29 = vld [vmem:[%s2337_s2] sm:$0xff] }
  0x18   : > { %781 = vmatpush.bf16.msra.mxu2 %v1826_v27  ;;  %v669_v32 = vmax.f32 %v668_v29, -1e+30  ;;  %v1864_v42 = vld [vmem:[%s2304_s8] ss:$0 sm:$0xff] }
  0x19   : > { %1658 = vmatmul.msk.bf16.vlgmr.msra.gmra.mxu0 %vm714_vm0, %v698_v5 }
  0x1a   : > { %1667 = vmatmul.msk.bf16.vlgmr.msra.gmra.mxu1 %vm714_vm0, %v698_v5  ;;  %s661_s28 = scalar_lea.vmem %s2336_s27, %s2342_s25 }
  0x1b   : > { %v670_v28 = vld [vmem:[%s661_s28] sm:$0x1]  ;;  %1676 = vmatmul.msk.bf16.vlgmr.msra.gmra.mxu2 %vm714_vm0, %v698_v5 }
  0x1c   : > { %vm671_vm2 = vcmp.gt.f32.partialorder %v670_v28, 0.5 }
  0x1d   : > { %v672_v31 = vsel %vm671_vm2, -1e+30, %v1921_v30 }
  0x1e   : > { %v674_v33 = vperm.slane %v672_v31, 0 }
  0x20   : > { %v676_v34 = vadd.f32 %v674_v33, %v669_v32  ;;  %v1831_v33 = vld [vmem:[%s2309_s13 + $0x8] sm:$0xff] }
  0x22   : > { %v2092_v35 = vmax.f32 %v676_v34, -1e+30  ;;  %v1830_v34 = vld [vmem:[%s2309_s13] sm:$0xff] }
  0x96   : > { %v727_v8 = vpop.f32.mrf.mxu0 }
  0x97   : > { %v755_v9 = vpop.f32.mrf.mxu1  ;;  %v728_v10 = vadd.f32 %v1862_v6, %v727_v8 }
  0x98   : > { %v756_v11 = vadd.f32 %v1863_v7, %v755_v9  ;;  %v1829_v7 = vld [vmem:[%s2305_s9 + $0x8] sm:$0xff] }
  0x99   : > { %v787_v13 = vpack.c.bf16 %v728_v10, %v728_v10 }
  0x9a   : > { %v788_v12 = vpack.c.bf16 %v756_v11, %v756_v11 }
  0x9b   : > { %v844_v19 = vunpack.c.l.b16 %v787_v13 }
  0x9c   : > { %v795_v14 = vsel %vm790_vm1, %v788_v12, 0  ;;  %v849_v15 = vunpack.c.l.b16 %v788_v12  ;;  %v1828_v12 = vld [vmem:[%s2305_s9] sm:$0xff] }
  0x9d   : > { %804 = vmatpush.bf16.xpose.msra.mxu3 %v795_v14  ;;  %v845_v20 = vpack.c.b16 %v844_v19, %v844_v19 }
  0x9e   : > { %v850_v16 = vpack.c.b16 %v849_v15, %v849_v15  ;;  %v729_v17 = vpop.f32.mrf.mxu0  ;;  %v783_v43 = vpop.f32.mrf.mxu2 }
  0x9f   : > { %v757_v18 = vpop.f32.mrf.mxu1  ;;  %v784_v44 = vadd.f32 %v1864_v42, %v783_v43 }
  0xa0   : > { %851 = vrot.lane.b32.xlu0 %v850_v16, %s2321_s22  ;;  %v1865_v16 = vld [vmem:[%s2306_s10] ss:$0 sm:$0xff] }
  0xa1   : > { %v789_v46 = vpack.c.bf16 %v784_v44, %v784_v44 }
  0xa3   : > { %v828_v48 = vsel %vm826_vm4, %v789_v46, 0  ;;  %v885_v58 = vunpack.c.l.b16 %v789_v46 }
  0xa4   : > { %1677 = vmatmul.msk.bf16.vlgmr.msra.gmra.mxu3 %vm790_vm1, %v787_v13  ;;  %837 = vmatpush.bf16.msrb.mxu0 %v828_v48 }
  0xa5   : > { %v886_v59 = vpack.c.b16 %v885_v58, %v885_v58  ;;  %938 = vmatpush.bf16.msrb.mxu3 %v1829_v7 }
  0xa6   : > { %v785_v50 = vpop.f32.mrf.mxu2 }
  0xa8   : > { %846 = vrot.lane.b32.xlu0 %v845_v20, %s2321_s22  ;;  %1024 = vmatpush.bf16.msra.mxu0 %v1831_v33 }
  0xa9   : > { %939 = vmatpush.bf16.msrb.mxu3 %v1828_v12  ;;  %v1841_v12 = vld [vmem:[%s2303_s7 + $0x18] sm:$0xff] }
  0xac   : > { %1025 = vmatpush.bf16.msra.mxu0 %v1830_v34 }
 0x112   : > { %v852_v21 = vpop.permute.xlu0 %851 }
 0x113   : > { %v857_v22 = vsel %vm790_vm1, %v852_v21, 0 }
 0x114   : > { %866 = vmatpush.bf16.xpose.msrb.mxu1 %v857_v22  ;;  %v1923_v22 = vmov 32.0  }
 0x11a   : > { %v847_v23 = vpop.permute.xlu0 %846 }
 0x11b   : > { %1679 = vmatmul.msk.bf16.vlgmr.msrb.gmra.mxu1 %vm790_vm1, %v847_v23 }
 0x127   : > { %v806_v24 = vpop.f32.mrf.mxu3 }
 0x128   : > { %v807_v39 = vadd.f32 %v806_v24, %v2092_v35 }
 0x12a   : > { %v811_v41 = vsel %vm810_vm3, %v807_v39, -inf }
 0x12f   : > { %v808_v25 = vpop.f32.mrf.mxu3 }
 0x198   : > { %v868_v36 = vpop.f32.mrf.mxu1 }
 0x199   : > { %v869_v37 = vadd.f32 %v868_v36, %v2092_v35  ;;  %v1835_v36 = vld [vmem:[%s2311_s15 + $0x18] sm:$0xff] }
 0x19a   : > { %1068 = vmatpush.bf16.msra.mxu1 %v1835_v36  ;;  %v1873_v36 = vld [vmem:[%s2335_s4 + $0x1] ss:$0 sm:$0xff] }
 0x19b   : > { %v872_v38 = vsel %vm810_vm3, %v869_v37, -inf }
 0x19c   : > { %873 = vmax.xlane.f32.xlu1 %v872_v38 }
 0x1a0   : > { %v870_v40 = vpop.f32.mrf.mxu1 }
 0x1a4   : > { %812 = vmax.xlane.f32.xlu1 %v811_v41 }
 0x20f   : > { %v874_v45 = vpop.xlane.xlu1 %873 }
 0x210   : > { %v875_v47 = vsub.f32 %v869_v37, %v874_v45 }
 0x212   : > { %v876_v49 = vmul.f32 1.442695, %v875_v47  ;;  %v1866_v47 = vld [vmem:[%s2307_s11] ss:$0 sm:$0xff] }
 0x214   : > { %1884 = vpow2.f32 %v876_v49  ;;  %v1867_v49 = vld [vmem:[%s2308_s12] ss:$0 sm:$0xff] }
 0x217   : > { %v813_v51 = vpop.xlane.xlu1 %812 }
 0x218   : > { %v814_v52 = vsub.f32 %v807_v39, %v813_v51  ;;  %v1834_v39 = vld [vmem:[%s2311_s15 + $0x10] sm:$0xff] }
 0x219   : > { %1069 = vmatpush.bf16.msra.mxu1 %v1834_v39 }
 0x21a   : > { %v1885_v53 = vpop.eup %1884  ;;  %v815_v54 = vmul.f32 1.442695, %v814_v52 }
 0x21b   : > { %v878_v55 = vsel %vm810_vm3, %v1885_v53, 0.0 }
 0x21c   : > { %1886 = vpow2.f32 %v815_v54  ;;  %879 = vadd.xlane.f32.xlu2 %v878_v55  ;;  %v1833_v54 = vld [vmem:[%s2311_s15 + $0x8] sm:$0xff]  ;;  %v1832_v55 = vld [vmem:[%s2311_s15] sm:$0xff] }
 0x21d   : > { %1070 = vmatpush.bf16.msra.mxu1 %v1833_v54 }
 0x221   : > { %1071 = vmatpush.bf16.msra.mxu1 %v1832_v55 }
 0x222   : > { %v1887_v56 = vpop.eup %1886 }
 0x223   : > { %v817_v57 = vsel %vm810_vm3, %v1887_v56, 0.0 }
 0x224   : > { %818 = vadd.xlane.f32.xlu0 %v817_v57 }
 0x234   : > { %887 = vrot.lane.b32.xlu2 %v886_v59, %s2338_s23 }
 0x28f   : > { %v880_v60 = vpop.xlane.xlu2 %879 }
 0x290   : > { %1888 = vrcp.f32 %v880_v60 }
 0x296   : > { %v1889_v61 = vpop.eup %1888 }
 0x297   : > { %v882_v62 = vmul.f32 %v1889_v61, %v1885_v53  ;;  %v888_v63 = vpop.permute.xlu2 %887  ;;  %v819_v0 = vpop.xlane.xlu0 %818 }
 0x298   : > { %1890 = vrcp.f32 %v819_v0  ;;  %v893_v1 = vsel %vm826_vm4, %v888_v63, 0 }
 0x299   : > { %902 = vmatpush.bf16.msrb.mxu2 %v893_v1  ;;  %v883_v2 = vpack.c.bf16 %v882_v62, %v882_v62  ;;  %1892 = vrcp.f32 %v1923_v22  ;;  %v1869_v62 = vld [vmem:[%s2312_s16] ss:$0 sm:$0xff] }
 0x29c   : > { %1680 = vmatmul.msk.bf16.vlgmr.msrb.gmra.mxu2 %vm810_vm3, %v883_v2 }
 0x29e   : > { %v1891_v3 = vpop.eup %1890 }
 0x29f   : > { %v821_v5 = vmul.f32 %v1891_v3, %v1887_v56  ;;  %v1893_v23 = vpop.eup %1892  ;;  %v1868_v56 = vld [vmem:[%s2310_s14] ss:$0 sm:$0xff] }
 0x2a0   : > { %v952_v24 = vmul.f32 32.0, %v1893_v23  ;;  %vm956_vm5 = vweird.f32 %v1893_v23 }
 0x2a1   : > { %v822_v6 = vpack.c.bf16 %v821_v5, %v821_v5 }
 0x2a2   : > { %v953_v25 = vsub.f32 1.0, %v952_v24 }
 0x2a3   : > { %1678 = vmatmul.msk.bf16.vlgmr.msrb.gmra.mxu0 %vm810_vm3, %v822_v6 }
 0x2a4   : > { %v954_v26 = vmul.f32 %v1893_v23, %v953_v25  ;;  %1219 = vmatpush.bf16.msrb.mxu0 %v1841_v12  ;;  %v1870_v25 = vld [vmem:[%s2313_s17] ss:$0 sm:$0xff] }
 0x2a6   : > { %v955_v27 = vadd.f32 %v1893_v23, %v954_v26 }
 0x2a8   : > { %v2122_v28 = vsel %vm956_vm5, %v1893_v23, %v955_v27  ;;  %v1871_v27 = vld [vmem:[%s2314_s18] ss:$0 sm:$0xff] }
 0x31f   : > { %v904_v8 = vpop.f32.mrf.mxu2 }
 0x320   : > { %909 = vrot.lane.b32.xlu1 %v904_v8, %s2324_s26  ;;  %v839_v9 = vpop.f32.mrf.mxu0 }
 0x327   : > { %v906_v10 = vpop.f32.mrf.mxu2 }
 0x328   : > { %v841_v11 = vpop.f32.mrf.mxu0  ;;  %v1837_v10 = vld [vmem:[%s2332_s3 + $0x18] sm:$0xff] }
 0x329   : > { %v1839_v11 = vld [vmem:[%s2333_s0 + $0x18] sm:$0xff]  ;;  %1163 = vmatpush.bf16.msra.mxu2 %v1837_v10 }
 0x32a   : > { %1191 = vmatpush.bf16.msra.mxu3 %v1839_v11 }
 0x392   : > { %v910_v13 = vpop.permute.xlu1 %909 }
 0x393   : > { %v912_v14 = vsel %vm790_vm1, %v839_v9, %v910_v13  ;;  %v1836_v13 = vld [vmem:[%s2332_s3 + $0x10] sm:$0xff] }
 0x394   : > { %v913_v15 = vpack.c.bf16 %v912_v14, %v912_v14  ;;  %v1838_v14 = vld [vmem:[%s2333_s0 + $0x10] sm:$0xff]  ;;  %1164 = vmatpush.bf16.msra.mxu2 %v1836_v13 }
 0x395   : > { %1192 = vmatpush.bf16.msra.mxu3 %v1838_v14 }
 0x396   : > { %1689 = vmatmul.msk.bf16.vlgmr.msrb.gmra.mxu3 %vm714_vm0, %v913_v15  ;;  %v1840_v15 = vld [vmem:[%s2303_s7 + $0x10] sm:$0xff] }
 0x397   : > { %1220 = vmatpush.bf16.msrb.mxu0 %v1840_v15 }
 0x419   : > { %v941_v17 = vpop.f32.mrf.mxu3 }
 0x41a   : > { %v942_v18 = vadd.f32 %v1865_v16, %v941_v17 }
 0x41c   : > { %v945_v19 = vadd.f32 %v942_v18, %v2060_v4 }
 0x41e   : > { %v948_v20 = vsel %vm714_vm0, %v945_v19, 0.0 }
 0x41f   : > { %949 = vadd.xlane.f32.xlu2 %v948_v20 }
 0x421   : > { %v943_v21 = vpop.f32.mrf.mxu3 }
 0x492   : > { %v950_v29 = vpop.xlane.xlu2 %949 }
 0x493   : > { %v958_v30 = vmul.f32 %v2122_v28, %v950_v29 }
 0x495   : > { %v959_v31 = vsub.f32 %v945_v19, %v958_v30 }
 0x497   : > { %v960_v32 = vmul.f32 %v959_v31, %v959_v31 }
 0x499   : > { %v961_v4 = vsel %vm714_vm0, %v960_v32, 0.0 }
 0x49a   : > { %962 = vadd.xlane.f32.xlu1 %v961_v4  ;;  %v1872_v4 = vld [vmem:[%s2304_s8 + $0x1] ss:$0 sm:$0xff] }
 0x50d   : > { %v963_v37 = vpop.xlane.xlu1 %962 }
 0x50e   : > { %v964_v38 = vmul.f32 %v963_v37, %v2122_v28  ;;  %v1874_v37 = vld [vmem:[%s2302_s6 + $0x1] ss:$0 sm:$0xff] }
 0x510   : > { %v965_v40 = vadd.f32 1e-05, %v964_v38 }
 0x512   : > { %1894 = vrsqrt.f32 %v965_v40  ;;  %vm972_vm7 = vweird.f32 %v965_v40 }
 0x518   : > { %v1895_v41 = vpop.eup %1894 }
 0x519   : > { %v967_v42 = vmul.f32 %v1895_v41, %v965_v40  ;;  %vm973_vm6 = vweird.f32 %v1895_v41 }
 0x51a   : > { %vm974_vm8 = vmor %vm972_vm7, %vm973_vm6  ;;  %vm1579_vm6 = vcmask 257024  }
 0x51b   : > { %v968_v43 = vmul.f32 %v1895_v41, %v967_v42 }
 0x51d   : > { %v969_v44 = vmul.f32 0.5, %v968_v43 }
 0x51f   : > { %v970_v45 = vsub.f32 1.5, %v969_v44 }
 0x521   : > { %v971_v46 = vmul.f32 %v1895_v41, %v970_v45 }
 0x523   : > { %v975_v48 = vsel %vm974_vm8, %v1895_v41, %v971_v46 }
 0x524   : > { %v976_v50 = vmul.f32 %v975_v48, %v959_v31 }
 0x526   : > { %v980_v51 = vmul.f32 %v1866_v47, %v976_v50 }
 0x528   : > { %v984_v52 = vadd.f32 %v1867_v49, %v980_v51 }
 0x52a   : > { %v999_v53 = vpack.c.bf16 %v984_v52, %v984_v52 }
 0x52c   : > { %1698 = vmatmul.msk.bf16.vlgmr.msra.gmra.mxu0 %vm714_vm0, %v999_v53 }
 0x5a9   : > { %v1027_v57 = vpop.f32.mrf.mxu0 }
 0x5aa   : > { %v1028_v58 = vadd.f32 %v1868_v56, %v1027_v57 }
 0x5ac   : > { %v1031_v59 = vmax.f32 %v1028_v58, 0.0 }
 0x5ae   : > { %v1032_v60 = vpack.c.bf16 %v1031_v59, %v1031_v59 }
 0x5b0   : > { %1715 = vmatmul.msk.bf16.vlgmr.msra.gmra.mxu1 %vm1060_vm9, %v1032_v60 }
 0x5b1   : > { %v1029_v61 = vpop.f32.mrf.mxu0 }
 0x62d   : > { %v1073_v63 = vpop.f32.mrf.mxu1 }
 0x62e   : > { %v1074_v0 = vadd.f32 %v1869_v62, %v1073_v63 }
 0x630   : > { %v1077_v1 = vadd.f32 %v1074_v0, %v984_v52 }
 0x632   : > { %v1080_v2 = vsel %vm714_vm0, %v1077_v1, 0.0 }
 0x633   : > { %1081 = vadd.xlane.f32.xlu0 %v1080_v2 }
 0x635   : > { %v1075_v3 = vpop.f32.mrf.mxu1 }
 0x6a6   : > { %v1082_v5 = vpop.xlane.xlu0 %1081 }
 0x6a7   : > { %v1083_v6 = vmul.f32 %v1082_v5, %v2122_v28 }
 0x6a9   : > { %v1084_v7 = vsub.f32 %v1077_v1, %v1083_v6 }
 0x6ab   : > { %v1085_v8 = vmul.f32 %v1084_v7, %v1084_v7 }
 0x6ad   : > { %v1086_v9 = vsel %vm714_vm0, %v1085_v8, 0.0 }
 0x6ae   : > { %1087 = vadd.xlane.f32.xlu0 %v1086_v9 }
 0x721   : > { %v1088_v16 = vpop.xlane.xlu0 %1087 }
 0x722   : > { %v1089_v17 = vmul.f32 %v1088_v16, %v2122_v28 }
 0x724   : > { %v1090_v18 = vadd.f32 1e-05, %v1089_v17 }
 0x726   : > { %1896 = vrsqrt.f32 %v1090_v18  ;;  %vm1097_vm11 = vweird.f32 %v1090_v18 }
 0x72c   : > { %v1897_v19 = vpop.eup %1896 }
 0x72d   : > { %v1092_v20 = vmul.f32 %v1897_v19, %v1090_v18  ;;  %vm1098_vm10 = vweird.f32 %v1897_v19 }
 0x72e   : > { %vm1099_vm12 = vmor %vm1097_vm11, %vm1098_vm10 }
 0x72f   : > { %v1093_v21 = vmul.f32 %v1897_v19, %v1092_v20 }
 0x731   : > { %v1094_v22 = vmul.f32 0.5, %v1093_v21 }
 0x733   : > { %v1095_v23 = vsub.f32 1.5, %v1094_v22 }
 0x735   : > { %v1096_v24 = vmul.f32 %v1897_v19, %v1095_v23  ;;  %v1843_v23 = vld [vmem:[%s2305_s9 + $0x18] sm:$0xff] }
 0x737   : > { %v1100_v26 = vsel %vm1099_vm12, %v1897_v19, %v1096_v24 }
 0x738   : > { %v1101_v29 = vmul.f32 %v1100_v26, %v1084_v7 }
 0x73a   : > { %v1105_v30 = vmul.f32 %v1870_v25, %v1101_v29  ;;  %v1842_v29 = vld [vmem:[%s2305_s9 + $0x10] sm:$0xff] }
 0x73c   : > { %v2187_v31 = vadd.f32 %v1871_v27, %v1105_v30 }
 0x73e   : > { %v1138_v32 = vpack.c.bf16 %v2187_v31, %v2187_v31 }
 0x740   : > { %1744 = vmatmul.msk.bf16.vlgmr.msra.gmra.mxu2 %vm714_vm0, %v1138_v32  ;;  %1753 = vmatmul.msk.bf16.vlgmr.msra.gmra.mxu3 %vm714_vm0, %v1138_v32 }
 0x741   : > { %1762 = vmatmul.msk.bf16.vlgmr.msrb.gmra.mxu0 %vm714_vm0, %v1138_v32 }
 0x7be   : > { %v1222_v33 = vpop.f32.mrf.mxu0 }
 0x7bf   : > { %v1223_v34 = vadd.f32 %v1872_v4, %v1222_v33  ;;  %v1875_v33 = vld [vmem:[%s2306_s10 + $0x1] ss:$0 sm:$0xff] }
 0x7c1   : > { %v1228_v38 = vpack.c.bf16 %v1223_v34, %v1223_v34 }
 0x7c3   : > { %v1264_v39 = vsel %vm826_vm4, %v1228_v38, 0  ;;  %v1166_v40 = vpop.f32.mrf.mxu2  ;;  %v1194_v41 = vpop.f32.mrf.mxu3  ;;  %v1321_v54 = vunpack.c.l.b16 %v1228_v38 }
 0x7c4   : > { %v1167_v42 = vadd.f32 %v1873_v36, %v1166_v40  ;;  %v1195_v43 = vadd.f32 %v1874_v37, %v1194_v41  ;;  %1273 = vmatpush.bf16.msrb.mxu2 %v1264_v39 }
 0x7c5   : > { %v1322_v55 = vpack.c.b16 %v1321_v54, %v1321_v54 }
 0x7c6   : > { %v1226_v44 = vpack.c.bf16 %v1167_v42, %v1167_v42  ;;  %v1227_v45 = vpack.c.bf16 %v1195_v43, %v1195_v43  ;;  %v1224_v46 = vpop.f32.mrf.mxu0 }
 0x7c7   : > { %v1849_v46 = vld [vmem:[%s2311_s15 + $0x38] sm:$0xff] }
 0x7c8   : > { %v1280_v47 = vunpack.c.l.b16 %v1226_v44  ;;  %v1233_v48 = vsel %vm790_vm1, %v1227_v45, 0  ;;  %v1285_v49 = vunpack.c.l.b16 %v1227_v45  ;;  %v1845_v45 = vld [vmem:[%s2309_s13 + $0x18] sm:$0xff] }
 0x7c9   : > { %1242 = vmatpush.bf16.xpose.msrb.mxu1 %v1233_v48  ;;  %1459 = vmatpush.bf16.msra.mxu2 %v1845_v45 }
 0x7ca   : > { %v1281_v50 = vpack.c.b16 %v1280_v47, %v1280_v47  ;;  %v1286_v51 = vpack.c.b16 %v1285_v49, %v1285_v49  ;;  %v1848_v49 = vld [vmem:[%s2311_s15 + $0x30] sm:$0xff] }
 0x7cb   : > { %v1168_v52 = vpop.f32.mrf.mxu2  ;;  %v1196_v53 = vpop.f32.mrf.mxu3 }
 0x7cc   : > { %1287 = vrot.lane.b32.xlu2 %v1286_v51, %s2338_s23  ;;  %1282 = vrot.lane.b32.xlu0 %v1281_v50, %s2338_s23 }
 0x7d0   : > { %1763 = vmatmul.msk.bf16.vlgmr.msrb.gmra.mxu1 %vm790_vm1, %v1226_v44 }
 0x7d1   : > { %1374 = vmatpush.bf16.msra.mxu1 %v1843_v23 }
 0x7d4   : > { %1323 = vrot.lane.b32.xlu2 %v1322_v55, %s2338_s23 }
 0x7d5   : > { %1375 = vmatpush.bf16.msra.mxu1 %v1842_v29  ;;  %v1880_v29 = vld [vmem:[%s2313_s17 + $0x1] ss:$0 sm:$0xff] }
 0x826   : > { %v1288_v56 = vpop.permute.xlu2 %1287 }
 0x827   : > { %v1293_v57 = vsel %vm790_vm1, %v1288_v56, 0 }
 0x828   : > { %1302 = vmatpush.bf16.xpose.msrb.mxu3 %v1293_v57  ;;  %v1876_v57 = vld [vmem:[%s2307_s11 + $0x1] ss:$0 sm:$0xff] }
 0x82e   : > { %v1324_v58 = vpop.permute.xlu2 %1323 }
 0x82f   : > { %v1329_v59 = vsel %vm826_vm4, %v1324_v58, 0 }
 0x830   : > { %1338 = vmatpush.bf16.msra.mxu0 %v1329_v59  ;;  %1502 = vmatpush.bf16.msra.mxu3 %v1849_v46  ;;  %v1877_v59 = vld [vmem:[%s2308_s12 + $0x1] ss:$0 sm:$0xff] }
 0x834   : > { %1503 = vmatpush.bf16.msra.mxu3 %v1848_v49 }
 0x83e   : > { %v1283_v60 = vpop.permute.xlu0 %1282 }
 0x83f   : > { %1765 = vmatmul.msk.bf16.vlgmr.msrb.gmra.mxu3 %vm790_vm1, %v1283_v60 }
 0x84d   : > { %v1244_v61 = vpop.f32.mrf.mxu1 }
 0x84e   : > { %v1245_v2 = vadd.f32 %v1244_v61, %v2092_v35 }
 0x850   : > { %v1248_v5 = vsel %vm810_vm3, %v1245_v2, -inf }
 0x855   : > { %v1246_v62 = vpop.f32.mrf.mxu1 }
 0x8c2   : > { %v1304_v63 = vpop.f32.mrf.mxu3 }
 0x8c3   : > { %v1305_v0 = vadd.f32 %v1304_v63, %v2092_v35 }
 0x8c5   : > { %v1308_v1 = vsel %vm810_vm3, %v1305_v0, -inf }
 0x8c6   : > { %1309 = vmax.xlane.f32.xlu1 %v1308_v1  ;;  %v1846_v1 = vld [vmem:[%s2311_s15 + $0x20] sm:$0xff] }
 0x8ca   : > { %v1306_v3 = vpop.f32.mrf.mxu3 }
 0x8ce   : > { %1249 = vmax.xlane.f32.xlu1 %v1248_v5 }
 0x939   : > { %v1310_v6 = vpop.xlane.xlu1 %1309 }
 0x93a   : > { %v1311_v7 = vsub.f32 %v1305_v0, %v1310_v6  ;;  %v1847_v0 = vld [vmem:[%s2311_s15 + $0x28] sm:$0xff] }
 0x93b   : > { %1504 = vmatpush.bf16.msra.mxu3 %v1847_v0 }
 0x93c   : > { %v1312_v8 = vmul.f32 1.442695, %v1311_v7 }
 0x93e   : > { %1898 = vpow2.f32 %v1312_v8 }
 0x93f   : > { %1505 = vmatpush.bf16.msra.mxu3 %v1846_v1 }
 0x941   : > { %v1250_v9 = vpop.xlane.xlu1 %1249 }
 0x942   : > { %v1251_v10 = vsub.f32 %v1245_v2, %v1250_v9  ;;  %v1878_v2 = vld [vmem:[%s2310_s14 + $0x1] ss:$0 sm:$0xff] }
 0x943   : > { %v1879_v9 = vld [vmem:[%s2312_s16 + $0x1] ss:$0 sm:$0xff] }
 0x944   : > { %v1899_v11 = vpop.eup %1898  ;;  %v1252_v12 = vmul.f32 1.442695, %v1251_v10 }
 0x945   : > { %v1314_v13 = vsel %vm810_vm3, %v1899_v11, 0.0 }
 0x946   : > { %1900 = vpow2.f32 %v1252_v12  ;;  %1315 = vadd.xlane.f32.xlu0 %v1314_v13 }
 0x94c   : > { %v1901_v14 = vpop.eup %1900 }
 0x94d   : > { %v1254_v15 = vsel %vm810_vm3, %v1901_v14, 0.0 }
 0x94e   : > { %1255 = vadd.xlane.f32.xlu1 %v1254_v15 }
 0x9b9   : > { %v1316_v35 = vpop.xlane.xlu0 %1315 }
 0x9ba   : > { %1902 = vrcp.f32 %v1316_v35 }
 0x9c0   : > { %v1903_v16 = vpop.eup %1902 }
 0x9c1   : > { %v1318_v17 = vmul.f32 %v1903_v16, %v1899_v11  ;;  %v1256_v18 = vpop.xlane.xlu1 %1255 }
 0x9c2   : > { %1904 = vrcp.f32 %v1256_v18 }
 0x9c3   : > { %v1319_v19 = vpack.c.bf16 %v1318_v17, %v1318_v17 }
 0x9c5   : > { %1766 = vmatmul.msk.bf16.vlgmr.msra.gmra.mxu0 %vm810_vm3, %v1319_v19 }
 0x9c8   : > { %v1905_v20 = vpop.eup %1904 }
 0x9c9   : > { %v1258_v21 = vmul.f32 %v1905_v20, %v1901_v14 }
 0x9cb   : > { %v1259_v22 = vpack.c.bf16 %v1258_v21, %v1258_v21 }
 0x9cd   : > { %1764 = vmatmul.msk.bf16.vlgmr.msrb.gmra.mxu2 %vm810_vm3, %v1259_v22 }
 0xa42   : > { %v1340_v24 = vpop.f32.mrf.mxu0 }
 0xa43   : > { %1345 = vrot.lane.b32.xlu2 %v1340_v24, %s2339_s24  ;;  %s1649_s24 = sshll.u32 %s2342_s25, 2 }
 0xa44   : > { %s665_s29 = scalar_lea.vmem %s2317_s21, %s1649_s24 }
 0xa4a   : > { %v1342_v25 = vpop.f32.mrf.mxu0 }
 0xa50   : > { %v1275_v26 = vpop.f32.mrf.mxu2 }
 0xa58   : > { %v1277_v27 = vpop.f32.mrf.mxu2 }
 0xa9d   : > { %v1346_v30 = vpop.permute.xlu2 %1345 }
 0xa9e   : > { %v1348_v32 = vsel %vm790_vm1, %v1275_v26, %v1346_v30 }
 0xa9f   : > { %v1349_v4 = vpack.c.bf16 %v1348_v32, %v1348_v32 }
 0xaa1   : > { %1775 = vmatmul.msk.bf16.vlgmr.msra.gmra.mxu1 %vm714_vm0, %v1349_v4  ;;  %v1881_v4 = vld [vmem:[%s2314_s18 + $0x1] ss:$0 sm:$0xff] }
 0xb1e   : > { %v1377_v34 = vpop.f32.mrf.mxu1 }
 0xb1f   : > { %v1378_v36 = vadd.f32 %v1875_v33, %v1377_v34 }
 0xb21   : > { %v1381_v37 = vadd.f32 %v1378_v36, %v2187_v31  ;;  %v1844_v31 = vld [vmem:[%s2309_s13 + $0x10] sm:$0xff] }
 0xb22   : > { %1460 = vmatpush.bf16.msra.mxu2 %v1844_v31 }
 0xb23   : > { %v1386_v38 = vsel %vm714_vm0, %v1381_v37, 0.0 }
 0xb24   : > { %1387 = vadd.xlane.f32.xlu1 %v1386_v38 }
 0xb26   : > { %v1379_v39 = vpop.f32.mrf.mxu1 }
 0xb97   : > { %v1388_v40 = vpop.xlane.xlu1 %1387 }
 0xb98   : > { %v1389_v41 = vmul.f32 %v1388_v40, %v2122_v28 }
 0xb9a   : > { %v1390_v42 = vsub.f32 %v1381_v37, %v1389_v41 }
 0xb9c   : > { %v1391_v43 = vmul.f32 %v1390_v42, %v1390_v42 }
 0xb9e   : > { %v1392_v44 = vsel %vm714_vm0, %v1391_v43, 0.0 }
 0xb9f   : > { %1393 = vadd.xlane.f32.xlu2 %v1392_v44 }
 0xc12   : > { %v1394_v47 = vpop.xlane.xlu2 %1393 }
 0xc13   : > { %v1395_v48 = vmul.f32 %v1394_v47, %v2122_v28 }
 0xc15   : > { %v1396_v50 = vadd.f32 1e-05, %v1395_v48 }
 0xc17   : > { %1906 = vrsqrt.f32 %v1396_v50  ;;  %vm1403_vm14 = vweird.f32 %v1396_v50 }
 0xc1d   : > { %v1907_v51 = vpop.eup %1906 }
 0xc1e   : > { %v1398_v52 = vmul.f32 %v1907_v51, %v1396_v50  ;;  %vm1404_vm13 = vweird.f32 %v1907_v51  ;;  %v1882_v50 = vld [vmem:[%s2315_s19] ss:$0 sm:$0xff] }
 0xc1f   : > { %vm1405_vm15 = vmor %vm1403_vm14, %vm1404_vm13 }
 0xc20   : > { %v1399_v53 = vmul.f32 %v1907_v51, %v1398_v52 }
 0xc22   : > { %v1400_v54 = vmul.f32 0.5, %v1399_v53 }
 0xc24   : > { %v1401_v55 = vsub.f32 1.5, %v1400_v54 }
 0xc26   : > { %v1402_v56 = vmul.f32 %v1907_v51, %v1401_v55 }
 0xc28   : > { %v1406_v58 = vsel %vm1405_vm15, %v1907_v51, %v1402_v56 }
 0xc29   : > { %v1407_v60 = vmul.f32 %v1406_v58, %v1390_v42 }
 0xc2b   : > { %v1411_v61 = vmul.f32 %v1876_v57, %v1407_v60 }
 0xc2d   : > { %v1415_v62 = vadd.f32 %v1877_v59, %v1411_v61 }
 0xc2f   : > { %v1434_v63 = vpack.c.bf16 %v1415_v62, %v1415_v62 }
 0xc31   : > { %1800 = vmatmul.msk.bf16.vlgmr.msra.gmra.mxu2 %vm714_vm0, %v1434_v63 }
 0xcb4   : > { %v1462_v3 = vpop.f32.mrf.mxu2 }
 0xcb5   : > { %v1463_v5 = vadd.f32 %v1878_v2, %v1462_v3 }
 0xcb7   : > { %v1466_v6 = vmax.f32 %v1463_v5, 0.0 }
 0xcb9   : > { %v1467_v7 = vpack.c.bf16 %v1466_v6, %v1466_v6 }
 0xcbb   : > { %1817 = vmatmul.msk.bf16.vlgmr.msra.gmra.mxu3 %vm1060_vm9, %v1467_v7 }
 0xcbc   : > { %v1464_v8 = vpop.f32.mrf.mxu2 }
 0xd3e   : > { %v1507_v10 = vpop.f32.mrf.mxu3 }
 0xd3f   : > { %v1508_v11 = vadd.f32 %v1879_v9, %v1507_v10 }
 0xd41   : > { %v1511_v12 = vadd.f32 %v1508_v11, %v1415_v62 }
 0xd43   : > { %v1516_v13 = vsel %vm714_vm0, %v1511_v12, 0.0 }
 0xd44   : > { %1517 = vadd.xlane.f32.xlu1 %v1516_v13 }
 0xd46   : > { %v1509_v14 = vpop.f32.mrf.mxu3 }
 0xdb7   : > { %v1518_v15 = vpop.xlane.xlu1 %1517 }
 0xdb8   : > { %v1519_v35 = vmul.f32 %v1518_v15, %v2122_v28 }
 0xdba   : > { %v1520_v16 = vsub.f32 %v1511_v12, %v1519_v35 }
 0xdbc   : > { %v1521_v17 = vmul.f32 %v1520_v16, %v1520_v16 }
 0xdbe   : > { %v1522_v18 = vsel %vm714_vm0, %v1521_v17, 0.0 }
 0xdbf   : > { %1523 = vadd.xlane.f32.xlu1 %v1522_v18 }
 0xe32   : > { %v1524_v19 = vpop.xlane.xlu1 %1523 }
 0xe33   : > { %v1525_v20 = vmul.f32 %v1524_v19, %v2122_v28 }
 0xe35   : > { %v1526_v21 = vadd.f32 1e-05, %v1525_v20 }
 0xe37   : > { %1908 = vrsqrt.f32 %v1526_v21  ;;  %vm1533_vm2 = vweird.f32 %v1526_v21 }
 0xe3d   : > { %v1909_v22 = vpop.eup %1908 }
 0xe3e   : > { %v1528_v23 = vmul.f32 %v1909_v22, %v1526_v21  ;;  %vm1534_vm1 = vweird.f32 %v1909_v22 }
 0xe3f   : > { %vm1535_vm3 = vmor %vm1533_vm2, %vm1534_vm1 }
 0xe40   : > { %v1529_v24 = vmul.f32 %v1909_v22, %v1528_v23 }
 0xe42   : > { %v1530_v25 = vmul.f32 0.5, %v1529_v24 }
 0xe44   : > { %v1531_v26 = vsub.f32 1.5, %v1530_v25 }
 0xe46   : > { %v1532_v27 = vmul.f32 %v1909_v22, %v1531_v26 }
 0xe48   : > { %v1536_v30 = vsel %vm1535_vm3, %v1909_v22, %v1532_v27 }
 0xe49   : > { %v1537_v32 = vmul.f32 %v1536_v30, %v1520_v16 }
 0xe4b   : > { %v1541_v33 = vmul.f32 %v1880_v29, %v1537_v32 }
 0xe4d   : > { %v1545_v34 = vadd.f32 %v1881_v4, %v1541_v33 }
 0xe4f   : > { %v1548_v36 = vsel %vm714_vm0, %v1545_v34, 0.0 }
 0xe50   : > { %1549 = vadd.xlane.f32.xlu1 %v1548_v36 }
 0xec3   : > { %v1550_v37 = vpop.xlane.xlu1 %1549 }
 0xec4   : > { %v1551_v38 = vmul.f32 %v1550_v37, %v2122_v28 }
 0xec6   : > { %v1552_v39 = vsub.f32 %v1545_v34, %v1551_v38 }
 0xec8   : > { %v1553_v40 = vmul.f32 %v1552_v39, %v1552_v39 }
 0xeca   : > { %v1554_v41 = vsel %vm714_vm0, %v1553_v40, 0.0 }
 0xecb   : > { %1555 = vadd.xlane.f32.xlu0 %v1554_v41 }
 0xf3e   : > { %v1556_v42 = vpop.xlane.xlu0 %1555 }
 0xf3f   : > { %v1557_v43 = vmul.f32 %v1556_v42, %v2122_v28  ;;  %v1883_v28 = vld [vmem:[%s2316_s20] ss:$0 sm:$0xff] }
 0xf41   : > { %v1558_v44 = vadd.f32 1e-05, %v1557_v43 }
 0xf43   : > { %1910 = vrsqrt.f32 %v1558_v44  ;;  %vm1565_vm5 = vweird.f32 %v1558_v44 }
 0xf49   : > { %v1911_v45 = vpop.eup %1910 }
 0xf4a   : > { %v1560_v31 = vmul.f32 %v1911_v45, %v1558_v44  ;;  %vm1566_vm4 = vweird.f32 %v1911_v45 }
 0xf4b   : > { %vm1567_vm0 = vmor %vm1565_vm5, %vm1566_vm4 }
 0xf4c   : > { %v1561_v46 = vmul.f32 %v1911_v45, %v1560_v31 }
 0xf4e   : > { %v1562_v47 = vmul.f32 0.5, %v1561_v46 }
 0xf50   : > { %v1563_v48 = vsub.f32 1.5, %v1562_v47 }
 0xf52   : > { %v1564_v49 = vmul.f32 %v1911_v45, %v1563_v48 }
 0xf54   : > { %v1568_v51 = vsel %vm1567_vm0, %v1911_v45, %v1564_v49 }
 0xf55   : > { %v1569_v52 = vmul.f32 %v1568_v51, %v1552_v39 }
 0xf57   : > { %v1573_v53 = vmul.f32 %v1882_v50, %v1569_v52 }
 0xf59   : > { %v1577_v54 = vadd.f32 %v1883_v28, %v1573_v53 }
 0xf5b   : > { %v1578_v55 = vpack.c.bf16 %v1577_v54, %v1577_v54 }
 0xf5d   : > { %1580 = vst.msk [vmem:[%s665_s29] sm:$0xf] %vm1579_vm6, %v1578_v55 }
 0xf5e PF: > { %s2340_s30 = sld [smem:[#allocation2_spill]] }
 0xf64   : > { %s31_s2 = sadd.s32 1, %s2340_s30  }
 0xf65   : > { %p28_p4 = scmp.ge.s32.totalorder %s31_s2, 4  }
 0xf67   :  { %30 = sbr.rel (!%p28_p4) target bundleno = 7 (0x7), region = 153 }

// kernel: seq2seq_forward.3
= control target key start
LH: loop header
LB: loop body
LE: loop exit
PB: predicated region body
PF: predicated region fallthrough
CT: control target
= control target key end

     0   :  { %s4240_s6 = smov 1   ;;  %s4241_s10 = smov 2   ;;  %s4965_s0 = inlined_call_operand.smem [shape: u32[36], index: -1, kind: input, shape index: {}] }
   0x1   :  { %s4303_s5 = sld [smem:[%s4965_s0]]   ;;  %s4242_s14 = smov 3  }
   0x2   :  { %s4308_s9 = sld [smem:[%s4965_s0 + %s4240_s6]]   ;;  %s4243_s18 = smov 4  }
   0x3   :  { %s4313_s13 = sld [smem:[%s4965_s0 + %s4241_s10]]   ;;  %s4244_s22 = smov 5  }
   0x4   :  { %s4318_s17 = sld [smem:[%s4965_s0 + %s4242_s14]]   ;;  %s4245_s26 = smov 6  }
   0x5   :  { %s4323_s21 = sld [smem:[%s4965_s0 + %s4243_s18]]   ;;  %s4246_s30 = smov 7  }
   0x6   :  { %s4328_s25 = sld [smem:[%s4965_s0 + %s4244_s22]]   ;;  %s4247_s4 = smov 8  }
   0x7   :  { %4991 = sst [smem:[#allocation32_spill]] %s4303_s5  ;;  %s4248_s10 = smov 9  }
   0x8   :  { %4992 = sst [smem:[#allocation33_spill]] %s4308_s9  ;;  %s4249_s15 = smov 10  }
   0x9   :  { %4993 = sst [smem:[#allocation34_spill]] %s4313_s13  ;;  %s4250_s20 = smov 11  }
   0xa   :  { %4994 = sst [smem:[#allocation35_spill]] %s4318_s17  ;;  %s4252_s1 = smov 13  }
   0xb   :  { %4995 = sst [smem:[#allocation36_spill]] %s4323_s21  ;;  %s4253_s7 = smov 14  }
   0xc   :  { %s4333_s29 = sld [smem:[%s4965_s0 + %s4245_s26]]   ;;  %s4251_s26 = smov 12  }
   0xd   :  { %s4338_s3 = sld [smem:[%s4965_s0 + %s4246_s30]]   ;;  %s4255_s22 = smov 16  }
   0xe   :  { %s4343_s8 = sld [smem:[%s4965_s0 + %s4247_s4]]   ;;  %s4256_s28 = smov 17  }
   0xf   :  { %s4348_s14 = sld [smem:[%s4965_s0 + %s4248_s10]]  }
  0x10   :  { %s4353_s19 = sld [smem:[%s4965_s0 + %s4249_s15]]   ;;  %s4254_s15 = smov 15  }
  0x11   :  { %s4358_s24 = sld [smem:[%s4965_s0 + %s4250_s20]]  }
  0x12   :  { %4996 = sst [smem:[#allocation37_spill]] %s4333_s29 }
  0x13   :  { %4997 = sst [smem:[#allocation38_spill]] %s4338_s3 }
  0x14   :  { %4998 = sst [smem:[#allocation39_spill]] %s4343_s8 }
  0x15   :  { %4999 = sst [smem:[#allocation40_spill]] %s4348_s14 }
  0x16   :  { %5000 = sst [smem:[#allocation41_spill]] %s4353_s19 }
  0x17   :  { %5001 = sst [smem:[#allocation42_spill]] %s4358_s24 }
  0x18   :  { %s4363_s30 = sld [smem:[%s4965_s0 + %s4251_s26]]  }
  0x19   :  { %s4368_s6 = sld [smem:[%s4965_s0 + %s4252_s1]]  }
  0x1a   :  { %s4373_s12 = sld [smem:[%s4965_s0 + %s4253_s7]]   ;;  %s4257_s7 = smov 18  }
  0x1b   :  { %s4378_s20 = sld [smem:[%s4965_s0 + %s4254_s15]]   ;;  %s4258_s15 = smov 19  }
  0x1c   :  { %s4383_s27 = sld [smem:[%s4965_s0 + %s4255_s22]]   ;;  %s4259_s22 = smov 20  }
  0x1d   :  { %s4388_s4 = sld [smem:[%s4965_s0 + %s4256_s28]]   ;;  %s4260_s28 = smov 21  }
  0x1e   :  { %5002 = sst [smem:[#allocation43_spill]] %s4363_s30 }
  0x1f   :  { %5003 = sst [smem:[#allocation44_spill]] %s4368_s6 }
  0x20   :  { %s4393_s21 = sld [smem:[%s4965_s0 + %s4257_s7]]   ;;  %s4261_s7 = smov 22  }
  0x21   :  { %5004 = sst [smem:[#allocation45_spill]] %s4378_s20 }
  0x22   :  { %5005 = sst [smem:[#allocation46_spill]] %s4383_s27 }
  0x23   :  { %5006 = sst [smem:[#allocation47_spill]] %s4388_s4 }
  0x24   :  { %s4398_s6 = sld [smem:[%s4965_s0 + %s4258_s15]]   ;;  %s4262_s15 = smov 23  }
  0x25   :  { %s4403_s20 = sld [smem:[%s4965_s0 + %s4259_s22]]   ;;  %s4263_s22 = smov 24  }
  0x26   :  { %s4408_s9 = sld [smem:[%s4965_s0 + %s4260_s28]]   ;;  %s4264_s28 = smov 25  }
  0x27   :  { %s4413_s4 = sld [smem:[%s4965_s0 + %s4261_s7]]   ;;  %s4265_s7 = smov 26  }
  0x28   :  { %s4423_s30 = sld [smem:[%s4965_s0 + %s4263_s22]]   ;;  %s4267_s22 = smov 28  }
  0x29   :  { %s4433_s24 = sld [smem:[%s4965_s0 + %s4265_s7]]   ;;  %s4269_s7 = smov 30  }
  0x2a   :  { %5007 = sst [smem:[#allocation48_spill]] %s4398_s6 }
  0x2b   :  { %5008 = sst [smem:[#allocation49_spill]] %s4403_s20 }
  0x2c   :  { %5009 = sst [smem:[#allocation50_spill]] %s4408_s9 }
  0x2d   :  { %5010 = sst [smem:[#allocation51_spill]] %s4413_s4 }
  0x2e   :  { %s4418_s6 = sld [smem:[%s4965_s0 + %s4262_s15]]   ;;  %s4266_s15 = smov 27  }
  0x2f   :  { %s4428_s9 = sld [smem:[%s4965_s0 + %s4264_s28]]   ;;  %s4268_s28 = smov 29  }
  0x30   :  { %s4438_s19 = sld [smem:[%s4965_s0 + %s4266_s15]]   ;;  %s4270_s15 = smov 31  }
  0x31   :  { %s4443_s13 = sld [smem:[%s4965_s0 + %s4267_s22]]   ;;  %s4271_s22 = smov 32  }
  0x32   :  { %s4453_s17 = sld [smem:[%s4965_s0 + %s4269_s7]]   ;;  %s4273_s7 = smov 34  }
  0x33   :  { %s4463_s14 = sld [smem:[%s4965_s0 + %s4271_s22]]  }
  0x34   :  { %s4473_s29 = sld [smem:[%s4965_s0 + %s4273_s7]]  }
  0x35   :  { %5011 = sst [smem:[#allocation52_spill]] %s4428_s9 }
  0x36   :  { %5012 = sst [smem:[#allocation53_spill]] %s4438_s19 }
  0x37   :  { %s4448_s9 = sld [smem:[%s4965_s0 + %s4268_s28]]   ;;  %s4272_s28 = smov 33  }
  0x38   :  { %s4458_s19 = sld [smem:[%s4965_s0 + %s4270_s15]]   ;;  %s4274_s15 = smov 35  }
  0x39   :  { %s4468_s8 = sld [smem:[%s4965_s0 + %s4272_s28]]  }
  0x3a   :  { %s4478_s3 = sld [smem:[%s4965_s0 + %s4274_s15]]  }
  0x3b   :  { %76 = vsyncpa [#allocation3], 0 }
  0x3c   :  { %77 = vsyncpa [#allocation5], 0 }
  0x3d   :  { %78 = vsyncpa [#allocation8], 0 }
  0x3e   :  { %79 = vsyncpa [#allocation11], 0 }
  0x3f   :  { %80 = vsyncpa [#allocation14], 0 }
  0x40   :  { %81 = vsyncpa [#allocation17], 0 }
  0x41   :  { %82 = vsyncpa [#allocation20], 0 }
  0x42   :  { %83 = vsyncpa [#allocation23], 0  ;;  %s4480_s22 = smov 0  }
  0x43 LB: > { %s5013_s4 = sld [smem:[#allocation51_spill]]  ;;  %s4486_s0 = sadd.s32 4294967295, %s4238_s22   ;;  %s4238_s22 = sphi %s4480_s22, %s89_s22  }
  0x44   : > { %s5014_s27 = sld [smem:[#allocation46_spill]]  ;;  %p3155_p0 = scmp.ge.s32.totalorder %s4238_s22, 1 }
  0x45   : > { %s5015_s20 = sld [smem:[#allocation49_spill]]  ;;  %p875_p1 = scmp.lt.s32.totalorder %s4238_s22, 3 }
  0x46   : > { %5016 = sst [smem:[#allocation54_spill]] %s4238_s22  ;;  %p3606_p2 = scmp.eq.s32.totalorder %s4486_s0, 0 }
  0x47   : > { %p4492_p3 = pnand %p3155_p0, %p875_p1  ;;  %s4275_s1 = smov [#allocation4]  }
  0x48   : > { %s935_s2 = sshll.u32 %s4275_s1, 4  ;;  %s4276_s10 = smov [#allocation7]   ;;  %s936_s2 = int_to_ptr.vmem [resolvable:$true] %s935_s2 }
  0x49   : > { %p3563_p4 = pneg %p4492_p3  ;;  %s4509_s11 = sshll.u32 %s4276_s10, 4 }
  0x4a   : > { %s933_s23 = sshll.u32 %s5014_s27, 4  ;;  %5019 = sst [smem:[#allocation55_spill]] %s4509_s11  ;;  %s4496_s23 = int_to_ptr.hbm [resolvable:$true] %s933_s23 }
  0x4b   : > { %s967_s28 = sshll.u32 %s5015_s20, 4  ;;  %p4505_p5 = pnand %p3606_p2, %p3563_p4  ;;  %s4501_s28 = int_to_ptr.hbm [resolvable:$true] %s967_s28 }
  0x4c   : > { %s3780_s16 = sshra.s32 %s4496_s23, 4  ;;  %s3787_s22 = scalar_lea.hbm %s5014_s27, 2  ;;  %s3781_s16 = int_to_ptr.hbm [resolvable:$true] %s3780_s16 }
  0x4d   : > { %s3782_s18 = scalar_lea.hbm %s3781_s16, 2  ;;  %p4516_p7 = pneg %p4505_p5 }
  0x4e   : > { %p3783_p6 = scmp.ne.s32.totalorder %s3781_s16, %s3782_s18  ;;  %p3788_p10 = scmp.lt.s32.totalorder %s3781_s16, %s5014_s27 }
  0x4f   : > { %p3789_p11 = scmp.lt.s32.totalorder %s3787_s22, %s3782_s18 }
  0x50   : > { %p3785_p8 = pnand %p4516_p7, %p3783_p6 }
  0x51   : > { %p3790_p12 = por %p3789_p11, %p3788_p10 }
  0x52   : > { %p3786_p9 = pneg %p3785_p8 }
  0x54   : > { %p3791_p13 = pnand %p3790_p12, %p3786_p9 }
  0x56   : > { %3794 = shalt.err (!%p3791_p13)
}
  0x57   : > { %s4277_s10 = smov 16   ;;  %s4278_s15 = smov 1  }
  0x58   : > { %3569 = dma.hbm_to_vmem [thread:$0]  (!%p4505_p5), %s4496_s23, 32, %s936_s2, [#allocation5], %s4277_s10, %s4277_s10, %s4278_s15  }
  0x59   : > { %s3810_s11 = sshra.s32 %s4501_s28, 4  ;;  %s3817_s22 = scalar_lea.hbm %s5015_s20, 2  ;;  %s3811_s11 = int_to_ptr.hbm [resolvable:$true] %s3810_s11 }
  0x5a   : > { %s3812_s16 = scalar_lea.hbm %s3811_s11, 2  ;;  %p3818_p6 = scmp.lt.s32.totalorder %s3811_s11, %s5015_s20 }
  0x5b   : > { %p3813_p0 = scmp.ne.s32.totalorder %s3811_s11, %s3812_s16  ;;  %p3819_p8 = scmp.lt.s32.totalorder %s3817_s22, %s3812_s16 }
  0x5d   : > { %p3815_p1 = pnand %p3813_p0, %p4516_p7  ;;  %p3820_p9 = por %p3819_p8, %p3818_p6 }
  0x5f   : > { %p3816_p4 = pneg %p3815_p1 }
  0x61   : > { %p3821_p10 = pnand %p3820_p9, %p3816_p4 }
  0x63   : > { %3824 = shalt.err (!%p3821_p10)
}
  0x64   : > { %s5021_s18 = sld [smem:[#allocation55_spill]]  ;;  %s5023_s2 = sshll.u32 %s4418_s6, 4  ;;  %s999_s2 = int_to_ptr.hbm [resolvable:$true] %s5023_s2 }
  0x65   : > { %s4279_s11 = smov [#allocation10]   ;;  %s1029_s22 = sshll.u32 %s4433_s24, 4  ;;  %s4546_s22 = int_to_ptr.hbm [resolvable:$true] %s1029_s22 }
  0x66   : > { %s1000_s16 = sshll.u32 %s4279_s11, 4  ;;  %s3840_s20 = sshra.s32 %s999_s2, 4  ;;  %s1001_s16 = int_to_ptr.vmem [resolvable:$true] %s1000_s16  ;;  %s3841_s20 = int_to_ptr.hbm [resolvable:$true] %s3840_s20 }
  0x67   : > { %s3842_s27 = scalar_lea.hbm %s3841_s20, 2  ;;  %p3848_p0 = scmp.lt.s32.totalorder %s3841_s20, %s4418_s6 }
  0x68   : > { %p3843_p11 = scmp.ne.s32.totalorder %s3841_s20, %s3842_s27 }
  0x6a   : > { %s5022_s23 = int_to_ptr.vmem [resolvable:$true] %s5021_s18  ;;  %p3845_p12 = pnand %p3843_p11, %p4516_p7 }
  0x6b   : > { %3575 = dma.hbm_to_vmem [thread:$0]  (!%p4505_p5), %s4501_s28, 32, %s5022_s23, [#allocation8], %s4277_s10, %s4277_s10, %s4278_s15  }
  0x6c   : > { %p3846_p13 = pneg %p3845_p12  ;;  %s3847_s18 = scalar_lea.hbm %s4418_s6, 2 }
  0x6d   : > { %p3849_p1 = scmp.lt.s32.totalorder %s3847_s18, %s3842_s27 }
  0x6f   : > { %p3850_p4 = por %p3849_p1, %p3848_p0 }
  0x71   : > { %p3851_p6 = pnand %p3850_p4, %p3846_p13 }
  0x73   : > { %3854 = shalt.err (!%p3851_p6)
}
  0x74   : > { %3581 = dma.hbm_to_vmem [thread:$0]  (!%p4505_p5), %s999_s2, 32, %s1001_s16, [#allocation11], %s4277_s10, %s4277_s10, %s4278_s15  }
  0x75   : > { %s1060_s28 = sshll.u32 %s4448_s9, 4  ;;  %s4280_s23 = smov [#allocation13]   ;;  %s4558_s28 = int_to_ptr.hbm [resolvable:$true] %s1060_s28 }
  0x76   : > { %s1031_s11 = sshll.u32 %s4280_s23, 4  ;;  %s3870_s20 = sshra.s32 %s4546_s22, 4  ;;  %s1032_s11 = int_to_ptr.vmem [resolvable:$true] %s1031_s11  ;;  %s3871_s20 = int_to_ptr.hbm [resolvable:$true] %s3870_s20 }
  0x77   : > { %s3872_s27 = scalar_lea.hbm %s3871_s20, 2  ;;  %s3877_s18 = scalar_lea.hbm %s4433_s24, 2 }
  0x78   : > { %p3873_p8 = scmp.ne.s32.totalorder %s3871_s20, %s3872_s27  ;;  %p3878_p11 = scmp.lt.s32.totalorder %s3871_s20, %s4433_s24 }
  0x79   : > { %p3879_p12 = scmp.lt.s32.totalorder %s3877_s18, %s3872_s27 }
  0x7a   : > { %p3875_p9 = pnand %p3873_p8, %p4516_p7 }
  0x7b   : > { %p3880_p13 = por %p3879_p12, %p3878_p11 }
  0x7c   : > { %p3876_p10 = pneg %p3875_p9 }
  0x7e   : > { %p3881_p0 = pnand %p3880_p13, %p3876_p10 }
  0x80   : > { %3884 = shalt.err (!%p3881_p0)
}
  0x81   : > { %3587 = dma.hbm_to_vmem [thread:$0]  (!%p4505_p5), %s4546_s22, 32, %s1032_s11, [#allocation14], %s4277_s10, %s4277_s10, %s4278_s15  }
  0x82   : > { %s4281_s2 = smov [#allocation16]   ;;  %s1089_s23 = sshll.u32 %s4458_s19, 4  ;;  %s4572_s23 = int_to_ptr.hbm [resolvable:$true] %s1089_s23 }
  0x83   : > { %s1062_s16 = sshll.u32 %s4281_s2, 4  ;;  %s3900_s20 = sshra.s32 %s4558_s28, 4  ;;  %s1063_s16 = int_to_ptr.vmem [resolvable:$true] %s1062_s16  ;;  %s3901_s20 = int_to_ptr.hbm [resolvable:$true] %s3900_s20 }
  0x84   : > { %s3902_s27 = scalar_lea.hbm %s3901_s20, 2  ;;  %s3907_s18 = scalar_lea.hbm %s4448_s9, 2 }
  0x85   : > { %p3903_p1 = scmp.ne.s32.totalorder %s3901_s20, %s3902_s27  ;;  %p3908_p8 = scmp.lt.s32.totalorder %s3901_s20, %s4448_s9 }
  0x86   : > { %p3909_p9 = scmp.lt.s32.totalorder %s3907_s18, %s3902_s27 }
  0x87   : > { %p3905_p4 = pnand %p3903_p1, %p4516_p7 }
  0x88   : > { %p3910_p10 = por %p3909_p9, %p3908_p8 }
  0x89   : > { %p3906_p6 = pneg %p3905_p4 }
  0x8b   : > { %p3911_p11 = pnand %p3910_p10, %p3906_p6 }
  0x8d   : > { %3914 = shalt.err (!%p3911_p11)
}
  0x8e   : > { %3593 = dma.hbm_to_vmem [thread:$0]  (!%p4505_p5), %s4558_s28, 32, %s1063_s16, [#allocation17], %s4277_s10, %s4277_s10, %s4278_s15  }
  0x8f   : > { %s916_s22 = sshll.u32 %s4373_s12, 4  ;;  %s4282_s11 = smov [#allocation19]   ;;  %s4586_s22 = int_to_ptr.hbm [resolvable:$true] %s916_s22 }
  0x90   : > { %s1091_s2 = sshll.u32 %s4282_s11, 4  ;;  %s3930_s20 = sshra.s32 %s4572_s23, 4  ;;  %s1092_s2 = int_to_ptr.vmem [resolvable:$true] %s1091_s2  ;;  %s3931_s20 = int_to_ptr.hbm [resolvable:$true] %s3930_s20 }
  0x91   : > { %s3932_s27 = scalar_lea.hbm %s3931_s20, 1  ;;  %s3937_s18 = scalar_lea.hbm %s4458_s19, 1 }
  0x92   : > { %p3933_p12 = scmp.ne.s32.totalorder %s3931_s20, %s3932_s27  ;;  %p3938_p1 = scmp.lt.s32.totalorder %s3931_s20, %s4458_s19 }
  0x93   : > { %p3939_p4 = scmp.lt.s32.totalorder %s3937_s18, %s3932_s27 }
  0x94   : > { %p3935_p13 = pnand %p3933_p12, %p4516_p7 }
  0x95   : > { %p3940_p6 = por %p3939_p4, %p3938_p1 }
  0x96   : > { %p3936_p0 = pneg %p3935_p13 }
  0x98   : > { %p3941_p8 = pnand %p3940_p6, %p3936_p0 }
  0x9a   : > { %3944 = shalt.err (!%p3941_p8)
}
  0x9b   : > { %3599 = dma.hbm_to_vmem [thread:$0]  (!%p4505_p5), %s4572_s23, 16, %s1092_s2, [#allocation20]  }
  0x9c   : > { %s4283_s28 = smov [#allocation2]   ;;  %s950_s11 = sshll.u32 %s4393_s21, 4  ;;  %s4597_s11 = int_to_ptr.hbm [resolvable:$true] %s950_s11 }
  0x9d   : > { %s918_s16 = sshll.u32 %s4283_s28, 4  ;;  %s3960_s20 = sshra.s32 %s4586_s22, 4  ;;  %s919_s16 = int_to_ptr.vmem [resolvable:$true] %s918_s16  ;;  %s3961_s20 = int_to_ptr.hbm [resolvable:$true] %s3960_s20 }
  0x9e   : > { %s3962_s27 = scalar_lea.hbm %s3961_s20, 2  ;;  %s3967_s18 = scalar_lea.hbm %s4373_s12, 2 }
  0x9f   : > { %p3963_p9 = scmp.ne.s32.totalorder %s3961_s20, %s3962_s27  ;;  %p3968_p12 = scmp.lt.s32.totalorder %s3961_s20, %s4373_s12 }
  0xa0   : > { %p3969_p13 = scmp.lt.s32.totalorder %s3967_s18, %s3962_s27 }
  0xa1   : > { %p3965_p10 = pnand %p3963_p9, %p4516_p7 }
  0xa2   : > { %p3970_p0 = por %p3969_p13, %p3968_p12 }
  0xa3   : > { %p3966_p11 = pneg %p3965_p10 }
  0xa5   : > { %p3971_p1 = pnand %p3970_p0, %p3966_p11 }
  0xa7   : > { %3974 = shalt.err (!%p3971_p1)
}
  0xa8   : > { %3566 = dma.hbm_to_vmem [thread:$0]  (!%p4505_p5), %s4586_s22, 32, %s919_s16, [#allocation3], %s4277_s10, %s4277_s10, %s4278_s15  }
  0xa9   : > { %s984_s23 = sshll.u32 %s5013_s4, 4  ;;  %s4284_s2 = smov [#allocation6]   ;;  %s4611_s23 = int_to_ptr.hbm [resolvable:$true] %s984_s23 }
  0xaa   : > { %s952_s28 = sshll.u32 %s4284_s2, 4  ;;  %s3990_s20 = sshra.s32 %s4597_s11, 4  ;;  %s953_s28 = int_to_ptr.vmem [resolvable:$true] %s952_s28  ;;  %s3991_s20 = int_to_ptr.hbm [resolvable:$true] %s3990_s20 }
  0xab   : > { %s3992_s27 = scalar_lea.hbm %s3991_s20, 2  ;;  %s3997_s18 = scalar_lea.hbm %s4393_s21, 2 }
  0xac   : > { %p3993_p4 = scmp.ne.s32.totalorder %s3991_s20, %s3992_s27  ;;  %p3998_p9 = scmp.lt.s32.totalorder %s3991_s20, %s4393_s21 }
  0xad   : > { %p3999_p10 = scmp.lt.s32.totalorder %s3997_s18, %s3992_s27 }
  0xae   : > { %p3995_p6 = pnand %p3993_p4, %p4516_p7 }
  0xaf   : > { %p4000_p11 = por %p3999_p10, %p3998_p9 }
  0xb0   : > { %p3996_p8 = pneg %p3995_p6 }
  0xb2   : > { %p4001_p12 = pnand %p4000_p11, %p3996_p8 }
  0xb4   : > { %4004 = shalt.err (!%p4001_p12)
}
  0xb5   : > { %3572 = dma.hbm_to_vmem [thread:$0]  (!%p4505_p5), %s4597_s11, 32, %s953_s28, [#allocation5], %s4277_s10, %s4277_s10, %s4278_s15  }
  0xb6   : > { %s4285_s22 = smov [#allocation9]   ;;  %s1012_s2 = sshll.u32 %s4423_s30, 4  ;;  %s4625_s2 = int_to_ptr.hbm [resolvable:$true] %s1012_s2 }
  0xb7   : > { %s986_s16 = sshll.u32 %s4285_s22, 4  ;;  %s4020_s20 = sshra.s32 %s4611_s23, 4  ;;  %s987_s16 = int_to_ptr.vmem [resolvable:$true] %s986_s16  ;;  %s4021_s20 = int_to_ptr.hbm [resolvable:$true] %s4020_s20 }
  0xb8   : > { %s4022_s27 = scalar_lea.hbm %s4021_s20, 2  ;;  %s4027_s18 = scalar_lea.hbm %s5013_s4, 2 }
  0xb9   : > { %p4023_p13 = scmp.ne.s32.totalorder %s4021_s20, %s4022_s27  ;;  %p4028_p4 = scmp.lt.s32.totalorder %s4021_s20, %s5013_s4 }
  0xba   : > { %p4029_p6 = scmp.lt.s32.totalorder %s4027_s18, %s4022_s27 }
  0xbb   : > { %p4025_p0 = pnand %p4023_p13, %p4516_p7 }
  0xbc   : > { %p4030_p8 = por %p4029_p6, %p4028_p4 }
  0xbd   : > { %p4026_p1 = pneg %p4025_p0 }
  0xbf   : > { %p4031_p9 = pnand %p4030_p8, %p4026_p1 }
  0xc1   : > { %4034 = shalt.err (!%p4031_p9)
}
  0xc2   : > { %3578 = dma.hbm_to_vmem [thread:$0]  (!%p4505_p5), %s4611_s23, 32, %s987_s16, [#allocation8], %s4277_s10, %s4277_s10, %s4278_s15  }
  0xc3   : > { %s1046_s11 = sshll.u32 %s4443_s13, 4  ;;  %s4286_s28 = smov [#allocation12]   ;;  %s4639_s11 = int_to_ptr.hbm [resolvable:$true] %s1046_s11 }
  0xc4   : > { %s1014_s22 = sshll.u32 %s4286_s28, 4  ;;  %s4050_s20 = sshra.s32 %s4625_s2, 4  ;;  %s1015_s22 = int_to_ptr.vmem [resolvable:$true] %s1014_s22  ;;  %s4051_s20 = int_to_ptr.hbm [resolvable:$true] %s4050_s20 }
  0xc5   : > { %s4052_s27 = scalar_lea.hbm %s4051_s20, 2  ;;  %s4057_s18 = scalar_lea.hbm %s4423_s30, 2 }
  0xc6   : > { %p4053_p10 = scmp.ne.s32.totalorder %s4051_s20, %s4052_s27  ;;  %p4058_p13 = scmp.lt.s32.totalorder %s4051_s20, %s4423_s30 }
  0xc7   : > { %p4059_p0 = scmp.lt.s32.totalorder %s4057_s18, %s4052_s27 }
  0xc8   : > { %p4055_p11 = pnand %p4053_p10, %p4516_p7 }
  0xc9   : > { %p4060_p1 = por %p4059_p0, %p4058_p13 }
  0xca   : > { %p4056_p12 = pneg %p4055_p11 }
  0xcc   : > { %p4061_p4 = pnand %p4060_p1, %p4056_p12 }
  0xce   : > { %4064 = shalt.err (!%p4061_p4)
}
  0xcf   : > { %3584 = dma.hbm_to_vmem [thread:$0]  (!%p4505_p5), %s4625_s2, 32, %s1015_s22, [#allocation11], %s4277_s10, %s4277_s10, %s4278_s15  }
  0xd0   : > { %s4287_s23 = smov [#allocation15]   ;;  %s1074_s28 = sshll.u32 %s4453_s17, 4  ;;  %s4653_s28 = int_to_ptr.hbm [resolvable:$true] %s1074_s28 }
  0xd1   : > { %s1048_s16 = sshll.u32 %s4287_s23, 4  ;;  %s4080_s20 = sshra.s32 %s4639_s11, 4  ;;  %s1049_s16 = int_to_ptr.vmem [resolvable:$true] %s1048_s16  ;;  %s4081_s20 = int_to_ptr.hbm [resolvable:$true] %s4080_s20 }
  0xd2   : > { %s4082_s27 = scalar_lea.hbm %s4081_s20, 2  ;;  %s4087_s18 = scalar_lea.hbm %s4443_s13, 2 }
  0xd3   : > { %p4083_p6 = scmp.ne.s32.totalorder %s4081_s20, %s4082_s27  ;;  %p4088_p10 = scmp.lt.s32.totalorder %s4081_s20, %s4443_s13 }
  0xd4   : > { %p4089_p11 = scmp.lt.s32.totalorder %s4087_s18, %s4082_s27 }
  0xd5   : > { %p4085_p8 = pnand %p4083_p6, %p4516_p7 }
  0xd6   : > { %p4090_p12 = por %p4089_p11, %p4088_p10 }
  0xd7   : > { %p4086_p9 = pneg %p4085_p8 }
  0xd9   : > { %p4091_p13 = pnand %p4090_p12, %p4086_p9 }
  0xdb   : > { %4094 = shalt.err (!%p4091_p13)
}
  0xdc   : > { %3590 = dma.hbm_to_vmem [thread:$0]  (!%p4505_p5), %s4639_s11, 32, %s1049_s16, [#allocation14], %s4277_s10, %s4277_s10, %s4278_s15  }
  0xdd   : > { %s1101_s2 = sshll.u32 %s4463_s14, 4  ;;  %s4288_s22 = smov [#allocation18]   ;;  %s4667_s2 = int_to_ptr.hbm [resolvable:$true] %s1101_s2 }
  0xde   : > { %s1076_s23 = sshll.u32 %s4288_s22, 4  ;;  %s4110_s20 = sshra.s32 %s4653_s28, 4  ;;  %s1077_s23 = int_to_ptr.vmem [resolvable:$true] %s1076_s23  ;;  %s4111_s20 = int_to_ptr.hbm [resolvable:$true] %s4110_s20 }
  0xdf   : > { %s4112_s27 = scalar_lea.hbm %s4111_s20, 2  ;;  %s4117_s18 = scalar_lea.hbm %s4453_s17, 2 }
  0xe0   : > { %p4113_p0 = scmp.ne.s32.totalorder %s4111_s20, %s4112_s27  ;;  %p4118_p6 = scmp.lt.s32.totalorder %s4111_s20, %s4453_s17 }
  0xe1   : > { %p4119_p8 = scmp.lt.s32.totalorder %s4117_s18, %s4112_s27 }
  0xe2   : > { %p4115_p1 = pnand %p4113_p0, %p4516_p7 }
  0xe3   : > { %p4120_p9 = por %p4119_p8, %p4118_p6 }
  0xe4   : > { %p4116_p4 = pneg %p4115_p1 }
  0xe6   : > { %p4121_p10 = pnand %p4120_p9, %p4116_p4 }
  0xe8   : > { %4124 = shalt.err (!%p4121_p10)
}
  0xe9   : > { %3596 = dma.hbm_to_vmem [thread:$0]  (!%p4505_p5), %s4653_s28, 32, %s1077_s23, [#allocation17], %s4277_s10, %s4277_s10, %s4278_s15  }
  0xea   : > { %s4289_s11 = smov [#allocation21]   ;;  %s1116_s22 = sshll.u32 %s4473_s29, 4  ;;  %s1117_s22 = int_to_ptr.hbm [resolvable:$true] %s1116_s22 }
  0xeb   : > { %s1103_s16 = sshll.u32 %s4289_s11, 4  ;;  %s4140_s20 = sshra.s32 %s4667_s2, 4  ;;  %s1104_s16 = int_to_ptr.vmem [resolvable:$true] %s1103_s16  ;;  %s4141_s20 = int_to_ptr.hbm [resolvable:$true] %s4140_s20 }
  0xec   : > { %s4142_s27 = scalar_lea.hbm %s4141_s20, 1  ;;  %s4147_s18 = scalar_lea.hbm %s4463_s14, 1 }
  0xed   : > { %p4143_p11 = scmp.ne.s32.totalorder %s4141_s20, %s4142_s27  ;;  %p4148_p0 = scmp.lt.s32.totalorder %s4141_s20, %s4463_s14 }
  0xee   : > { %p4149_p1 = scmp.lt.s32.totalorder %s4147_s18, %s4142_s27 }
  0xef   : > { %p4145_p12 = pnand %p4143_p11, %p4516_p7 }
  0xf0   : > { %p4150_p4 = por %p4149_p1, %p4148_p0 }
  0xf1   : > { %p4146_p13 = pneg %p4145_p12 }
  0xf3   : > { %p4151_p6 = pnand %p4150_p4, %p4146_p13 }
  0xf5   : > { %4154 = shalt.err (!%p4151_p6)
}
  0xf6   : > { %3602 = dma.hbm_to_vmem [thread:$0]  (!%p4505_p5), %s4667_s2, 16, %s1104_s16, [#allocation20]  }
  0xf7   : > { %s4290_s15 = smov [#allocation22]   ;;  %s4170_s28 = sshra.s32 %s1117_s22, 4  ;;  %s4171_s28 = int_to_ptr.hbm [resolvable:$true] %s4170_s28 }
  0xf8   : > { %s1118_s10 = sshll.u32 %s4290_s15, 4  ;;  %s4172_s23 = scalar_lea.hbm %s4171_s28, 1  ;;  %s1119_s10 = int_to_ptr.vmem [resolvable:$true] %s1118_s10 }
  0xf9   : > { %p4173_p8 = scmp.ne.s32.totalorder %s4171_s28, %s4172_s23  ;;  %s4177_s11 = scalar_lea.hbm %s4473_s29, 1 }
  0xfa   : > { %p4178_p11 = scmp.lt.s32.totalorder %s4171_s28, %s4473_s29  ;;  %p4179_p12 = scmp.lt.s32.totalorder %s4177_s11, %s4172_s23 }
  0xfb   : > { %p4175_p9 = pnand %p4173_p8, %p4516_p7 }
  0xfc   : > { %p4180_p13 = por %p4179_p12, %p4178_p11 }
  0xfd   : > { %p4176_p10 = pneg %p4175_p9 }
  0xff   : > { %p4181_p0 = pnand %p4180_p13, %p4176_p10 }
 0x101   : > { %4184 = shalt.err (!%p4181_p0)
}
 0x102   : > { %3605 = dma.hbm_to_vmem [thread:$0]  (!%p4505_p5), %s1117_s22, 16, %s1119_s10, [#allocation23]  }
 0x103   : > { %1157 = sbr.rel (%p4492_p3) target bundleno = 6898 (0x1af2), region = 160 }
 0x108   : > { %4205 = dma.done.wait (%p3606_p2), [#allocation3], 32  }
 0x109   : > { %4207 = vsyncadd (%p3606_p2), [#allocation3], 4294967264 }
 0x10a   : > { %4209 = dma.done.wait (%p3606_p2), [#allocation5], 64  }
 0x10b   : > { %4211 = vsyncadd (%p3606_p2), [#allocation5], 4294967232 }
 0x10c   : > { %4213 = dma.done.wait (%p3606_p2), [#allocation8], 64  }
 0x10d   : > { %4215 = vsyncadd (%p3606_p2), [#allocation8], 4294967232 }
 0x10e   : > { %4217 = dma.done.wait (%p3606_p2), [#allocation11], 64  }
 0x10f   : > { %4219 = vsyncadd (%p3606_p2), [#allocation11], 4294967232 }
 0x110   : > { %4221 = dma.done.wait (%p3606_p2), [#allocation14], 64  }
 0x111   : > { %4223 = vsyncadd (%p3606_p2), [#allocation14], 4294967232 }
 0x112   : > { %4225 = dma.done.wait (%p3606_p2), [#allocation17], 64  }
 0x113   : > { %4227 = vsyncadd (%p3606_p2), [#allocation17], 4294967232 }
 0x114   : > { %4229 = dma.done.wait (%p3606_p2), [#allocation20], 32  }
 0x115   : > { %4231 = vsyncadd (%p3606_p2), [#allocation20], 4294967264 }
 0x116   : > { %4233 = dma.done.wait (%p3606_p2), [#allocation23], 16  }
 0x117   : > { %4235 = vsyncadd (%p3606_p2), [#allocation23], 4294967280  ;;  %s5024_s5 = sld [smem:[#allocation32_spill]]  ;;  %p1319_p3 = scmp.lt.s32.totalorder %s4486_s0, 1  ;;  %v3462_v0 = vld [vmem:[%s4328_s25 + $0x8] sm:$0xff]  ;;  %v3461_v2 = vld [vmem:[%s4328_s25] sm:$0xff] }
 0x118   : > { %s5025_s26 = sld [smem:[#allocation38_spill]]  ;;  %1399 = vmatpush.bf16.msra.mxu0 %v3462_v0  ;;  %vm1389_vm0 = vcmask 261120   ;;  %vm1465_vm1 = vcmask 130048   ;;  %s4987_s18 = smov 112   ;;  %v4292_v30 = vmov 0.0   ;;  %vm1485_vm3 = vcmask 64512  }
 0x119   : > { %s5052_s0 = smov (!%p1319_p3, %s4486_s0), 1  ;;  %s5026_s7 = sld [smem:[#allocation37_spill]]  ;;  %vm1501_vm4 = vcmask 1043456   ;;  %vm2037_vm13 = vcmask 523264  }
 0x11a   : > { %s4984_s1 = sshll.u32 %s5052_s0, 3  ;;  %s5027_s2 = sld [smem:[#allocation39_spill]] }
 0x11b   : > { %s5028_s22 = sld [smem:[#allocation40_spill]] }
 0x11c   : > { %1400 = vmatpush.bf16.msra.mxu0 %v3461_v2  ;;  %s5030_s27 = sld [smem:[#allocation35_spill]] }
 0x11d   : > { %s1322_s16 = scalar_lea.vmem %s5024_s5, %s4984_s1  ;;  %s5031_s15 = sld [smem:[#allocation34_spill]] }
 0x11e   : > { %v3464_v1 = vld [vmem:[%s5025_s26 + $0x8] sm:$0xff]  ;;  %v3463_v3 = vld [vmem:[%s5025_s26] sm:$0xff]  ;;  %s5032_s28 = sld [smem:[#allocation41_spill]] }
 0x11f   : > { %1427 = vmatpush.bf16.msra.mxu1 %v3464_v1  ;;  %v4741_v4 = vld [vmem:[%s1322_s16] sm:$0xff]  ;;  %s5033_s23 = sld [smem:[#allocation42_spill]]  ;;  %s4985_s16 = smov 16  }
 0x120   : > { %v1373_v5 = vpack.c.bf16 %v4741_v4, %v4741_v4  ;;  %v3697_v6 = vld [vmem:[%s5026_s7] ss:$0 sm:$0xff]  ;;  %s5034_s11 = sld [smem:[#allocation43_spill]] }
 0x121   : > { %v3698_v7 = vld [vmem:[%s5027_s2] ss:$0 sm:$0xff]  ;;  %s5029_s20 = smov %s5028_s22  ;;  %v3466_v26 = vld [vmem:[%s5028_s22 + $0x8] sm:$0xff]  ;;  %s5035_s22 = sld [smem:[#allocation47_spill]] }
 0x122   : > { %3197 = vmatmul.msk.bf16.vlgmr.msra.gmra.mxu0 %vm1389_vm0, %v1373_v5  ;;  %1455 = vmatpush.bf16.msra.mxu2 %v3466_v26  ;;  %s1329_s10 = scalar_lea.vmem %s5030_s27, %s5052_s0  ;;  %v3465_v27 = vld [vmem:[%s5029_s20] sm:$0xff]  ;;  %s5045_s4 = sld [smem:[#allocation52_spill]] }
 0x123   : > { %1428 = vmatpush.bf16.msra.mxu1 %v3463_v3  ;;  %v1342_v28 = vld [vmem:[%s1329_s10] sm:$0x1]  ;;  %s3187_s10 = sshll.u32 %s5052_s0, 2 }
 0x124   : > { %vm1343_vm2 = vcmp.gt.f32.partialorder %v1342_v28, 0.5  ;;  %v1340_v29 = vld [vmem:[%s5031_s15] sm:$0xff]  ;;  %s5037_s15 = sld [smem:[#allocation33_spill]] }
 0x125   : > { %v1344_v31 = vsel %vm1343_vm2, -1e+30, %v4292_v30  ;;  %v1341_v32 = vmax.f32 %v1340_v29, -1e+30  ;;  %v3699_v42 = vld [vmem:[%s5032_s28] ss:$0 sm:$0xff] }
 0x126   : > { %3206 = vmatmul.msk.bf16.vlgmr.msra.gmra.mxu1 %vm1389_vm0, %v1373_v5  ;;  %1456 = vmatpush.bf16.msra.mxu2 %v3465_v27  ;;  %v1346_v33 = vperm.slane %v1344_v31, 0 }
 0x127   : > { %s5036_s27 = smov %s5035_s22 }
 0x128   : > { %v1348_v34 = vadd.f32 %v1346_v33, %v1341_v32 }
 0x129   : > { %3215 = vmatmul.msk.bf16.vlgmr.msra.gmra.mxu2 %vm1389_vm0, %v1373_v5 }
 0x12a   : > { %v4762_v35 = vmax.f32 %v1348_v34, -1e+30  ;;  %s1326_s1 = scalar_lea.vmem %s5037_s15, %s3187_s10  ;;  %s5041_s15 = sld [smem:[#allocation48_spill]] }
 0x12b   : > { %v4788_v27 = vld [vmem:[%s1326_s1] sm:$0xf]  ;;  %s5039_s1 = sld [smem:[#allocation44_spill]] }
 0x19f   : > { %v1402_v8 = vpop.f32.mrf.mxu0 }
 0x1a0   : > { %v1403_v10 = vadd.f32 %v3697_v6, %v1402_v8 }
 0x1a2   : > { %v1462_v13 = vpack.c.bf16 %v1403_v10, %v1403_v10 }
 0x1a3   : > { %v1430_v9 = vpop.f32.mrf.mxu1 }
 0x1a4   : > { %v1431_v11 = vadd.f32 %v3698_v7, %v1430_v9  ;;  %v1519_v19 = vunpack.c.l.b16 %v1462_v13  ;;  %v3468_v7 = vld [vmem:[%s5033_s23 + $0x8] sm:$0xff] }
 0x1a6   : > { %v1463_v12 = vpack.c.bf16 %v1431_v11, %v1431_v11  ;;  %v1520_v20 = vpack.c.b16 %v1519_v19, %v1519_v19 }
 0x1a7   : > { %v1404_v17 = vpop.f32.mrf.mxu0 }
 0x1a8   : > { %v1470_v14 = vsel %vm1465_vm1, %v1463_v12, 0  ;;  %v1524_v15 = vunpack.c.l.b16 %v1463_v12  ;;  %v3467_v12 = vld [vmem:[%s5033_s23] sm:$0xff] }
 0x1a9   : > { %1479 = vmatpush.bf16.xpose.msra.mxu3 %v1470_v14 }
 0x1aa   : > { %v1525_v16 = vpack.c.b16 %v1524_v15, %v1524_v15 }
 0x1ab   : > { %v1432_v18 = vpop.f32.mrf.mxu1 }
 0x1ac   : > { %1526 = vrot.lane.b32.xlu0 %v1525_v16, %s4987_s18  ;;  %v1458_v43 = vpop.f32.mrf.mxu2  ;;  %v3700_v16 = vld [vmem:[%s5034_s11] ss:$0 sm:$0xff] }
 0x1ad   : > { %v1459_v44 = vadd.f32 %v3699_v42, %v1458_v43 }
 0x1af   : > { %v1464_v46 = vpack.c.bf16 %v1459_v44, %v1459_v44 }
 0x1b0   : > { %3216 = vmatmul.msk.bf16.vlgmr.msra.gmra.mxu3 %vm1465_vm1, %v1462_v13 }
 0x1b1   : > { %v1503_v48 = vsel %vm1501_vm4, %v1464_v46, 0  ;;  %v1560_v58 = vunpack.c.l.b16 %v1464_v46  ;;  %1613 = vmatpush.bf16.msrb.mxu3 %v3468_v7 }
 0x1b2   : > { %1512 = vmatpush.bf16.msrb.mxu0 %v1503_v48 }
 0x1b3   : > { %v1561_v59 = vpack.c.b16 %v1560_v58, %v1560_v58 }
 0x1b4   : > { %1521 = vrot.lane.b32.xlu0 %v1520_v20, %s4987_s18  ;;  %v1460_v50 = vpop.f32.mrf.mxu2 }
 0x1b5   : > { %1614 = vmatpush.bf16.msrb.mxu3 %v3467_v12 }
 0x21e   : > { %v1527_v21 = vpop.permute.xlu0 %1526 }
 0x21f   : > { %v1532_v22 = vsel %vm1465_vm1, %v1527_v21, 0 }
 0x220   : > { %1541 = vmatpush.bf16.xpose.msrb.mxu1 %v1532_v22  ;;  %v4294_v22 = vmov 32.0  }
 0x226   : > { %v1522_v23 = vpop.permute.xlu0 %1521 }
 0x227   : > { %3218 = vmatmul.msk.bf16.vlgmr.msrb.gmra.mxu1 %vm1465_vm1, %v1522_v23  ;;  %v3472_v23 = vld [vmem:[%s5035_s22 + $0x8] sm:$0xff]  ;;  %s5040_s22 = sld [smem:[#allocation36_spill]] }
 0x228   : > { %1736 = vmatpush.bf16.msra.mxu1 %v3472_v23  ;;  %v3705_v23 = vld [vmem:[#allocation7] ss:$0 sm:$0xff] }
 0x22d   : > { %s1332_s10 = scalar_lea.vmem %s5040_s22, %s5052_s0  ;;  %s5042_s22 = sld [smem:[#allocation50_spill]] }
 0x233   : > { %v1481_v24 = vpop.f32.mrf.mxu3 }
 0x234   : > { %v1482_v39 = vadd.f32 %v1481_v24, %v4762_v35  ;;  %v3471_v24 = vld [vmem:[%s5036_s27] sm:$0xff] }
 0x235   : > { %1737 = vmatpush.bf16.msra.mxu1 %v3471_v24 }
 0x236   : > { %v1486_v41 = vsel %vm1485_vm3, %v1482_v39, -inf }
 0x238   : > { %3246 = vmatmul.msk.bf16.vlgmr.msra.gmra.mxu1 %vm1389_vm0, %v4788_v27 }
 0x23b   : > { %v1483_v25 = vpop.f32.mrf.mxu3 }
 0x2a4   : > { %v1543_v36 = vpop.f32.mrf.mxu1 }
 0x2a5   : > { %v1544_v37 = vadd.f32 %v1543_v36, %v4762_v35 }
 0x2a7   : > { %v1547_v38 = vsel %vm1485_vm3, %v1544_v37, -inf }
 0x2a8   : > { %1548 = vmax.xlane.f32.xlu1 %v1547_v38 }
 0x2ac   : > { %v1545_v40 = vpop.f32.mrf.mxu1 }
 0x2ad   : > { %v3703_v40 = vld [vmem:[#allocation6] ss:$0 sm:$0xff] }
 0x2b0   : > { %1487 = vmax.xlane.f32.xlu1 %v1486_v41 }
 0x2b5   : > { %v1739_v41 = vpop.f32.mrf.mxu1 }
 0x2b6   : > { %v1740_v44 = vadd.f32 %v3703_v40, %v1739_v41 }
 0x2b8   : > { %v1772_v46 = vpack.c.bf16 %v1740_v44, %v1740_v44 }
 0x2ba   : > { %v1833_v48 = vunpack.c.l.b16 %v1772_v46 }
 0x2bd   : > { %v1741_v50 = vpop.f32.mrf.mxu1 }
 0x31b   : > { %v1549_v45 = vpop.xlane.xlu1 %1548 }
 0x31c   : > { %v1550_v47 = vsub.f32 %v1544_v37, %v1549_v45 }
 0x31e   : > { %v1551_v49 = vmul.f32 1.442695, %v1550_v47  ;;  %v1781_v47 = vsel %vm1465_vm1, %v1772_v46, 0 }
 0x31f   : > { %1790 = vmatpush.bf16.xpose.msra.mxu3 %v1781_v47 }
 0x320   : > { %3732 = vpow2.f32 %v1551_v49  ;;  %v1834_v49 = vpack.c.b16 %v1833_v48, %v1833_v48 }
 0x323   : > { %v1488_v51 = vpop.xlane.xlu1 %1487 }
 0x324   : > { %v1489_v52 = vsub.f32 %v1482_v39, %v1488_v51 }
 0x326   : > { %v3733_v53 = vpop.eup %3732  ;;  %v1490_v54 = vmul.f32 1.442695, %v1489_v52 }
 0x327   : > { %v1553_v55 = vsel %vm1485_vm3, %v3733_v53, 0.0 }
 0x328   : > { %3734 = vpow2.f32 %v1490_v54  ;;  %1554 = vadd.xlane.f32.xlu2 %v1553_v55 }
 0x32e   : > { %v3735_v56 = vpop.eup %3734 }
 0x32f   : > { %v1492_v57 = vsel %vm1485_vm3, %v3735_v56, 0.0 }
 0x330   : > { %1493 = vadd.xlane.f32.xlu0 %v1492_v57  ;;  %v3701_v57 = vld [vmem:[%s5039_s1] ss:$0 sm:$0xff] }
 0x340   : > { %1562 = vrot.lane.b32.xlu2 %v1561_v59, %s4987_s18  ;;  %v3702_v59 = vld [vmem:[#allocation2] ss:$0 sm:$0xff] }
 0x344   : > { %1835 = vrot.lane.b32.xlu0 %v1834_v49, %s4987_s18 }
 0x39b   : > { %v1555_v60 = vpop.xlane.xlu2 %1554 }
 0x39c   : > { %3736 = vrcp.f32 %v1555_v60 }
 0x3a2   : > { %v3737_v61 = vpop.eup %3736 }
 0x3a3   : > { %v1557_v62 = vmul.f32 %v3737_v61, %v3733_v53  ;;  %v1563_v63 = vpop.permute.xlu2 %1562  ;;  %v1494_v0 = vpop.xlane.xlu0 %1493 }
 0x3a4   : > { %3738 = vrcp.f32 %v1494_v0  ;;  %v1568_v1 = vsel %vm1501_vm4, %v1563_v63, 0 }
 0x3a5   : > { %1577 = vmatpush.bf16.msrb.mxu2 %v1568_v1  ;;  %v1558_v2 = vpack.c.bf16 %v1557_v62, %v1557_v62  ;;  %3740 = vrcp.f32 %v4294_v22 }
 0x3a8   : > { %3219 = vmatmul.msk.bf16.vlgmr.msrb.gmra.mxu2 %vm1485_vm3, %v1558_v2  ;;  %v3704_v2 = vld [vmem:[#allocation4] ss:$0 sm:$0xff] }
 0x3aa   : > { %v3739_v3 = vpop.eup %3738 }
 0x3ab   : > { %v1496_v5 = vmul.f32 %v3739_v3, %v3735_v56  ;;  %v3741_v25 = vpop.eup %3740 }
 0x3ac   : > { %v1627_v26 = vmul.f32 32.0, %v3741_v25  ;;  %vm1631_vm5 = vweird.f32 %v3741_v25 }
 0x3ad   : > { %v1497_v6 = vpack.c.bf16 %v1496_v5, %v1496_v5 }
 0x3af   : > { %3217 = vmatmul.msk.bf16.vlgmr.msrb.gmra.mxu0 %vm1485_vm3, %v1497_v6 }
 0x3b6   : > { %v1836_v0 = vpop.permute.xlu0 %1835 }
 0x3b7   : > { %v1841_v1 = vsel %vm1465_vm1, %v1836_v0, 0  ;;  %v3706_v0 = vld [vmem:[#allocation9] ss:$0 sm:$0xff] }
 0x3b8   : > { %1850 = vmatpush.bf16.xpose.msrb.mxu1 %v1841_v1 }
 0x42b   : > { %v1579_v8 = vpop.f32.mrf.mxu2 }
 0x42c   : > { %1584 = vrot.lane.b32.xlu1 %v1579_v8, %s4985_s16  ;;  %v1514_v9 = vpop.f32.mrf.mxu0  ;;  %s5038_s16 = sld [smem:[#allocation45_spill]] }
 0x432   : > { %v3470_v38 = vld [vmem:[%s5038_s16 + $0x8] sm:$0xff]  ;;  %v3469_v39 = vld [vmem:[%s5038_s16] sm:$0xff] }
 0x433   : > { %v1581_v10 = vpop.f32.mrf.mxu2  ;;  %1705 = vmatpush.bf16.msra.mxu0 %v3470_v38 }
 0x434   : > { %v1516_v11 = vpop.f32.mrf.mxu0 }
 0x435   : > { %v1350_v11 = vld [vmem:[%s1332_s10] sm:$0x1]  ;;  %s5043_s10 = smov %s5042_s22 }
 0x436   : > { %vm1351_vm9 = vcmp.gt.f32.partialorder %v1350_v11, 0.5 }
 0x437   : > { %1706 = vmatpush.bf16.msra.mxu0 %v3469_v39  ;;  %v1352_v12 = vsel %vm1351_vm9, -1e+30, %v4292_v30 }
 0x49e   : > { %v1585_v13 = vpop.permute.xlu1 %1584 }
 0x49f   : > { %v1587_v14 = vsel %vm1465_vm1, %v1514_v9, %v1585_v13  ;;  %v4814_v13 = vperm.slane %v1352_v12, 0  ;;  %v3478_v12 = vld [vmem:[%s5045_s4 + $0x8] sm:$0xff] }
 0x4a0   : > { %v1588_v15 = vpack.c.bf16 %v1587_v14, %v1587_v14 }
 0x4a2   : > { %3228 = vmatmul.msk.bf16.vlgmr.msrb.gmra.mxu3 %vm1389_vm0, %v1588_v15 }
 0x525   : > { %v1616_v17 = vpop.f32.mrf.mxu3 }
 0x526   : > { %v1617_v18 = vadd.f32 %v3700_v16, %v1616_v17 }
 0x528   : > { %v1620_v19 = vadd.f32 %v1617_v18, %v4741_v4  ;;  %v1628_v4 = vsub.f32 1.0, %v1627_v26  ;;  %v3474_v18 = vld [vmem:[%s5041_s15 + $0x8] sm:$0xff] }
 0x529   : > { %1764 = vmatpush.bf16.msra.mxu2 %v3474_v18 }
 0x52a   : > { %v1623_v20 = vsel %vm1389_vm0, %v1620_v19, 0.0  ;;  %v1629_v28 = vmul.f32 %v3741_v25, %v1628_v4 }
 0x52b   : > { %1624 = vadd.xlane.f32.xlu2 %v1623_v20 }
 0x52c   : > { %v1630_v29 = vadd.f32 %v3741_v25, %v1629_v28 }
 0x52d   : > { %v1618_v21 = vpop.f32.mrf.mxu3 }
 0x52e   : > { %v4792_v31 = vsel %vm1631_vm5, %v3741_v25, %v1630_v29 }
 0x59e   : > { %v1625_v32 = vpop.xlane.xlu2 %1624 }
 0x59f   : > { %v1633_v33 = vmul.f32 %v4792_v31, %v1625_v32 }
 0x5a1   : > { %v1634_v34 = vsub.f32 %v1620_v19, %v1633_v33  ;;  %v3473_v19 = vld [vmem:[%s5041_s15] sm:$0xff] }
 0x5a2   : > { %1765 = vmatpush.bf16.msra.mxu2 %v3473_v19 }
 0x5a3   : > { %v1635_v36 = vmul.f32 %v1634_v34, %v1634_v34 }
 0x5a5   : > { %v1636_v37 = vsel %vm1389_vm0, %v1635_v36, 0.0  ;;  %3255 = vmatmul.msk.bf16.vlgmr.msra.gmra.mxu2 %vm1389_vm0, %v4788_v27 }
 0x5a6   : > { %1637 = vadd.xlane.f32.xlu1 %v1636_v37 }
 0x619   : > { %v1638_v42 = vpop.xlane.xlu1 %1637 }
 0x61a   : > { %v1639_v43 = vmul.f32 %v1638_v42, %v4792_v31 }
 0x61c   : > { %v1640_v45 = vadd.f32 1e-05, %v1639_v43 }
 0x61e   : > { %3742 = vrsqrt.f32 %v1640_v45  ;;  %vm1647_vm7 = vweird.f32 %v1640_v45 }
 0x624   : > { %v3743_v51 = vpop.eup %3742 }
 0x625   : > { %v1642_v52 = vmul.f32 %v3743_v51, %v1640_v45  ;;  %vm1648_vm6 = vweird.f32 %v3743_v51 }
 0x626   : > { %vm1649_vm8 = vmor %vm1647_vm7, %vm1648_vm6 }
 0x627   : > { %v1643_v53 = vmul.f32 %v3743_v51, %v1642_v52 }
 0x628   : > { %v1767_v24 = vpop.f32.mrf.mxu2 }
 0x629   : > { %v1644_v54 = vmul.f32 0.5, %v1643_v53  ;;  %v1768_v25 = vadd.f32 %v3705_v23, %v1767_v24  ;;  %v3707_v24 = vld [vmem:[#allocation10] ss:$0 sm:$0xff] }
 0x62b   : > { %v1645_v55 = vsub.f32 1.5, %v1644_v54  ;;  %v1773_v26 = vpack.c.bf16 %v1768_v25, %v1768_v25  ;;  %v3476_v54 = vld [vmem:[%s5042_s22 + $0x8] sm:$0xff]  ;;  %s5046_s22 = sld [smem:[#allocation53_spill]] }
 0x62c   : > { %1922 = vmatpush.bf16.msrb.mxu3 %v3476_v54  ;;  %v3486_v54 = vld [vmem:[%s5025_s26 + $0x18] sm:$0xff] }
 0x62d   : > { %v1646_v56 = vmul.f32 %v3743_v51, %v1645_v55  ;;  %v1812_v32 = vsel %vm1501_vm4, %v1773_v26, 0  ;;  %v1869_v33 = vunpack.c.l.b16 %v1773_v26  ;;  %v3708_v26 = vld [vmem:[#allocation12] ss:$0 sm:$0xff] }
 0x62e   : > { %1821 = vmatpush.bf16.msrb.mxu0 %v1812_v32 }
 0x62f   : > { %v1650_v58 = vsel %vm1649_vm8, %v3743_v51, %v1646_v56  ;;  %v1870_v37 = vpack.c.b16 %v1869_v33, %v1869_v33 }
 0x630   : > { %v1651_v60 = vmul.f32 %v1650_v58, %v1634_v34  ;;  %v1769_v38 = vpop.f32.mrf.mxu2 }
 0x631   : > { %s5047_s5 = smov %s5046_s22 }
 0x632   : > { %v1655_v61 = vmul.f32 %v3701_v57, %v1651_v60  ;;  %v3480_v33 = vld [vmem:[%s5047_s5 + $0x8] sm:$0xff] }
 0x634   : > { %v4802_v62 = vadd.f32 %v3702_v59, %v1655_v61  ;;  %v3475_v59 = vld [vmem:[%s5043_s10] sm:$0xff] }
 0x635   : > { %1923 = vmatpush.bf16.msrb.mxu3 %v3475_v59 }
 0x636   : > { %v1680_v63 = vpack.c.bf16 %v4802_v62, %v4802_v62 }
 0x638   : > { %3237 = vmatmul.msk.bf16.vlgmr.msra.gmra.mxu0 %vm1389_vm0, %v1680_v63 }
 0x639   : > { %2001 = vmatpush.bf16.msra.mxu0 %v3478_v12 }
 0x6b5   : > { %v1708_v3 = vpop.f32.mrf.mxu0 }
 0x6b6   : > { %v1709_v5 = vadd.f32 %v3704_v2, %v1708_v3 }
 0x6b8   : > { %v1771_v6 = vpack.c.bf16 %v1709_v5, %v1709_v5 }
 0x6ba   : > { %v1828_v7 = vunpack.c.l.b16 %v1771_v6  ;;  %3256 = vmatmul.msk.bf16.vlgmr.msra.gmra.mxu3 %vm1465_vm1, %v1771_v6 }
 0x6bb   : > { %2168 = vmatpush.bf16.msra.mxu3 %v3486_v54 }
 0x6bc   : > { %v1829_v8 = vpack.c.b16 %v1828_v7, %v1828_v7 }
 0x6bd   : > { %v1710_v9 = vpop.f32.mrf.mxu0 }
 0x6be   : > { %1830 = vrot.lane.b32.xlu2 %v1829_v8, %s4987_s18 }
 0x6c6   : > { %1871 = vrot.lane.b32.xlu2 %v1870_v37, %s4987_s18  ;;  %s5044_s18 = smov 16  }
 0x718   : > { %v1831_v10 = vpop.permute.xlu2 %1830 }
 0x719   : > { %3258 = vmatmul.msk.bf16.vlgmr.msrb.gmra.mxu1 %vm1465_vm1, %v1831_v10 }
 0x720   : > { %v1872_v44 = vpop.permute.xlu2 %1871 }
 0x721   : > { %v1877_v45 = vsel %vm1501_vm4, %v1872_v44, 0 }
 0x722   : > { %1886 = vmatpush.bf16.msrb.mxu2 %v1877_v45 }
 0x73d   : > { %v1792_v14 = vpop.f32.mrf.mxu3 }
 0x73e   : > { %v1793_v15 = vadd.f32 %v1792_v14, %v4814_v13  ;;  %v3477_v14 = vld [vmem:[%s5045_s4] sm:$0xff] }
 0x73f   : > { %2002 = vmatpush.bf16.msra.mxu0 %v3477_v14  ;;  %v3713_v14 = vld [vmem:[%s5032_s28 + $0x1] ss:$0 sm:$0xff] }
 0x740   : > { %v1796_v16 = vsel %vm1485_vm3, %v1793_v15, -inf }
 0x741   : > { %1797 = vmax.xlane.f32.xlu1 %v1796_v16 }
 0x745   : > { %v1794_v17 = vpop.f32.mrf.mxu3 }
 0x746   : > { %v3481_v17 = vld [vmem:[%s5047_s5 + $0x10] sm:$0xff] }
 0x796   : > { %v1852_v20 = vpop.f32.mrf.mxu1 }
 0x797   : > { %v1853_v21 = vadd.f32 %v1852_v20, %v4814_v13 }
 0x799   : > { %v1856_v30 = vsel %vm1485_vm3, %v1853_v21, -inf }
 0x79a   : > { %1857 = vmax.xlane.f32.xlu0 %v1856_v30 }
 0x79e   : > { %v1854_v22 = vpop.f32.mrf.mxu1 }
 0x7b4   : > { %v1798_v4 = vpop.xlane.xlu1 %1797 }
 0x7b5   : > { %v1799_v34 = vsub.f32 %v1793_v15, %v1798_v4  ;;  %v3482_v15 = vld [vmem:[%s5046_s22 + $0x18] sm:$0xff]  ;;  %s5048_s22 = smov 112  }
 0x7b6   : > { %2045 = vmatpush.bf16.msra.mxu1 %v3482_v15 }
 0x7b7   : > { %v1800_v39 = vmul.f32 1.442695, %v1799_v34  ;;  %v3479_v34 = vld [vmem:[%s5047_s5] sm:$0xff] }
 0x7ba   : > { %2046 = vmatpush.bf16.msra.mxu1 %v3481_v17  ;;  %v3715_v17 = vld [vmem:[%s5027_s2 + $0x1] ss:$0 sm:$0xff] }
 0x7be   : > { %2047 = vmatpush.bf16.msra.mxu1 %v3480_v33 }
 0x7c2   : > { %2048 = vmatpush.bf16.msra.mxu1 %v3479_v34 }
 0x80d   : > { %v1858_v28 = vpop.xlane.xlu0 %1857 }
 0x80e   : > { %v1859_v29 = vsub.f32 %v1853_v21, %v1858_v28 }
 0x810   : > { %v1860_v36 = vmul.f32 1.442695, %v1859_v29 }
 0x812   : > { %3744 = vpow2.f32 %v1860_v36  ;;  %v3709_v36 = vld [vmem:[#allocation13] ss:$0 sm:$0xff] }
 0x813   : > { %3746 = vpow2.f32 %v1800_v39 }
 0x818   : > { %v3745_v40 = vpop.eup %3744 }
 0x819   : > { %v1862_v41 = vsel %vm1485_vm3, %v3745_v40, 0.0  ;;  %v3747_v42 = vpop.eup %3746 }
 0x81a   : > { %1863 = vadd.xlane.f32.xlu1 %v1862_v41  ;;  %v1802_v43 = vsel %vm1485_vm3, %v3747_v42, 0.0 }
 0x822   : > { %1803 = vadd.xlane.f32.xlu1 %v1802_v43 }
 0x88d   : > { %v1864_v46 = vpop.xlane.xlu1 %1863 }
 0x88e   : > { %3748 = vrcp.f32 %v1864_v46 }
 0x894   : > { %v3749_v47 = vpop.eup %3748 }
 0x895   : > { %v1866_v48 = vmul.f32 %v3749_v47, %v3745_v40  ;;  %v1804_v49 = vpop.xlane.xlu1 %1803 }
 0x896   : > { %3750 = vrcp.f32 %v1804_v49 }
 0x897   : > { %v1867_v50 = vpack.c.bf16 %v1866_v48, %v1866_v48 }
 0x899   : > { %3259 = vmatmul.msk.bf16.vlgmr.msrb.gmra.mxu2 %vm1485_vm3, %v1867_v50 }
 0x89c   : > { %v3751_v51 = vpop.eup %3750 }
 0x89d   : > { %v1806_v52 = vmul.f32 %v3751_v51, %v3747_v42  ;;  %v3710_v42 = vld [vmem:[#allocation15] ss:$0 sm:$0xff] }
 0x89f   : > { %v1807_v53 = vpack.c.bf16 %v1806_v52, %v1806_v52 }
 0x8a1   : > { %3257 = vmatmul.msk.bf16.vlgmr.msrb.gmra.mxu0 %vm1485_vm3, %v1807_v53  ;;  %v3484_v53 = vld [vmem:[%s4328_s25 + $0x18] sm:$0xff] }
 0x8a2   : > { %2140 = vmatpush.bf16.msra.mxu2 %v3484_v53 }
 0x91c   : > { %v1888_v55 = vpop.f32.mrf.mxu2 }
 0x91d   : > { %1893 = vrot.lane.b32.xlu2 %v1888_v55, %s5044_s18  ;;  %v3488_v55 = vld [vmem:[%s5029_s20 + $0x18] sm:$0xff] }
 0x91e   : > { %v1823_v56 = vpop.f32.mrf.mxu0  ;;  %2196 = vmatpush.bf16.msrb.mxu0 %v3488_v55 }
 0x924   : > { %v1890_v57 = vpop.f32.mrf.mxu2 }
 0x925   : > { %v3485_v57 = vld [vmem:[%s5025_s26 + $0x10] sm:$0xff] }
 0x926   : > { %v1825_v58 = vpop.f32.mrf.mxu0  ;;  %2169 = vmatpush.bf16.msra.mxu3 %v3485_v57 }
 0x927   : > { %v3487_v58 = vld [vmem:[%s5029_s20 + $0x10] sm:$0xff] }
 0x928   : > { %2197 = vmatpush.bf16.msrb.mxu0 %v3487_v58 }
 0x977   : > { %v1894_v60 = vpop.permute.xlu2 %1893 }
 0x978   : > { %v1896_v61 = vsel %vm1465_vm1, %v1823_v56, %v1894_v60  ;;  %v3483_v56 = vld [vmem:[%s4328_s25 + $0x10] sm:$0xff] }
 0x979   : > { %v1897_v63 = vpack.c.bf16 %v1896_v61, %v1896_v61  ;;  %2141 = vmatpush.bf16.msra.mxu2 %v3483_v56 }
 0x97b   : > { %3268 = vmatmul.msk.bf16.vlgmr.msrb.gmra.mxu3 %vm1389_vm0, %v1897_v63 }
 0x9fe   : > { %v1925_v1 = vpop.f32.mrf.mxu3 }
 0x9ff   : > { %v1926_v2 = vadd.f32 %v3706_v0, %v1925_v1 }
 0xa01   : > { %v1929_v3 = vadd.f32 %v1926_v2, %v4802_v62 }
 0xa03   : > { %v1932_v5 = vsel %vm1389_vm0, %v1929_v3, 0.0 }
 0xa04   : > { %1933 = vadd.xlane.f32.xlu1 %v1932_v5 }
 0xa06   : > { %v1927_v6 = vpop.f32.mrf.mxu3 }
 0xa07   : > { %v3711_v6 = vld [vmem:[#allocation16] ss:$0 sm:$0xff] }
 0xa77   : > { %v1934_v7 = vpop.xlane.xlu1 %1933 }
 0xa78   : > { %v1935_v8 = vmul.f32 %v1934_v7, %v4792_v31 }
 0xa7a   : > { %v1936_v9 = vsub.f32 %v1929_v3, %v1935_v8  ;;  %v3712_v8 = vld [vmem:[#allocation18] ss:$0 sm:$0xff] }
 0xa7c   : > { %v1937_v10 = vmul.f32 %v1936_v9, %v1936_v9 }
 0xa7e   : > { %v1938_v11 = vsel %vm1389_vm0, %v1937_v10, 0.0 }
 0xa7f   : > { %1939 = vadd.xlane.f32.xlu2 %v1938_v11 }
 0xaf2   : > { %v1940_v16 = vpop.xlane.xlu2 %1939 }
 0xaf3   : > { %v1941_v62 = vmul.f32 %v1940_v16, %v4792_v31 }
 0xaf5   : > { %v1942_v18 = vadd.f32 1e-05, %v1941_v62  ;;  %v3714_v62 = vld [vmem:[%s5026_s7 + $0x1] ss:$0 sm:$0xff] }
 0xaf7   : > { %3752 = vrsqrt.f32 %v1942_v18  ;;  %vm1949_vm11 = vweird.f32 %v1942_v18 }
 0xafd   : > { %v3753_v19 = vpop.eup %3752 }
 0xafe   : > { %v1944_v20 = vmul.f32 %v3753_v19, %v1942_v18  ;;  %vm1950_vm10 = vweird.f32 %v3753_v19 }
 0xaff   : > { %vm1951_vm12 = vmor %vm1949_vm11, %vm1950_vm10 }
 0xb00   : > { %v1945_v21 = vmul.f32 %v3753_v19, %v1944_v20 }
 0xb02   : > { %v1946_v30 = vmul.f32 0.5, %v1945_v21 }
 0xb04   : > { %v1947_v22 = vsub.f32 1.5, %v1946_v30 }
 0xb06   : > { %v1948_v23 = vmul.f32 %v3753_v19, %v1947_v22 }
 0xb08   : > { %v1952_v25 = vsel %vm1951_vm12, %v3753_v19, %v1948_v23 }
 0xb09   : > { %v1953_v4 = vmul.f32 %v1952_v25, %v1936_v9 }
 0xb0b   : > { %v1957_v28 = vmul.f32 %v3707_v24, %v1953_v4 }
 0xb0d   : > { %v1961_v29 = vadd.f32 %v3708_v26, %v1957_v28 }
 0xb0f   : > { %v1976_v32 = vpack.c.bf16 %v1961_v29, %v1961_v29 }
 0xb11   : > { %3277 = vmatmul.msk.bf16.vlgmr.msra.gmra.mxu0 %vm1389_vm0, %v1976_v32 }
 0xb8e   : > { %v2004_v37 = vpop.f32.mrf.mxu0 }
 0xb8f   : > { %v2005_v38 = vadd.f32 %v3709_v36, %v2004_v37 }
 0xb91   : > { %v2008_v39 = vmax.f32 %v2005_v38, 0.0 }
 0xb93   : > { %v2009_v40 = vpack.c.bf16 %v2008_v39, %v2008_v39 }
 0xb95   : > { %3294 = vmatmul.msk.bf16.vlgmr.msra.gmra.mxu1 %vm2037_vm13, %v2009_v40 }
 0xb96   : > { %v2006_v41 = vpop.f32.mrf.mxu0 }
 0xc12   : > { %v2050_v43 = vpop.f32.mrf.mxu1 }
 0xc13   : > { %v2051_v44 = vadd.f32 %v3710_v42, %v2050_v43 }
 0xc15   : > { %v2054_v45 = vadd.f32 %v2051_v44, %v1961_v29 }
 0xc17   : > { %v2057_v46 = vsel %vm1389_vm0, %v2054_v45, 0.0 }
 0xc18   : > { %2058 = vadd.xlane.f32.xlu1 %v2057_v46 }
 0xc1a   : > { %v2052_v47 = vpop.f32.mrf.mxu1 }
 0xc8b   : > { %v2059_v48 = vpop.xlane.xlu1 %2058 }
 0xc8c   : > { %v2060_v49 = vmul.f32 %v2059_v48, %v4792_v31 }
 0xc8e   : > { %v2061_v50 = vsub.f32 %v2054_v45, %v2060_v49 }
 0xc90   : > { %v2062_v51 = vmul.f32 %v2061_v50, %v2061_v50 }
 0xc92   : > { %v2063_v52 = vsel %vm1389_vm0, %v2062_v51, 0.0 }
 0xc93   : > { %2064 = vadd.xlane.f32.xlu0 %v2063_v52 }
 0xd06   : > { %v2065_v59 = vpop.xlane.xlu0 %2064 }
 0xd07   : > { %v2066_v60 = vmul.f32 %v2065_v59, %v4792_v31 }
 0xd09   : > { %v2067_v61 = vadd.f32 1e-05, %v2066_v60 }
 0xd0b   : > { %3754 = vrsqrt.f32 %v2067_v61  ;;  %vm2074_vm15 = vweird.f32 %v2067_v61 }
 0xd11   : > { %v3755_v63 = vpop.eup %3754 }
 0xd12   : > { %v2069_v0 = vmul.f32 %v3755_v63, %v2067_v61  ;;  %vm2075_vm14 = vweird.f32 %v3755_v63 }
 0xd13   : > { %vm2076_vm2 = vmor %vm2074_vm15, %vm2075_vm14 }
 0xd14   : > { %v2070_v1 = vmul.f32 %v3755_v63, %v2069_v0 }
 0xd16   : > { %v2071_v2 = vmul.f32 0.5, %v2070_v1 }
 0xd18   : > { %v2072_v3 = vsub.f32 1.5, %v2071_v2 }
 0xd1a   : > { %v2073_v5 = vmul.f32 %v3755_v63, %v2072_v3 }
 0xd1c   : > { %v2077_v7 = vsel %vm2076_vm2, %v3755_v63, %v2073_v5 }
 0xd1d   : > { %v2078_v9 = vmul.f32 %v2077_v7, %v2061_v50 }
 0xd1f   : > { %v2082_v10 = vmul.f32 %v3711_v6, %v2078_v9 }
 0xd21   : > { %v4859_v11 = vadd.f32 %v3712_v8, %v2082_v10  ;;  %v3490_v8 = vld [vmem:[%s5033_s23 + $0x18] sm:$0xff] }
 0xd23   : > { %v2115_v12 = vpack.c.bf16 %v4859_v11, %v4859_v11 }
 0xd25   : > { %3323 = vmatmul.msk.bf16.vlgmr.msra.gmra.mxu2 %vm1389_vm0, %v2115_v12  ;;  %3332 = vmatmul.msk.bf16.vlgmr.msra.gmra.mxu3 %vm1389_vm0, %v2115_v12 }
 0xd26   : > { %3341 = vmatmul.msk.bf16.vlgmr.msrb.gmra.mxu0 %vm1389_vm0, %v2115_v12  ;;  %v3489_v12 = vld [vmem:[%s5033_s23 + $0x10] sm:$0xff] }
 0xda3   : > { %v2199_v15 = vpop.f32.mrf.mxu0 }
 0xda4   : > { %v2200_v16 = vadd.f32 %v3713_v14, %v2199_v15 }
 0xda6   : > { %v2205_v18 = vpack.c.bf16 %v2200_v16, %v2200_v16 }
 0xda8   : > { %v2241_v19 = vsel %vm1501_vm4, %v2205_v18, 0  ;;  %v2143_v20 = vpop.f32.mrf.mxu2  ;;  %v2171_v21 = vpop.f32.mrf.mxu3  ;;  %v2298_v52 = vunpack.c.l.b16 %v2205_v18 }
 0xda9   : > { %v2144_v30 = vadd.f32 %v3714_v62, %v2143_v20  ;;  %v2172_v22 = vadd.f32 %v3715_v17, %v2171_v21  ;;  %2250 = vmatpush.bf16.msrb.mxu2 %v2241_v19  ;;  %v3716_v62 = vld [vmem:[%s5034_s11 + $0x1] ss:$0 sm:$0xff] }
 0xdaa   : > { %v2299_v53 = vpack.c.b16 %v2298_v52, %v2298_v52 }
 0xdab   : > { %v2203_v23 = vpack.c.bf16 %v2144_v30, %v2144_v30  ;;  %v2204_v24 = vpack.c.bf16 %v2172_v22, %v2172_v22  ;;  %v2201_v25 = vpop.f32.mrf.mxu0 }
 0xdad   : > { %v2257_v26 = vunpack.c.l.b16 %v2203_v23  ;;  %v2210_v4 = vsel %vm1465_vm1, %v2204_v24, 0  ;;  %v2262_v28 = vunpack.c.l.b16 %v2204_v24 }
 0xdae   : > { %2219 = vmatpush.bf16.xpose.msrb.mxu1 %v2210_v4  ;;  %v3493_v4 = vld [vmem:[%s5036_s27 + $0x10] sm:$0xff] }
 0xdaf   : > { %v2258_v29 = vpack.c.b16 %v2257_v26, %v2257_v26  ;;  %v2263_v32 = vpack.c.b16 %v2262_v28, %v2262_v28  ;;  %v3494_v26 = vld [vmem:[%s5036_s27 + $0x18] sm:$0xff]  ;;  %v3491_v28 = vld [vmem:[%s5038_s16 + $0x10] sm:$0xff] }
 0xdb0   : > { %v2145_v33 = vpop.f32.mrf.mxu2  ;;  %v2173_v34 = vpop.f32.mrf.mxu3 }
 0xdb1   : > { %2264 = vrot.lane.b32.xlu1 %v2263_v32, %s5048_s22  ;;  %2259 = vrot.lane.b32.xlu0 %v2258_v29, %s5048_s22 }
 0xdb5   : > { %3342 = vmatmul.msk.bf16.vlgmr.msrb.gmra.mxu1 %vm1465_vm1, %v2203_v23 }
 0xdb6   : > { %2351 = vmatpush.bf16.msra.mxu1 %v3490_v8 }
 0xdba   : > { %2352 = vmatpush.bf16.msra.mxu1 %v3489_v12 }
 0xe23   : > { %v2265_v36 = vpop.permute.xlu1 %2264  ;;  %v2260_v38 = vpop.permute.xlu0 %2259 }
 0xe24   : > { %v2270_v37 = vsel %vm1465_vm1, %v2265_v36, 0 }
 0xe25   : > { %2279 = vmatpush.bf16.xpose.msrb.mxu3 %v2270_v37 }
 0xe2c   : > { %3344 = vmatmul.msk.bf16.vlgmr.msrb.gmra.mxu3 %vm1465_vm1, %v2260_v38 }
 0xe2d   : > { %2474 = vmatpush.bf16.msra.mxu3 %v3494_v26 }
 0xe31   : > { %2475 = vmatpush.bf16.msra.mxu3 %v3493_v4 }
 0xe32   : > { %v2221_v39 = vpop.f32.mrf.mxu1 }
 0xe33   : > { %v2222_v40 = vadd.f32 %v2221_v39, %v4762_v35 }
 0xe35   : > { %v2225_v41 = vsel %vm1485_vm3, %v2222_v40, -inf }
 0xe36   : > { %2226 = vmax.xlane.f32.xlu1 %v2225_v41  ;;  %v3717_v41 = vld [vmem:[%s5039_s1 + $0x1] ss:$0 sm:$0xff] }
 0xe3a   : > { %v2223_v42 = vpop.f32.mrf.mxu1 }
 0xe3c   : > { %3389 = vmatmul.msk.bf16.vlgmr.msra.gmra.mxu3 %vm1389_vm0, %v4788_v27 }
 0xea9   : > { %v2227_v54 = vpop.xlane.xlu1 %2226 }
 0xeaa   : > { %v2228_v55 = vsub.f32 %v2222_v40, %v2227_v54 }
 0xeac   : > { %v2229_v56 = vmul.f32 1.442695, %v2228_v55 }
 0xeaf   : > { %v2281_v43 = vpop.f32.mrf.mxu3 }
 0xeb0   : > { %v2282_v44 = vadd.f32 %v2281_v43, %v4762_v35  ;;  %v3718_v43 = vld [vmem:[#allocation2 + $0x1] ss:$0 sm:$0xff] }
 0xeb2   : > { %v2285_v45 = vsel %vm1485_vm3, %v2282_v44, -inf }
 0xeb3   : > { %2286 = vmax.xlane.f32.xlu0 %v2285_v45 }
 0xeb7   : > { %v2283_v46 = vpop.f32.mrf.mxu3 }
 0xf26   : > { %v2287_v47 = vpop.xlane.xlu0 %2286 }
 0xf27   : > { %v2288_v48 = vsub.f32 %v2282_v44, %v2287_v47 }
 0xf29   : > { %v2289_v49 = vmul.f32 1.442695, %v2288_v48  ;;  %v3719_v48 = vld [vmem:[#allocation6 + $0x1] ss:$0 sm:$0xff] }
 0xf2b   : > { %3756 = vpow2.f32 %v2289_v49  ;;  %v2477_v49 = vpop.f32.mrf.mxu3 }
 0xf2c   : > { %3758 = vpow2.f32 %v2229_v56  ;;  %v3496_v56 = vld [vmem:[%s5041_s15 + $0x18] sm:$0xff] }
 0xf31   : > { %v3757_v50 = vpop.eup %3756 }
 0xf32   : > { %v2291_v51 = vsel %vm1485_vm3, %v3757_v50, 0.0  ;;  %v3759_v35 = vpop.eup %3758 }
 0xf33   : > { %2292 = vadd.xlane.f32.xlu2 %v2291_v51  ;;  %v2231_v57 = vsel %vm1485_vm3, %v3759_v35, 0.0  ;;  %v2479_v55 = vpop.f32.mrf.mxu3 }
 0xf4b   : > { %2300 = vrot.lane.b32.xlu2 %v2299_v53, %s5048_s22 }
 0xf74   : > { %2232 = vadd.xlane.f32.xlu2 %v2231_v57  ;;  %v3720_v57 = vld [vmem:[#allocation4 + $0x1] ss:$0 sm:$0xff] }
 0xfa6   : > { %v2293_v58 = vpop.xlane.xlu2 %2292 }
 0xfa7   : > { %3760 = vrcp.f32 %v2293_v58 }
 0xfad   : > { %v3761_v59 = vpop.eup %3760 }
 0xfae   : > { %v2295_v60 = vmul.f32 %v3761_v59, %v3757_v50  ;;  %v2301_v61 = vpop.permute.xlu2 %2300  ;;  %v2478_v50 = vadd.f32 %v3719_v48, %v2477_v49 }
 0xfaf   : > { %v2306_v63 = vsel %vm1501_vm4, %v2301_v61, 0 }
 0xfb0   : > { %v2296_v0 = vpack.c.bf16 %v2295_v60, %v2295_v60  ;;  %2315 = vmatpush.bf16.msra.mxu0 %v2306_v63  ;;  %v2510_v51 = vpack.c.bf16 %v2478_v50, %v2478_v50 }
 0xfb2   : > { %v2516_v52 = vsel %vm1465_vm1, %v2510_v51, 0  ;;  %v2568_v53 = vunpack.c.l.b16 %v2510_v51  ;;  %v3722_v51 = vld [vmem:[#allocation9 + $0x1] ss:$0 sm:$0xff] }
 0xfb3   : > { %3345 = vmatmul.msk.bf16.vlgmr.msra.gmra.mxu0 %vm1485_vm3, %v2296_v0  ;;  %2525 = vmatpush.bf16.xpose.msrb.mxu1 %v2516_v52 }
 0xfb4   : > { %v2569_v54 = vpack.c.b16 %v2568_v53, %v2568_v53  ;;  %2502 = vmatpush.bf16.msrb.mxu0 %v3496_v56 }
 0xfe7   : > { %v2233_v1 = vpop.xlane.xlu2 %2232 }
 0xfe8   : > { %3762 = vrcp.f32 %v2233_v1 }
 0xfee   : > { %v3763_v2 = vpop.eup %3762 }
 0xfef   : > { %v2235_v3 = vmul.f32 %v3763_v2, %v3759_v35  ;;  %v3495_v35 = vld [vmem:[%s5041_s15 + $0x10] sm:$0xff] }
 0xff0   : > { %2503 = vmatpush.bf16.msrb.mxu0 %v3495_v35 }
 0xff1   : > { %v2236_v5 = vpack.c.bf16 %v2235_v3, %v2235_v3  ;;  %v3721_v3 = vld [vmem:[#allocation7 + $0x1] ss:$0 sm:$0xff] }
 0xff3   : > { %3343 = vmatmul.msk.bf16.vlgmr.msrb.gmra.mxu2 %vm1485_vm3, %v2236_v5  ;;  %3398 = vmatmul.msk.bf16.vlgmr.msrb.gmra.mxu0 %vm1389_vm0, %v4788_v27 }
0x1030   : > { %v2317_v6 = vpop.f32.mrf.mxu0 }
0x1031   : > { %2322 = vrot.lane.b32.xlu0 %v2317_v6, %s5044_s18 }
0x1038   : > { %v2319_v7 = vpop.f32.mrf.mxu0 }
0x1070   : > { %v2505_v5 = vpop.f32.mrf.mxu0 }
0x1071   : > { %v2506_v6 = vadd.f32 %v3721_v3, %v2505_v5 }
0x1073   : > { %v2511_v7 = vpack.c.bf16 %v2506_v6, %v2506_v6 }
0x1075   : > { %v2547_v27 = vsel %vm1501_vm4, %v2511_v7, 0 }
0x1076   : > { %v2252_v9 = vpop.f32.mrf.mxu2 }
0x1078   : > { %v2507_v8 = vpop.f32.mrf.mxu0 }
0x107e   : > { %v2254_v10 = vpop.f32.mrf.mxu2 }
0x10a3   : > { %v2323_v14 = vpop.permute.xlu0 %2322 }
0x10a4   : > { %v2325_v15 = vsel %vm1465_vm1, %v2252_v9, %v2323_v14 }
0x10a5   : > { %v2326_v16 = vpack.c.bf16 %v2325_v15, %v2325_v15 }
0x10a7   : > { %3354 = vmatmul.msk.bf16.vlgmr.msra.gmra.mxu1 %vm1389_vm0, %v2326_v16  ;;  %v2604_v16 = vunpack.c.l.b16 %v2511_v7 }
0x1124   : > { %v2354_v17 = vpop.f32.mrf.mxu1 }
0x1125   : > { %v2355_v18 = vadd.f32 %v3716_v62, %v2354_v17  ;;  %v2605_v62 = vpack.c.b16 %v2604_v16, %v2604_v16 }
0x1127   : > { %v2358_v19 = vadd.f32 %v2355_v18, %v4859_v11  ;;  %v3492_v11 = vld [vmem:[%s5038_s16 + $0x18] sm:$0xff] }
0x1128   : > { %2446 = vmatpush.bf16.msra.mxu2 %v3492_v11 }
0x1129   : > { %v2363_v20 = vsel %vm1389_vm0, %v2358_v19, 0.0 }
0x112a   : > { %2364 = vadd.xlane.f32.xlu1 %v2363_v20 }
0x112c   : > { %v2356_v21 = vpop.f32.mrf.mxu1  ;;  %2447 = vmatpush.bf16.msra.mxu2 %v3491_v28 }
0x1130   : > { %2556 = vmatpush.bf16.msrb.mxu2 %v2547_v27 }
0x119d   : > { %v2365_v30 = vpop.xlane.xlu1 %2364 }
0x119e   : > { %v2366_v22 = vmul.f32 %v2365_v30, %v4792_v31 }
0x11a0   : > { %v2367_v23 = vsub.f32 %v2358_v19, %v2366_v22 }
0x11a2   : > { %v2368_v24 = vmul.f32 %v2367_v23, %v2367_v23 }
0x11a4   : > { %v2369_v25 = vsel %vm1389_vm0, %v2368_v24, 0.0 }
0x11a5   : > { %2370 = vadd.xlane.f32.xlu1 %v2369_v25 }
0x11be   : > { %2570 = vrot.lane.b32.xlu1 %v2569_v54, %s5048_s22 }
0x1218   : > { %v2371_v29 = vpop.xlane.xlu1 %2370 }
0x1219   : > { %v2372_v32 = vmul.f32 %v2371_v29, %v4792_v31 }
0x121b   : > { %v2373_v33 = vadd.f32 1e-05, %v2372_v32 }
0x121d   : > { %3764 = vrsqrt.f32 %v2373_v33  ;;  %vm2380_vm6 = vweird.f32 %v2373_v33 }
0x1223   : > { %v3765_v34 = vpop.eup %3764 }
0x1224   : > { %v2375_v36 = vmul.f32 %v3765_v34, %v2373_v33  ;;  %vm2381_vm5 = vweird.f32 %v3765_v34 }
0x1225   : > { %vm2382_vm7 = vmor %vm2380_vm6, %vm2381_vm5 }
0x1226   : > { %v2376_v37 = vmul.f32 %v3765_v34, %v2375_v36 }
0x1228   : > { %v2377_v38 = vmul.f32 0.5, %v2376_v37 }
0x122a   : > { %v2378_v39 = vsub.f32 1.5, %v2377_v38 }
0x122c   : > { %v2379_v40 = vmul.f32 %v3765_v34, %v2378_v39 }
0x122e   : > { %v2383_v42 = vsel %vm2382_vm7, %v3765_v34, %v2379_v40 }
0x122f   : > { %v2384_v44 = vmul.f32 %v2383_v42, %v2367_v23 }
0x1230   : > { %v2571_v1 = vpop.permute.xlu1 %2570 }
0x1231   : > { %v2388_v45 = vmul.f32 %v3717_v41, %v2384_v44  ;;  %v2576_v2 = vsel %vm1465_vm1, %v2571_v1, 0 }
0x1232   : > { %2585 = vmatpush.bf16.xpose.msrb.mxu3 %v2576_v2  ;;  %v3503_v2 = vld [vmem:[%s5047_s5 + $0x30] sm:$0xff] }
0x1233   : > { %v4904_v46 = vadd.f32 %v3718_v43, %v2388_v45  ;;  %v3498_v43 = vld [vmem:[%s5043_s10 + $0x18] sm:$0xff] }
0x1234   : > { %2657 = vmatpush.bf16.msra.mxu1 %v3498_v43 }
0x1235   : > { %v2421_v47 = vpack.c.bf16 %v4904_v46, %v4904_v46 }
0x1237   : > { %3380 = vmatmul.msk.bf16.vlgmr.msra.gmra.mxu2 %vm1389_vm0, %v2421_v47  ;;  %v3497_v47 = vld [vmem:[%s5043_s10 + $0x10] sm:$0xff] }
0x1238   : > { %2658 = vmatpush.bf16.msra.mxu1 %v3497_v47  ;;  %v3727_v47 = vld [vmem:[#allocation16 + $0x1] ss:$0 sm:$0xff] }
0x12ba   : > { %v2449_v58 = vpop.f32.mrf.mxu2 }
0x12bb   : > { %v2450_v59 = vadd.f32 %v3720_v57, %v2449_v58 }
0x12bd   : > { %v2509_v60 = vpack.c.bf16 %v2450_v59, %v2450_v59 }
0x12bf   : > { %v2563_v61 = vunpack.c.l.b16 %v2509_v60  ;;  %3399 = vmatmul.msk.bf16.vlgmr.msrb.gmra.mxu1 %vm1465_vm1, %v2509_v60 }
0x12c1   : > { %v2564_v63 = vpack.c.b16 %v2563_v61, %v2563_v61  ;;  %v3500_v61 = vld [vmem:[%s5045_s4 + $0x18] sm:$0xff] }
0x12c2   : > { %v2451_v0 = vpop.f32.mrf.mxu2  ;;  %2742 = vmatpush.bf16.msra.mxu2 %v3500_v61 }
0x12c3   : > { %2565 = vrot.lane.b32.xlu0 %v2564_v63, %s5048_s22  ;;  %v3499_v63 = vld [vmem:[%s5045_s4 + $0x10] sm:$0xff]  ;;  %v3504_v0 = vld [vmem:[%s5047_s5 + $0x38] sm:$0xff] }
0x12c4   : > { %2785 = vmatpush.bf16.msra.mxu3 %v3504_v0 }
0x12c6   : > { %2743 = vmatpush.bf16.msra.mxu2 %v3499_v63 }
0x12c8   : > { %2786 = vmatpush.bf16.msra.mxu3 %v3503_v2 }
0x1335   : > { %v2566_v9 = vpop.permute.xlu0 %2565 }
0x1336   : > { %3401 = vmatmul.msk.bf16.vlgmr.msrb.gmra.mxu3 %vm1465_vm1, %v2566_v9 }
0x133c   : > { %v2527_v10 = vpop.f32.mrf.mxu1 }
0x133d   : > { %v2528_v12 = vadd.f32 %v2527_v10, %v4814_v13  ;;  %v3723_v10 = vld [vmem:[#allocation10 + $0x1] ss:$0 sm:$0xff] }
0x133f   : > { %v2531_v14 = vsel %vm1485_vm3, %v2528_v12, -inf }
0x1340   : > { %2532 = vmax.xlane.f32.xlu2 %v2531_v14  ;;  %v3724_v14 = vld [vmem:[#allocation12 + $0x1] ss:$0 sm:$0xff] }
0x1344   : > { %v2529_v15 = vpop.f32.mrf.mxu1 }
0x1358   : > { %2606 = vrot.lane.b32.xlu2 %v2605_v62, %s5048_s22 }
0x13b3   : > { %v2533_v17 = vpop.xlane.xlu2 %2532 }
0x13b4   : > { %v2534_v18 = vsub.f32 %v2528_v12, %v2533_v17 }
0x13b6   : > { %v2535_v19 = vmul.f32 1.442695, %v2534_v18  ;;  %v3502_v18 = vld [vmem:[%s5047_s5 + $0x28] sm:$0xff] }
0x13b7   : > { %2787 = vmatpush.bf16.msra.mxu3 %v3502_v18 }
0x13b8   : > { %3766 = vpow2.f32 %v2535_v19  ;;  %v3501_v19 = vld [vmem:[%s5047_s5 + $0x20] sm:$0xff] }
0x13b9   : > { %v2587_v20 = vpop.f32.mrf.mxu3 }
0x13ba   : > { %v2588_v21 = vadd.f32 %v2587_v20, %v4814_v13  ;;  %v3725_v20 = vld [vmem:[#allocation13 + $0x1] ss:$0 sm:$0xff] }
0x13bb   : > { %v2607_v30 = vpop.permute.xlu2 %2606  ;;  %2788 = vmatpush.bf16.msra.mxu3 %v3501_v19 }
0x13bc   : > { %v2591_v22 = vsel %vm1485_vm3, %v2588_v21, -inf  ;;  %v2612_v23 = vsel %vm1501_vm4, %v2607_v30, 0 }
0x13bd   : > { %2592 = vmax.xlane.f32.xlu0 %v2591_v22  ;;  %2621 = vmatpush.bf16.msra.mxu0 %v2612_v23 }
0x13be   : > { %v3767_v24 = vpop.eup %3766 }
0x13bf   : > { %v2537_v25 = vsel %vm1485_vm3, %v3767_v24, 0.0 }
0x13c0   : > { %2538 = vadd.xlane.f32.xlu2 %v2537_v25  ;;  %v3726_v25 = vld [vmem:[#allocation15 + $0x1] ss:$0 sm:$0xff] }
0x13c1   : > { %v2589_v26 = vpop.f32.mrf.mxu3 }
0x1430   : > { %v2593_v4 = vpop.xlane.xlu0 %2592 }
0x1431   : > { %v2594_v11 = vsub.f32 %v2588_v21, %v2593_v4 }
0x1433   : > { %v2595_v28 = vmul.f32 1.442695, %v2594_v11  ;;  %v2539_v29 = vpop.xlane.xlu2 %2538 }
0x1434   : > { %3768 = vrcp.f32 %v2539_v29 }
0x1435   : > { %3770 = vpow2.f32 %v2595_v28 }
0x143a   : > { %v3769_v13 = vpop.eup %3768 }
0x143b   : > { %v3771_v32 = vpop.eup %3770  ;;  %v2541_v33 = vmul.f32 %v3769_v13, %v3767_v24 }
0x143c   : > { %v2597_v34 = vsel %vm1485_vm3, %v3771_v32, 0.0 }
0x143d   : > { %v2542_v36 = vpack.c.bf16 %v2541_v33, %v2541_v33  ;;  %2598 = vadd.xlane.f32.xlu1 %v2597_v34 }
0x143f   : > { %3400 = vmatmul.msk.bf16.vlgmr.msrb.gmra.mxu2 %vm1485_vm3, %v2542_v36 }
0x14b0   : > { %v2599_v37 = vpop.xlane.xlu1 %2598 }
0x14b1   : > { %3772 = vrcp.f32 %v2599_v37 }
0x14b7   : > { %v3773_v38 = vpop.eup %3772 }
0x14b8   : > { %v2601_v39 = vmul.f32 %v3773_v38, %v3771_v32 }
0x14ba   : > { %v2602_v40 = vpack.c.bf16 %v2601_v39, %v2601_v39 }
0x14bc   : > { %3402 = vmatmul.msk.bf16.vlgmr.msra.gmra.mxu0 %vm1485_vm3, %v2602_v40 }
0x14c2   : > { %v2558_v41 = vpop.f32.mrf.mxu2 }
0x14ca   : > { %v2560_v42 = vpop.f32.mrf.mxu2 }
0x1539   : > { %v2623_v44 = vpop.f32.mrf.mxu0 }
0x153a   : > { %2628 = vrot.lane.b32.xlu0 %v2623_v44, %s5044_s18  ;;  %s5049_s18 = sshll.u32 %s5052_s0, 3 }
0x153b   : > { %s1336_s22 = scalar_lea.vmem %s4478_s3, %s5049_s18 }
0x1541   : > { %v2625_v45 = vpop.f32.mrf.mxu0 }
0x15ac   : > { %v2629_v48 = vpop.permute.xlu0 %2628 }
0x15ad   : > { %v2631_v49 = vsel %vm1465_vm1, %v2558_v41, %v2629_v48 }
0x15ae   : > { %v2632_v50 = vpack.c.bf16 %v2631_v49, %v2631_v49 }
0x15b0   : > { %3411 = vmatmul.msk.bf16.vlgmr.msra.gmra.mxu1 %vm1389_vm0, %v2632_v50  ;;  %v3728_v50 = vld [vmem:[#allocation18 + $0x1] ss:$0 sm:$0xff] }
0x162d   : > { %v2660_v52 = vpop.f32.mrf.mxu1 }
0x162e   : > { %v2661_v53 = vadd.f32 %v3722_v51, %v2660_v52 }
0x1630   : > { %v2664_v54 = vadd.f32 %v2661_v53, %v4904_v46 }
0x1632   : > { %v2669_v55 = vsel %vm1389_vm0, %v2664_v54, 0.0 }
0x1633   : > { %2670 = vadd.xlane.f32.xlu1 %v2669_v55 }
0x1635   : > { %v2662_v56 = vpop.f32.mrf.mxu1 }
0x16a6   : > { %v2671_v35 = vpop.xlane.xlu1 %2670 }
0x16a7   : > { %v2672_v57 = vmul.f32 %v2671_v35, %v4792_v31 }
0x16a9   : > { %v2673_v58 = vsub.f32 %v2664_v54, %v2672_v57 }
0x16ab   : > { %v2674_v59 = vmul.f32 %v2673_v58, %v2673_v58 }
0x16ad   : > { %v2675_v60 = vsel %vm1389_vm0, %v2674_v59, 0.0  ;;  %v3505_v59 = vld [vmem:[%s4468_s8] sm:$0xff] }
0x16ae   : > { %2676 = vadd.xlane.f32.xlu0 %v2675_v60 }
0x1721   : > { %v2677_v1 = vpop.xlane.xlu0 %2676 }
0x1722   : > { %v2678_v46 = vmul.f32 %v2677_v1, %v4792_v31 }
0x1724   : > { %v2679_v3 = vadd.f32 1e-05, %v2678_v46 }
0x1726   : > { %3774 = vrsqrt.f32 %v2679_v3  ;;  %vm2686_vm3 = vweird.f32 %v2679_v3 }
0x172c   : > { %v3775_v5 = vpop.eup %3774 }
0x172d   : > { %v2681_v6 = vmul.f32 %v3775_v5, %v2679_v3  ;;  %vm2687_vm1 = vweird.f32 %v3775_v5 }
0x172e   : > { %vm2688_vm4 = vmor %vm2686_vm3, %vm2687_vm1 }
0x172f   : > { %v2682_v7 = vmul.f32 %v3775_v5, %v2681_v6  ;;  %v3729_v6 = vld [vmem:[#allocation19] ss:$0 sm:$0xff] }
0x1731   : > { %v2683_v27 = vmul.f32 0.5, %v2682_v7 }
0x1733   : > { %v2684_v8 = vsub.f32 1.5, %v2683_v27 }
0x1735   : > { %v2685_v9 = vmul.f32 %v3775_v5, %v2684_v8  ;;  %v3730_v8 = vld [vmem:[#allocation21] ss:$0 sm:$0xff] }
0x1737   : > { %v2689_v12 = vsel %vm2688_vm4, %v3775_v5, %v2685_v9 }
0x1738   : > { %v2690_v15 = vmul.f32 %v2689_v12, %v2673_v58  ;;  %v3506_v58 = vld [vmem:[%s4468_s8 + $0x8] sm:$0xff]  ;;  %v3731_v12 = vld [vmem:[#allocation22] ss:$0 sm:$0xff] }
0x1739   : > { %2891 = vmatpush.bf16.msrb.mxu0 %v3506_v58 }
0x173a   : > { %v2694_v16 = vmul.f32 %v3723_v10, %v2690_v15 }
0x173c   : > { %v2698_v62 = vadd.f32 %v3724_v14, %v2694_v16 }
0x173d   : > { %2892 = vmatpush.bf16.msrb.mxu0 %v3505_v59 }
0x173e   : > { %v2717_v17 = vpack.c.bf16 %v2698_v62, %v2698_v62 }
0x1740   : > { %3432 = vmatmul.msk.bf16.vlgmr.msra.gmra.mxu2 %vm1389_vm0, %v2717_v17 }
0x17c3   : > { %v2745_v21 = vpop.f32.mrf.mxu2 }
0x17c4   : > { %v2746_v30 = vadd.f32 %v3725_v20, %v2745_v21 }
0x17c6   : > { %v2749_v22 = vmax.f32 %v2746_v30, 0.0 }
0x17c8   : > { %v2750_v23 = vpack.c.bf16 %v2749_v22, %v2749_v22 }
0x17ca   : > { %3449 = vmatmul.msk.bf16.vlgmr.msra.gmra.mxu3 %vm2037_vm13, %v2750_v23 }
0x17cb   : > { %v2747_v24 = vpop.f32.mrf.mxu2 }
0x184d   : > { %v2790_v26 = vpop.f32.mrf.mxu3 }
0x184e   : > { %v2791_v4 = vadd.f32 %v3726_v25, %v2790_v26 }
0x1850   : > { %v2794_v11 = vadd.f32 %v2791_v4, %v2698_v62 }
0x1852   : > { %v2799_v28 = vsel %vm1389_vm0, %v2794_v11, 0.0 }
0x1853   : > { %2800 = vadd.xlane.f32.xlu1 %v2799_v28 }
0x1855   : > { %v2792_v29 = vpop.f32.mrf.mxu3 }
0x18c6   : > { %v2801_v13 = vpop.xlane.xlu1 %2800 }
0x18c7   : > { %v2802_v32 = vmul.f32 %v2801_v13, %v4792_v31 }
0x18c9   : > { %v2803_v33 = vsub.f32 %v2794_v11, %v2802_v32 }
0x18cb   : > { %v2804_v34 = vmul.f32 %v2803_v33, %v2803_v33 }
0x18cd   : > { %v2805_v36 = vsel %vm1389_vm0, %v2804_v34, 0.0 }
0x18ce   : > { %2806 = vadd.xlane.f32.xlu1 %v2805_v36 }
0x1941   : > { %v2807_v37 = vpop.xlane.xlu1 %2806 }
0x1942   : > { %v2808_v38 = vmul.f32 %v2807_v37, %v4792_v31 }
0x1944   : > { %v2809_v39 = vadd.f32 1e-05, %v2808_v38 }
0x1946   : > { %3776 = vrsqrt.f32 %v2809_v39  ;;  %vm2816_vm9 = vweird.f32 %v2809_v39 }
0x194c   : > { %v3777_v40 = vpop.eup %3776 }
0x194d   : > { %v2811_v41 = vmul.f32 %v3777_v40, %v2809_v39  ;;  %vm2817_vm8 = vweird.f32 %v3777_v40 }
0x194e   : > { %vm2818_vm10 = vmor %vm2816_vm9, %vm2817_vm8 }
0x194f   : > { %v2812_v42 = vmul.f32 %v3777_v40, %v2811_v41 }
0x1951   : > { %v2813_v43 = vmul.f32 0.5, %v2812_v42 }
0x1953   : > { %v2814_v44 = vsub.f32 1.5, %v2813_v43 }
0x1955   : > { %v2815_v45 = vmul.f32 %v3777_v40, %v2814_v44 }
0x1957   : > { %v2819_v48 = vsel %vm2818_vm10, %v3777_v40, %v2815_v45 }
0x1958   : > { %v2820_v49 = vmul.f32 %v2819_v48, %v2803_v33 }
0x195a   : > { %v2824_v51 = vmul.f32 %v3727_v47, %v2820_v49 }
0x195c   : > { %v2828_v52 = vadd.f32 %v3728_v50, %v2824_v51 }
0x195e   : > { %v2831_v53 = vsel %vm1389_vm0, %v2828_v52, 0.0 }
0x195f   : > { %2832 = vadd.xlane.f32.xlu1 %v2831_v53 }
0x19d2   : > { %v2833_v54 = vpop.xlane.xlu1 %2832 }
0x19d3   : > { %v2834_v55 = vmul.f32 %v2833_v54, %v4792_v31 }
0x19d5   : > { %v2835_v56 = vsub.f32 %v2828_v52, %v2834_v55 }
0x19d7   : > { %v2836_v35 = vmul.f32 %v2835_v56, %v2835_v56 }
0x19d9   : > { %v2837_v57 = vsel %vm1389_vm0, %v2836_v35, 0.0 }
0x19da   : > { %2838 = vadd.xlane.f32.xlu2 %v2837_v57 }
0x1a4d   : > { %v2839_v60 = vpop.xlane.xlu2 %2838 }
0x1a4e   : > { %v2840_v61 = vmul.f32 %v2839_v60, %v4792_v31 }
0x1a50   : > { %v2841_v63 = vadd.f32 1e-05, %v2840_v61 }
0x1a52   : > { %3778 = vrsqrt.f32 %v2841_v63  ;;  %vm2848_vm12 = vweird.f32 %v2841_v63 }
0x1a58   : > { %v3779_v0 = vpop.eup %3778 }
0x1a59   : > { %v2843_v1 = vmul.f32 %v3779_v0, %v2841_v63  ;;  %vm2849_vm11 = vweird.f32 %v3779_v0 }
0x1a5a   : > { %vm2850_vm13 = vmor %vm2848_vm12, %vm2849_vm11 }
0x1a5b   : > { %v2844_v46 = vmul.f32 %v3779_v0, %v2843_v1 }
0x1a5d   : > { %v2845_v2 = vmul.f32 0.5, %v2844_v46 }
0x1a5f   : > { %v2846_v3 = vsub.f32 1.5, %v2845_v2 }
0x1a61   : > { %v2847_v5 = vmul.f32 %v3779_v0, %v2846_v3 }
0x1a63   : > { %v2851_v7 = vsel %vm2850_vm13, %v3779_v0, %v2847_v5 }
0x1a64   : > { %v2852_v27 = vmul.f32 %v2851_v7, %v2835_v56 }
0x1a66   : > { %v2856_v9 = vmul.f32 %v3729_v6, %v2852_v27 }
0x1a68   : > { %v2860_v10 = vadd.f32 %v3730_v8, %v2856_v9 }
0x1a6a   : > { %v2861_v31 = vpack.c.bf16 %v2860_v10, %v2860_v10 }
0x1a6c   : > { %3458 = vmatmul.msk.bf16.vlgmr.msrb.gmra.mxu0 %vm1389_vm0, %v2861_v31 }
0x1ae9   : > { %v2894_v14 = vpop.f32.mrf.mxu0 }
0x1aea   : > { %v2895_v15 = vadd.f32 %v3731_v12, %v2894_v14 }
0x1aec   : > { %2898 = vst [vmem:[%s1336_s22] sm:$0xff] %v2895_v15 }
0x1af1   : > { %v2896_v16 = vpop.f32.mrf.mxu0 }
0x1af2 PF: > { %s5050_s1 = sld [smem:[#allocation54_spill]] }
0x1af8   : > { %s89_s22 = sadd.s32 1, %s5050_s1  }
0x1af9   : > { %p86_p2 = scmp.ge.s32.totalorder %s89_s22, 4  }
0x1afb   :  { %88 = sbr.rel (!%p86_p2) target bundleno = 67 (0x43), region = 317 }
0x1b00   :  { %2918 = vsyncpa [#allocation3], 1 }
0x1b01   :  { %2920 = vsyncpa [#allocation3 + $0x1], 1 }
0x1b02   :  { %2921 = vsyncpa [#allocation5], 1 }
0x1b03   :  { %2922 = vsyncpa [#allocation8], 1 }
0x1b04   :  { %2923 = vsyncpa [#allocation11], 1 }
0x1b05   :  { %2924 = vsyncpa [#allocation14], 1 }
0x1b06   :  { %2925 = vsyncpa [#allocation17], 1 }
0x1b07   :  { %2926 = vsyncpa [#allocation20], 1 }
0x1b08   :  { %2927 = vsyncpa [#allocation23], 1 }

</bundles_post_ra>
